<compile_context>
chip_gen: v5e
topology: v5e:2x2
jax: 0.10.0
libtpu: 0.0.40
codegen_flags: <defaults>
</compile_context>

<pallas_src>
import jax
import jax.numpy as jnp
from jax.experimental import pallas as pl
from jax.experimental.pallas import tpu as pltpu

K_IN = 28 * 28          # 784 (= 98*8, sublane-aligned as a full-dim block)
N_OUT = 10
N_OUT_PAD = 128         # 10 padded to one lane-width for a dense output store
MAX_TM = 512            # batch-tile cap (fills MXU, amortizes step overhead)


def _round_up(x, m):
    return (x + m - 1) // m * m


def _choose_tm(b):
    """Pick the batch-tile size.

    * tiny B  : a single grid step, rounded up to 16 rows (bf16 packs 16 rows
                per vreg sublane group, so 8-row tiles leave vregs half-masked).
    * B >= 32 : at least 2 grid steps so v7x's two TensorCores both get work
                via dimension_semantics=("parallel",), capped at MAX_TM so the
                ~600-cycle per-step pipeline overhead is amortized and the
                256-wide MXU M dimension is filled on v6e/v7x.
    """
    if b < 32:
        return _round_up(max(b, 1), 16)
    return min(MAX_TM, _round_up((b + 1) // 2, 16))


def mlp_kernel(x_ref, w1_ref, b1_ref, w2_ref, b2_ref, w3_ref, b3_ref,
               w4_ref, b4_ref, o_ref):
    # All weights/biases are VMEM-resident (constant block index across the
    # grid); only the (TM, 784) f32 activation tile and (TM, 128) output tile
    # stream.  x is cast to bf16 in-kernel; every matmul uses bf16 operands
    # with f32 accumulation on the MXU.
    h = x_ref[...].astype(jnp.bfloat16)
    h = jnp.dot(h, w1_ref[...],
                preferred_element_type=jnp.float32) + b1_ref[...]
    h = jnp.maximum(h, 0.0).astype(jnp.bfloat16)
    h = jnp.dot(h, w2_ref[...],
                preferred_element_type=jnp.float32) + b2_ref[...]
    h = jnp.maximum(h, 0.0).astype(jnp.bfloat16)
    h = jnp.dot(h, w3_ref[...],
                preferred_element_type=jnp.float32) + b3_ref[...]
    h = jnp.maximum(h, 0.0).astype(jnp.bfloat16)
    o_ref[...] = jnp.dot(h, w4_ref[...],
                         preferred_element_type=jnp.float32) + b4_ref[...]


@jax.jit
def neural_network_forward(x, params):
    """x: (B, 28, 28) float32 -> logits (B, 10) float32."""
    b = x.shape[0]
    (w1, b1, w2, b2, w3, b3, w4, b4) = params

    # nn.Flatten(): row-major reshape of a contiguous array -> no data
    # movement.  x stays float32; the bf16 cast happens inside the kernel,
    # which removes the old HBM-bound wrapper cast/pad pre-pass.
    x_flat = x.reshape(b, K_IN)

    tm = _choose_tm(b)
    b_pad = _round_up(b, tm)
    if b_pad != b:
        # Only touches x when B is not already a tile multiple; padded rows
        # produce garbage logits that are sliced off below.
        x_flat = jnp.pad(x_flat, ((0, b_pad - b), (0, 0)))
    grid = (b_pad // tm,)

    def resident(shape):
        # Full-array block whose index never changes -> DMA'd once, then
        # stays in VMEM for every batch tile.  (pipeline_mode=pl.Buffered(1)
        # would save ~3 MiB more VMEM but is unnecessary at this footprint.)
        return pl.BlockSpec(shape, lambda i: (0, 0))

    in_specs = [
        pl.BlockSpec((tm, K_IN), lambda i: (i, 0)),       # x tile (streams)
        resident(w1.shape), resident(b1.shape),
        resident(w2.shape), resident(b2.shape),
        resident(w3.shape), resident(b3.shape),
        resident(w4.shape), resident(b4.shape),
    ]
    out_spec = pl.BlockSpec((tm, N_OUT_PAD), lambda i: (i, 0))

    out_padded = pl.pallas_call(
        mlp_kernel,
        out_shape=jax.ShapeDtypeStruct((b_pad, N_OUT_PAD), jnp.float32),
        grid=grid,
        in_specs=in_specs,
        out_specs=out_spec,
        compiler_params=pltpu.CompilerParams(
            dimension_semantics=("parallel",),   # megacore split on v7x
            vmem_limit_bytes=32 << 20,           # safe on v7x (64 MiB physical)
        ),
    )(x_flat, w1, b1, w2, b2, w3, b3, w4, b4)

    return out_padded[:b, :N_OUT]


def init_params(key):
    """Deterministic init mimicking torch.nn.Linear default (U(-k, k), k=1/sqrt(fan_in)).

    Weights stored (in, out) in bfloat16; biases (1, out) in float32.
    w4/b4 are zero-padded 10 -> 128 lanes (extra logits sliced off in the
    wrapper).
    """
    dims = [(K_IN, 512), (512, 1024), (1024, 512), (512, N_OUT)]
    raw = []
    keys = jax.random.split(key, 2 * len(dims))
    for i, (fan_in, fan_out) in enumerate(dims):
        bound = 1.0 / jnp.sqrt(fan_in)
        w = jax.random.uniform(keys[2 * i], (fan_in, fan_out),
                               minval=-bound, maxval=bound, dtype=jnp.float32)
        bvec = jax.random.uniform(keys[2 * i + 1], (1, fan_out),
                                  minval=-bound, maxval=bound, dtype=jnp.float32)
        raw.append((w, bvec))

    (w1, b1), (w2, b2), (w3, b3), (w4, b4) = raw

    # Pad layer-4 output dim to 128 lanes with zero weights / zero bias.
    w4p = jnp.zeros((512, N_OUT_PAD), jnp.float32).at[:, :N_OUT].set(w4)
    b4p = jnp.zeros((1, N_OUT_PAD), jnp.float32).at[:, :N_OUT].set(b4)

    return (w1.astype(jnp.bfloat16), b1,
            w2.astype(jnp.bfloat16), b2,
            w3.astype(jnp.bfloat16), b3,
            w4p.astype(jnp.bfloat16), b4p)


def reference_forward(x, params):
    """Pure-JAX reference replicating the kernel's bf16-operand / f32-accum math."""
    (w1, b1, w2, b2, w3, b3, w4, b4) = params
    h = x.reshape(x.shape[0], -1).astype(jnp.bfloat16)
    h = jnp.maximum(jnp.dot(h, w1, preferred_element_type=jnp.float32) + b1, 0.0)
    h = jnp.maximum(jnp.dot(h.astype(jnp.bfloat16), w2,
                            preferred_element_type=jnp.float32) + b2, 0.0)
    h = jnp.maximum(jnp.dot(h.astype(jnp.bfloat16), w3,
                            preferred_element_type=jnp.float32) + b3, 0.0)
    out = jnp.dot(h.astype(jnp.bfloat16), w4,
                  preferred_element_type=jnp.float32) + b4
    return out[:, :N_OUT]


if __name__ == "__main__":
    key = jax.random.PRNGKey(0)
    k_params, k_x = jax.random.split(key)

    params = init_params(k_params)

    B = 8
    x = jax.random.normal(k_x, (B, 28, 28), dtype=jnp.float32)

    logits = neural_network_forward(x, params)
    logits = jax.block_until_ready(logits)

    ref = reference_forward(x, params)
    assert logits.shape == (B, N_OUT), logits.shape
    assert jnp.allclose(logits, ref, atol=2e-2, rtol=2e-2), "mismatch vs reference"

    print("KERNEL_OK")
</pallas_src>

<mosaic_0001>
module attributes {stable_mosaic.version = 11 : i64} {
  func.func @mlp_kernel(%arg0: i32, %arg1: memref<16x784xf32, #tpu.memory_space<vmem>>, %arg2: memref<784x512xbf16, #tpu.memory_space<vmem>>, %arg3: memref<1x512xf32, #tpu.memory_space<vmem>>, %arg4: memref<512x1024xbf16, #tpu.memory_space<vmem>>, %arg5: memref<1x1024xf32, #tpu.memory_space<vmem>>, %arg6: memref<1024x512xbf16, #tpu.memory_space<vmem>>, %arg7: memref<1x512xf32, #tpu.memory_space<vmem>>, %arg8: memref<512x128xbf16, #tpu.memory_space<vmem>>, %arg9: memref<1x128xf32, #tpu.memory_space<vmem>>, %arg10: memref<16x128xf32, #tpu.memory_space<vmem>>) attributes {dimension_semantics = [#tpu.dimension_semantics<parallel>], iteration_bounds = array<i64: 1>, scalar_prefetch = 0 : i64, scratch_operands = 0 : i64, tpu.core_type = #tpu.core_type<tc>, window_params = [{transform_indices = @transform_0, window_bounds = array<i64: 16, 784>}, {pipeline_mode = #tpu.pipeline_mode<synchronous>, transform_indices = @transform_1, window_bounds = array<i64: 784, 512>}, {pipeline_mode = #tpu.pipeline_mode<synchronous>, transform_indices = @transform_2, window_bounds = array<i64: 1, 512>}, {pipeline_mode = #tpu.pipeline_mode<synchronous>, transform_indices = @transform_3, window_bounds = array<i64: 512, 1024>}, {pipeline_mode = #tpu.pipeline_mode<synchronous>, transform_indices = @transform_4, window_bounds = array<i64: 1, 1024>}, {pipeline_mode = #tpu.pipeline_mode<synchronous>, transform_indices = @transform_5, window_bounds = array<i64: 1024, 512>}, {pipeline_mode = #tpu.pipeline_mode<synchronous>, transform_indices = @transform_6, window_bounds = array<i64: 1, 512>}, {pipeline_mode = #tpu.pipeline_mode<synchronous>, transform_indices = @transform_7, window_bounds = array<i64: 512, 128>}, {pipeline_mode = #tpu.pipeline_mode<synchronous>, transform_indices = @transform_8, window_bounds = array<i64: 1, 128>}, {transform_indices = @transform_9, window_bounds = array<i64: 16, 128>}]} {
    %c0 = arith.constant 0 : index
    %c0_0 = arith.constant 0 : index
    %0 = vector.load %arg1[%c0, %c0_0] : memref<16x784xf32, #tpu.memory_space<vmem>>, vector<16x784xf32>
    %1 = arith.truncf %0 : vector<16x784xf32> to vector<16x784xbf16>
    %c0_1 = arith.constant 0 : index
    %c0_2 = arith.constant 0 : index
    %2 = vector.load %arg2[%c0_1, %c0_2] : memref<784x512xbf16, #tpu.memory_space<vmem>>, vector<784x512xbf16>
    %cst = arith.constant dense<0.000000e+00> : vector<16x512xf32>
    %3 = tpu.matmul %1, %2, %cst {dimension_numbers = #tpu.dot_dimension_numbers<[1], [0], [0], [1], [0, 0, 1, 1], [], []>} : vector<16x784xbf16>, vector<784x512xbf16>, vector<16x512xf32> -> vector<16x512xf32>
    %c0_3 = arith.constant 0 : index
    %c0_4 = arith.constant 0 : index
    %4 = vector.load %arg3[%c0_3, %c0_4] : memref<1x512xf32, #tpu.memory_space<vmem>>, vector<1x512xf32>
    %5 = vector.broadcast %4 : vector<1x512xf32> to vector<16x512xf32>
    %6 = arith.addf %3, %5 : vector<16x512xf32>
    %cst_5 = arith.constant 0.000000e+00 : f32
    %7 = vector.broadcast %cst_5 : f32 to vector<16x512xf32>
    %8 = arith.maximumf %6, %7 : vector<16x512xf32>
    %9 = arith.truncf %8 : vector<16x512xf32> to vector<16x512xbf16>
    %c0_6 = arith.constant 0 : index
    %c0_7 = arith.constant 0 : index
    %10 = vector.load %arg4[%c0_6, %c0_7] : memref<512x1024xbf16, #tpu.memory_space<vmem>>, vector<512x1024xbf16>
    %cst_8 = arith.constant dense<0.000000e+00> : vector<16x1024xf32>
    %11 = tpu.matmul %9, %10, %cst_8 {dimension_numbers = #tpu.dot_dimension_numbers<[1], [0], [0], [1], [0, 0, 1, 1], [], []>} : vector<16x512xbf16>, vector<512x1024xbf16>, vector<16x1024xf32> -> vector<16x1024xf32>
    %c0_9 = arith.constant 0 : index
    %c0_10 = arith.constant 0 : index
    %12 = vector.load %arg5[%c0_9, %c0_10] : memref<1x1024xf32, #tpu.memory_space<vmem>>, vector<1x1024xf32>
    %13 = vector.broadcast %12 : vector<1x1024xf32> to vector<16x1024xf32>
    %14 = arith.addf %11, %13 : vector<16x1024xf32>
    %cst_11 = arith.constant 0.000000e+00 : f32
    %15 = vector.broadcast %cst_11 : f32 to vector<16x1024xf32>
    %16 = arith.maximumf %14, %15 : vector<16x1024xf32>
    %17 = arith.truncf %16 : vector<16x1024xf32> to vector<16x1024xbf16>
    %c0_12 = arith.constant 0 : index
    %c0_13 = arith.constant 0 : index
    %18 = vector.load %arg6[%c0_12, %c0_13] : memref<1024x512xbf16, #tpu.memory_space<vmem>>, vector<1024x512xbf16>
    %cst_14 = arith.constant dense<0.000000e+00> : vector<16x512xf32>
    %19 = tpu.matmul %17, %18, %cst_14 {dimension_numbers = #tpu.dot_dimension_numbers<[1], [0], [0], [1], [0, 0, 1, 1], [], []>} : vector<16x1024xbf16>, vector<1024x512xbf16>, vector<16x512xf32> -> vector<16x512xf32>
    %c0_15 = arith.constant 0 : index
    %c0_16 = arith.constant 0 : index
    %20 = vector.load %arg7[%c0_15, %c0_16] : memref<1x512xf32, #tpu.memory_space<vmem>>, vector<1x512xf32>
    %21 = vector.broadcast %20 : vector<1x512xf32> to vector<16x512xf32>
    %22 = arith.addf %19, %21 : vector<16x512xf32>
    %cst_17 = arith.constant 0.000000e+00 : f32
    %23 = vector.broadcast %cst_17 : f32 to vector<16x512xf32>
    %24 = arith.maximumf %22, %23 : vector<16x512xf32>
    %25 = arith.truncf %24 : vector<16x512xf32> to vector<16x512xbf16>
    %c0_18 = arith.constant 0 : index
    %c0_19 = arith.constant 0 : index
    %26 = vector.load %arg8[%c0_18, %c0_19] : memref<512x128xbf16, #tpu.memory_space<vmem>>, vector<512x128xbf16>
    %cst_20 = arith.constant dense<0.000000e+00> : vector<16x128xf32>
    %27 = tpu.matmul %25, %26, %cst_20 {dimension_numbers = #tpu.dot_dimension_numbers<[1], [0], [0], [1], [0, 0, 1, 1], [], []>} : vector<16x512xbf16>, vector<512x128xbf16>, vector<16x128xf32> -> vector<16x128xf32>
    %c0_21 = arith.constant 0 : index
    %c0_22 = arith.constant 0 : index
    %28 = vector.load %arg9[%c0_21, %c0_22] : memref<1x128xf32, #tpu.memory_space<vmem>>, vector<1x128xf32>
    %29 = vector.broadcast %28 : vector<1x128xf32> to vector<16x128xf32>
    %30 = arith.addf %27, %29 : vector<16x128xf32>
    %c0_23 = arith.constant 0 : index
    %c0_24 = arith.constant 0 : index
    %31 = vector.load %arg10[%c0_23, %c0_24] : memref<16x128xf32, #tpu.memory_space<vmem>>, vector<16x128xf32>
    tpu.vector_store %arg10[%c0_23, %c0_24], %30 {strides = array<i32>} : memref<16x128xf32, #tpu.memory_space<vmem>>, vector<16x128xf32>,
    return
  }
  func.func @transform_0(%arg0: i32) -> (i32, i32) {
    %c0_i32 = arith.constant 0 : i32
    %c0_i32_0 = arith.constant 0 : i32
    return %arg0, %c0_i32 : i32, i32
  }
  func.func @transform_1(%arg0: i32) -> (i32, i32) {
    %c0_i32 = arith.constant 0 : i32
    %c0_i32_0 = arith.constant 0 : i32
    %c0_i32_1 = arith.constant 0 : i32
    return %c0_i32, %c0_i32_0 : i32, i32
  }
  func.func @transform_2(%arg0: i32) -> (i32, i32) {
    %c0_i32 = arith.constant 0 : i32
    %c0_i32_0 = arith.constant 0 : i32
    %c0_i32_1 = arith.constant 0 : i32
    return %c0_i32, %c0_i32_0 : i32, i32
  }
  func.func @transform_3(%arg0: i32) -> (i32, i32) {
    %c0_i32 = arith.constant 0 : i32
    %c0_i32_0 = arith.constant 0 : i32
    %c0_i32_1 = arith.constant 0 : i32
    return %c0_i32, %c0_i32_0 : i32, i32
  }
  func.func @transform_4(%arg0: i32) -> (i32, i32) {
    %c0_i32 = arith.constant 0 : i32
    %c0_i32_0 = arith.constant 0 : i32
    %c0_i32_1 = arith.constant 0 : i32
    return %c0_i32, %c0_i32_0 : i32, i32
  }
  func.func @transform_5(%arg0: i32) -> (i32, i32) {
    %c0_i32 = arith.constant 0 : i32
    %c0_i32_0 = arith.constant 0 : i32
    %c0_i32_1 = arith.constant 0 : i32
    return %c0_i32, %c0_i32_0 : i32, i32
  }
  func.func @transform_6(%arg0: i32) -> (i32, i32) {
    %c0_i32 = arith.constant 0 : i32
    %c0_i32_0 = arith.constant 0 : i32
    %c0_i32_1 = arith.constant 0 : i32
    return %c0_i32, %c0_i32_0 : i32, i32
  }
  func.func @transform_7(%arg0: i32) -> (i32, i32) {
    %c0_i32 = arith.constant 0 : i32
    %c0_i32_0 = arith.constant 0 : i32
    %c0_i32_1 = arith.constant 0 : i32
    return %c0_i32, %c0_i32_0 : i32, i32
  }
  func.func @transform_8(%arg0: i32) -> (i32, i32) {
    %c0_i32 = arith.constant 0 : i32
    %c0_i32_0 = arith.constant 0 : i32
    %c0_i32_1 = arith.constant 0 : i32
    return %c0_i32, %c0_i32_0 : i32, i32
  }
  func.func @transform_9(%arg0: i32) -> (i32, i32) {
    %c0_i32 = arith.constant 0 : i32
    %c0_i32_0 = arith.constant 0 : i32
    return %arg0, %c0_i32 : i32, i32
  }
}

</mosaic_0001>

<bundles_post_ra>
// kernel: neural_network_forward.1
= control target key start
LH: loop header
LB: loop body
LE: loop exit
PB: predicated region body
PF: predicated region fallthrough
CT: control target
= control target key end

     0   :  { %14 = vsyncpa [#allocation3], 0  ;;  %s10275_s0 = inlined_call_operand.vmem [shape: f32[16,784], index: 0, kind: input, shape index: {}]   ;;  %s10276_s1 = inlined_call_operand.hbm [shape: bf16[784,512], index: 1, kind: input, shape index: {}]   ;;  %s10277_s2 = inlined_call_operand.vmem [shape: f32[1,512], index: 2, kind: input, shape index: {}]   ;;  %s10278_s3 = inlined_call_operand.hbm [shape: bf16[512,1024], index: 3, kind: input, shape index: {}]   ;;  %s10279_s4 = inlined_call_operand.vmem [shape: f32[1,1024], index: 4, kind: input, shape index: {}]   ;;  %s10280_s5 = inlined_call_operand.hbm [shape: bf16[1024,512], index: 5, kind: input, shape index: {}]   ;;  %s10281_s6 = inlined_call_operand.vmem [shape: f32[1,512], index: 6, kind: input, shape index: {}]   ;;  %s10282_s7 = inlined_call_operand.vmem [shape: bf16[512,128], index: 7, kind: input, shape index: {}]   ;;  %s10283_s8 = inlined_call_operand.vmem [shape: f32[1,128], index: 8, kind: input, shape index: {}]   ;;  %s10284_s9 = inlined_call_operand.vmem [shape: f32[16,128], index: 9, kind: output, shape index: {}]  }
   0x1   :  { %15 = vsyncpa [#allocation5], 0  ;;  %s37_s11 = sshll.u32 %s10278_s3, 4  ;;  %s9840_s12 = smov [#allocation4]   ;;  %s38_s11 = int_to_ptr.hbm [resolvable:$true] %s37_s11 }
   0x2   :  { %s39_s13 = sshll.u32 %s9840_s12, 4  ;;  %s22_s16 = sshll.u32 %s10276_s1, 4  ;;  %s40_s13 = int_to_ptr.vmem [resolvable:$true] %s39_s13  ;;  %s23_s16 = int_to_ptr.hbm [resolvable:$true] %s22_s16 }
   0x3   :  { %s9841_s17 = smov 512   ;;  %s9842_s18 = smov 32  }
   0x4   :  { %45 = dma.hbm_to_vmem [thread:$0]  %s38_s11, 32768, %s40_s13, [#allocation5], %s9841_s17, %s9841_s17, %s9842_s18  }
   0x5   :  { %s9843_s19 = smov [#allocation2]   ;;  %s9844_s21 = smov 256  }
   0x6   :  { %s24_s20 = sshll.u32 %s9843_s19, 4  ;;  %s9845_s22 = smov 16   ;;  %s25_s20 = int_to_ptr.vmem [resolvable:$true] %s24_s20 }
   0x7   :  { %30 = dma.hbm_to_vmem [thread:$0]  %s23_s16, 25088, %s25_s20, [#allocation3], %s9844_s21, %s9844_s21, %s9845_s22  }
   0x8   :  { %s52_s24 = sshll.u32 %s10280_s5, 4  ;;  %s9846_s25 = smov [#allocation6]   ;;  %s53_s24 = int_to_ptr.hbm [resolvable:$true] %s52_s24 }
   0x9   :  { %s54_s26 = sshll.u32 %s9846_s25, 4  ;;  %s55_s26 = int_to_ptr.vmem [resolvable:$true] %s54_s26 }
   0xa   :  { %60 = dma.hbm_to_vmem [thread:$0]  %s53_s24, 32768, %s55_s26, [#allocation5], %s9844_s21, %s9844_s21, %s9845_s22  }
   0xb   :  { %9836 = dma.done.wait [#allocation3], 25088  }
   0xc   :  { %9837 = vsyncadd [#allocation3], 4294942208 }
   0xd   :  { %9838 = dma.done.wait [#allocation5], 65536  }
   0xe   :  { %9839 = vsyncadd [#allocation5], 4294901760  ;;  %v6165_v0 = vld [vmem:[#allocation2 + $0xe0] sm:$0xf]  ;;  %v9045_v1 = vld [vmem:[#allocation2 + $0xec] sm:$0xf0] }
   0xf   :  { %v6293_v2 = vld [vmem:[#allocation2 + $0x1e0] sm:$0xf]  ;;  %v6166_v3 = vor.u32 %v9045_v1, %v6165_v0  ;;  %v9077_v4 = vld [vmem:[#allocation2 + $0x1ec] sm:$0xf0]  ;;  %vm1287_vm0 = vcmask 130048  }
  0x10   :  { %v6421_v5 = vld [vmem:[#allocation2 + $0x2e0] sm:$0xf]  ;;  %v9109_v6 = vld [vmem:[#allocation2 + $0x2ec] sm:$0xf0]  ;;  %v6294_v7 = vor.u32 %v9077_v4, %v6293_v2 }
  0x11   :  { %v6422_v8 = vor.u32 %v9109_v6, %v6421_v5  ;;  %v6549_v9 = vld [vmem:[#allocation2 + $0x3e0] sm:$0xf]  ;;  %v9141_v10 = vld [vmem:[#allocation2 + $0x3ec] sm:$0xf0]  ;;  %1291 = vmatpush.bf16.msra.mxu0 %v6166_v3 }
  0x12   :  { %v6149_v11 = vld [vmem:[#allocation2 + $0xc0] sm:$0xf]  ;;  %v6550_v12 = vor.u32 %v9141_v10, %v6549_v9  ;;  %v9041_v13 = vld [vmem:[#allocation2 + $0xcc] sm:$0xf0]  ;;  %1305 = vmatpush.bf16.msra.mxu1 %v6294_v7 }
  0x13   :  { %v6277_v14 = vld [vmem:[#allocation2 + $0x1c0] sm:$0xf]  ;;  %v9073_v15 = vld [vmem:[#allocation2 + $0x1cc] sm:$0xf0]  ;;  %1319 = vmatpush.bf16.msra.mxu2 %v6422_v8  ;;  %v6150_v16 = vor.u32 %v9041_v13, %v6149_v11 }
  0x14   :  { %v6278_v17 = vor.u32 %v9073_v15, %v6277_v14  ;;  %v6405_v18 = vld [vmem:[#allocation2 + $0x2c0] sm:$0xf]  ;;  %v9105_v19 = vld [vmem:[#allocation2 + $0x2cc] sm:$0xf0]  ;;  %1333 = vmatpush.bf16.msra.mxu3 %v6550_v12 }
  0x15   :  { %v6533_v20 = vld [vmem:[#allocation2 + $0x3c0] sm:$0xf]  ;;  %v6406_v21 = vor.u32 %v9105_v19, %v6405_v18  ;;  %v9137_v22 = vld [vmem:[#allocation2 + $0x3cc] sm:$0xf0]  ;;  %1292 = vmatpush.bf16.msra.mxu0 %v6150_v16 }
  0x16   :  { %v6133_v23 = vld [vmem:[#allocation2 + $0xa0] sm:$0xf]  ;;  %v9037_v24 = vld [vmem:[#allocation2 + $0xac] sm:$0xf0]  ;;  %v6534_v25 = vor.u32 %v9137_v22, %v6533_v20  ;;  %1306 = vmatpush.bf16.msra.mxu1 %v6278_v17 }
  0x17   :  { %v6261_v26 = vld [vmem:[#allocation2 + $0x1a0] sm:$0xf]  ;;  %v9069_v27 = vld [vmem:[#allocation2 + $0x1ac] sm:$0xf0]  ;;  %v6134_v29 = vor.u32 %v9037_v24, %v6133_v23  ;;  %1320 = vmatpush.bf16.msra.mxu2 %v6406_v21 }
  0x18   :  { %v6389_v28 = vld [vmem:[#allocation2 + $0x2a0] sm:$0xf]  ;;  %v9101_v30 = vld [vmem:[#allocation2 + $0x2ac] sm:$0xf0]  ;;  %v6262_v33 = vor.u32 %v9069_v27, %v6261_v26  ;;  %1334 = vmatpush.bf16.msra.mxu3 %v6534_v25 }
  0x19   :  { %v6517_v31 = vld [vmem:[#allocation2 + $0x3a0] sm:$0xf]  ;;  %v9133_v32 = vld [vmem:[#allocation2 + $0x3ac] sm:$0xf0]  ;;  %v6390_v34 = vor.u32 %v9101_v30, %v6389_v28  ;;  %1293 = vmatpush.bf16.msra.mxu0 %v6134_v29 }
  0x1a   :  { %v6117_v35 = vld [vmem:[#allocation2 + $0x80] sm:$0xf]  ;;  %v9033_v36 = vld [vmem:[#allocation2 + $0x8c] sm:$0xf0]  ;;  %v6518_v38 = vor.u32 %v9133_v32, %v6517_v31  ;;  %1307 = vmatpush.bf16.msra.mxu1 %v6262_v33  ;;  %v9043_v32 = vld [vmem:[#allocation2 + $0xe4] sm:$0xf] }
  0x1b   :  { %v6245_v37 = vld [vmem:[#allocation2 + $0x180] sm:$0xf]  ;;  %v9065_v39 = vld [vmem:[#allocation2 + $0x18c] sm:$0xf0]  ;;  %v6118_v44 = vor.u32 %v9033_v36, %v6117_v35  ;;  %1321 = vmatpush.bf16.msra.mxu2 %v6390_v34  ;;  %v6167_v33 = vld [vmem:[#allocation2 + $0xf0] sm:$0xf0] }
  0x1c   :  { %v6373_v40 = vld [vmem:[#allocation2 + $0x280] sm:$0xf]  ;;  %v9097_v41 = vld [vmem:[#allocation2 + $0x28c] sm:$0xf0]  ;;  %v6246_v45 = vor.u32 %v9065_v39, %v6245_v37  ;;  %1335 = vmatpush.bf16.msra.mxu3 %v6518_v38  ;;  %v89_v36 = vld [vmem:[%s10275_s0 + $0x48] sm:$0xff] }
  0x1d   :  { %v6501_v42 = vld [vmem:[#allocation2 + $0x380] sm:$0xf]  ;;  %v9129_v43 = vld [vmem:[#allocation2 + $0x38c] sm:$0xf0]  ;;  %v6374_v46 = vor.u32 %v9097_v41, %v6373_v40  ;;  %1294 = vmatpush.bf16.msra.mxu0 %v6118_v44  ;;  %v9075_v41 = vld [vmem:[#allocation2 + $0x1e4] sm:$0xf] }
  0x1e   :  { %v6101_v47 = vld [vmem:[#allocation2 + $0x60] sm:$0xf]  ;;  %v9029_v48 = vld [vmem:[#allocation2 + $0x6c] sm:$0xf0]  ;;  %v6502_v50 = vor.u32 %v9129_v43, %v6501_v42  ;;  %1308 = vmatpush.bf16.msra.mxu1 %v6246_v45  ;;  %v87_v43 = vld [vmem:[%s10275_s0 + $0x38] sm:$0xff] }
  0x1f   :  { %v6229_v49 = vld [vmem:[#allocation2 + $0x160] sm:$0xf]  ;;  %v9061_v51 = vld [vmem:[#allocation2 + $0x16c] sm:$0xf0]  ;;  %v6102_v56 = vor.u32 %v9029_v48, %v6101_v47  ;;  %1322 = vmatpush.bf16.msra.mxu2 %v6374_v46  ;;  %v6295_v46 = vld [vmem:[#allocation2 + $0x1f0] sm:$0xf0] }
  0x20   :  { %v6357_v52 = vld [vmem:[#allocation2 + $0x260] sm:$0xf]  ;;  %v9093_v53 = vld [vmem:[#allocation2 + $0x26c] sm:$0xf0]  ;;  %v6230_v57 = vor.u32 %v9061_v51, %v6229_v49  ;;  %1336 = vmatpush.bf16.msra.mxu3 %v6502_v50  ;;  %v83_v47 = vld [vmem:[%s10275_s0 + $0x18] sm:$0xff]  ;;  %v6170_v50 = vor.u32 %v9043_v32, %v6167_v33 }
  0x21   :  { %v6485_v54 = vld [vmem:[#allocation2 + $0x360] sm:$0xf]  ;;  %v9125_v55 = vld [vmem:[#allocation2 + $0x36c] sm:$0xf0]  ;;  %v6358_v58 = vor.u32 %v9093_v53, %v6357_v52  ;;  %1295 = vmatpush.bf16.msra.mxu0 %v6102_v56 }
  0x22   :  { %v6085_v59 = vld [vmem:[#allocation2 + $0x40] sm:$0xf]  ;;  %v9025_v60 = vld [vmem:[#allocation2 + $0x4c] sm:$0xf0]  ;;  %v6486_v62 = vor.u32 %v9125_v55, %v6485_v54  ;;  %1309 = vmatpush.bf16.msra.mxu1 %v6230_v57  ;;  %v9039_v57 = vld [vmem:[#allocation2 + $0xc4] sm:$0xf] }
  0x23   :  { %v6213_v61 = vld [vmem:[#allocation2 + $0x140] sm:$0xf]  ;;  %v9057_v63 = vld [vmem:[#allocation2 + $0x14c] sm:$0xf0]  ;;  %v6086_v4 = vor.u32 %v9025_v60, %v6085_v59  ;;  %1323 = vmatpush.bf16.msra.mxu2 %v6358_v58  ;;  %v6151_v58 = vld [vmem:[#allocation2 + $0xd0] sm:$0xf0] }
  0x24   :  { %v6341_v0 = vld [vmem:[#allocation2 + $0x240] sm:$0xf]  ;;  %v9089_v1 = vld [vmem:[#allocation2 + $0x24c] sm:$0xf0]  ;;  %v6214_v6 = vor.u32 %v9057_v63, %v6213_v61  ;;  %1337 = vmatpush.bf16.msra.mxu3 %v6486_v62  ;;  %v81_v61 = vld [vmem:[%s10275_s0 + $0x8] sm:$0xff]  ;;  %v6298_v63 = vor.u32 %v9075_v41, %v6295_v46 }
  0x25   :  { %v6469_v2 = vld [vmem:[#allocation2 + $0x340] sm:$0xf]  ;;  %v9121_v3 = vld [vmem:[#allocation2 + $0x34c] sm:$0xf0]  ;;  %v6342_v7 = vor.u32 %v9089_v1, %v6341_v0  ;;  %1296 = vmatpush.bf16.msra.mxu0 %v6086_v4  ;;  %v9071_v1 = vld [vmem:[#allocation2 + $0x1c4] sm:$0xf]  ;;  %v6154_v4 = vor.u32 %v9039_v57, %v6151_v58 }
  0x26   :  { %v6069_v5 = vld [vmem:[#allocation2 + $0x20] sm:$0xf]  ;;  %v9021_v8 = vld [vmem:[#allocation2 + $0x2c] sm:$0xf0]  ;;  %v6470_v11 = vor.u32 %v9121_v3, %v6469_v2  ;;  %1310 = vmatpush.bf16.msra.mxu1 %v6214_v6  ;;  %v6279_v2 = vld [vmem:[#allocation2 + $0x1d0] sm:$0xf0] }
  0x27   :  { %v6197_v9 = vld [vmem:[#allocation2 + $0x120] sm:$0xf]  ;;  %v9053_v10 = vld [vmem:[#allocation2 + $0x12c] sm:$0xf0]  ;;  %v6070_v18 = vor.u32 %v9021_v8, %v6069_v5  ;;  %1324 = vmatpush.bf16.msra.mxu2 %v6342_v7  ;;  %v6231_v41 = vld [vmem:[#allocation2 + $0x170] sm:$0xf0] }
  0x28   :  { %v6325_v12 = vld [vmem:[#allocation2 + $0x220] sm:$0xf]  ;;  %v9085_v13 = vld [vmem:[#allocation2 + $0x22c] sm:$0xf0]  ;;  %v6198_v23 = vor.u32 %v9053_v10, %v6197_v9  ;;  %1338 = vmatpush.bf16.msra.mxu3 %v6470_v11  ;;  %v9035_v10 = vld [vmem:[#allocation2 + $0xa4] sm:$0xf] }
  0x29   :  { %v6453_v14 = vld [vmem:[#allocation2 + $0x320] sm:$0xf]  ;;  %v9117_v15 = vld [vmem:[#allocation2 + $0x32c] sm:$0xf0]  ;;  %v6326_v24 = vor.u32 %v9085_v13, %v6325_v12  ;;  %1297 = vmatpush.bf16.msra.mxu0 %v6070_v18  ;;  %v6135_v11 = vld [vmem:[#allocation2 + $0xb0] sm:$0xf0]  ;;  %v6282_v12 = vor.u32 %v9071_v1, %v6279_v2 }
  0x2a   :  { %v6053_v16 = vld [vmem:[#allocation2] sm:$0xf]  ;;  %v9017_v17 = vld [vmem:[#allocation2 + $0xc] sm:$0xf0]  ;;  %v6454_v28 = vor.u32 %v9117_v15, %v6453_v14  ;;  %1311 = vmatpush.bf16.msra.mxu1 %v6198_v23  ;;  %v9067_v14 = vld [vmem:[#allocation2 + $0x1a4] sm:$0xf] }
  0x2b   :  { %v6181_v19 = vld [vmem:[#allocation2 + $0x100] sm:$0xf]  ;;  %v9049_v20 = vld [vmem:[#allocation2 + $0x10c] sm:$0xf0]  ;;  %v6054_v35 = vor.u32 %v9017_v17, %v6053_v16  ;;  %1325 = vmatpush.bf16.msra.mxu2 %v6326_v24  ;;  %v6263_v15 = vld [vmem:[#allocation2 + $0x1b0] sm:$0xf0]  ;;  %v6138_v17 = vor.u32 %v9035_v10, %v6135_v11 }
  0x2c   :  { %v6309_v21 = vld [vmem:[#allocation2 + $0x200] sm:$0xf]  ;;  %v9081_v22 = vld [vmem:[#allocation2 + $0x20c] sm:$0xf0]  ;;  %v6182_v39 = vor.u32 %v9049_v20, %v6181_v19  ;;  %1339 = vmatpush.bf16.msra.mxu3 %v6454_v28  ;;  %v6119_v23 = vld [vmem:[#allocation2 + $0x90] sm:$0xf0]  ;;  %v6266_v24 = vor.u32 %v9067_v14, %v6263_v15 }
  0x2d   :  { %v6437_v25 = vld [vmem:[#allocation2 + $0x300] sm:$0xf]  ;;  %v9113_v26 = vld [vmem:[#allocation2 + $0x30c] sm:$0xf0]  ;;  %v6310_v40 = vor.u32 %v9081_v22, %v6309_v21  ;;  %1298 = vmatpush.bf16.msra.mxu0 %v6054_v35  ;;  %v9031_v22 = vld [vmem:[#allocation2 + $0x84] sm:$0xf] }
  0x2e   :  { %v6677_v27 = vld [vmem:[#allocation2 + $0x4e0] sm:$0xf]  ;;  %v9173_v29 = vld [vmem:[#allocation2 + $0x4ec] sm:$0xf0]  ;;  %v6438_v44 = vor.u32 %v9113_v26, %v6437_v25  ;;  %1312 = vmatpush.bf16.msra.mxu1 %v6182_v39  ;;  %v9063_v26 = vld [vmem:[#allocation2 + $0x184] sm:$0xf] }
  0x2f   :  { %v6805_v30 = vld [vmem:[#allocation2 + $0x5e0] sm:$0xf]  ;;  %v9205_v31 = vld [vmem:[#allocation2 + $0x5ec] sm:$0xf0]  ;;  %v6678_v45 = vor.u32 %v9173_v29, %v6677_v27  ;;  %1326 = vmatpush.bf16.msra.mxu2 %v6310_v40  ;;  %v6247_v27 = vld [vmem:[#allocation2 + $0x190] sm:$0xf0]  ;;  %v6122_v29 = vor.u32 %v9031_v22, %v6119_v23 }
  0x30   :  { %v82_v34 = vld [vmem:[%s10275_s0 + $0x10] sm:$0xff]  ;;  %v6821_v37 = vld [vmem:[#allocation2 + $0x600] sm:$0xf]  ;;  %v6806_v49 = vor.u32 %v9205_v31, %v6805_v30  ;;  %1340 = vmatpush.bf16.msra.mxu3 %v6438_v44  ;;  %v9059_v40 = vld [vmem:[#allocation2 + $0x164] sm:$0xf] }
  0x31   :  { %v9209_v38 = vld [vmem:[#allocation2 + $0x60c] sm:$0xf0]  ;;  %v80_v42 = vld [vmem:[%s10275_s0] sm:$0xff]  ;;  %v9924_v54 = vpack.c.bf16 %v89_v36, %v82_v34  ;;  %1347 = vmatpush.bf16.msrb.mxu0 %v6678_v45  ;;  %v6103_v35 = vld [vmem:[#allocation2 + $0x70] sm:$0xf0] }
  0x32   :  { %v90_v48 = vld [vmem:[%s10275_s0 + $0x50] sm:$0xff]  ;;  %v6661_v51 = vld [vmem:[#allocation2 + $0x4c0] sm:$0xf]  ;;  %v9926_v55 = vpack.c.bf16 %v87_v43, %v80_v42  ;;  %v6822_v59 = vor.u32 %v9209_v38, %v6821_v37  ;;  %1361 = vmatpush.bf16.msrb.mxu1 %v6806_v49  ;;  %v9027_v34 = vld [vmem:[#allocation2 + $0x64] sm:$0xf]  ;;  %v6250_v38 = vor.u32 %v9063_v26, %v6247_v27 }
  0x33   :  { %v9169_v52 = vld [vmem:[#allocation2 + $0x4cc] sm:$0xf0]  ;;  %v6789_v53 = vld [vmem:[#allocation2 + $0x5c0] sm:$0xf]  ;;  %v9928_v60 = vpack.c.bf16 %v90_v48, %v83_v47  ;;  %1327 = vmatmul.bf16.vlgmr.msra.gmra.mxu2 %v9924_v54  ;;  %v93_v37 = vld [vmem:[%s10275_s0 + $0x68] sm:$0xff]  ;;  %v6106_v43 = vor.u32 %v9027_v34, %v6103_v35 }
  0x34   :  { %v9201_v56 = vld [vmem:[#allocation2 + $0x5cc] sm:$0xf0]  ;;  %v88_v62 = vld [vmem:[%s10275_s0 + $0x40] sm:$0xff]  ;;  %v6662_v0 = vor.u32 %v9169_v52, %v6661_v51  ;;  %1389 = vmatpush.bf16.msrb.mxu3 %v6170_v50  ;;  %1299 = vmatmul.bf16.vlgmr.msra.gmra.mxu0 %v9926_v55  ;;  %v6087_v49 = vld [vmem:[#allocation2 + $0x50] sm:$0xf0]  ;;  %v6234_v51 = vor.u32 %v9059_v40, %v6231_v41 }
  0x35   :  { %v6790_v3 = vor.u32 %v9201_v56, %v6789_v53  ;;  %v6645_v5 = vld [vmem:[#allocation2 + $0x4a0] sm:$0xf]  ;;  %v9165_v6 = vld [vmem:[#allocation2 + $0x4ac] sm:$0xf0]  ;;  %v9938_v8 = vpack.c.bf16 %v88_v62, %v81_v61  ;;  %1382 = vmatpush.bf16.msrb.mxu2 %v6822_v59  ;;  %1341 = vmatmul.bf16.vlgmr.msra.gmra.mxu3 %v9928_v60  ;;  %v9023_v48 = vld [vmem:[#allocation2 + $0x44] sm:$0xf] }
  0x36   :  { %v6773_v7 = vld [vmem:[#allocation2 + $0x5a0] sm:$0xf]  ;;  %v9197_v9 = vld [vmem:[#allocation2 + $0x5ac] sm:$0xf0]  ;;  %1348 = vmatpush.bf16.msrb.mxu0 %v6662_v0  ;;  %v6646_v13 = vor.u32 %v9165_v6, %v6645_v5  ;;  %v9055_v53 = vld [vmem:[#allocation2 + $0x144] sm:$0xf]  ;;  %v6090_v58 = vor.u32 %v9023_v48, %v6087_v49 }
  0x37   :  { %1362 = vmatpush.bf16.msrb.mxu1 %v6790_v3  ;;  %v6774_v16 = vor.u32 %v9197_v9, %v6773_v7  ;;  %v6629_v18 = vld [vmem:[#allocation2 + $0x480] sm:$0xf]  ;;  %v9161_v19 = vld [vmem:[#allocation2 + $0x48c] sm:$0xf0]  ;;  %v6215_v56 = vld [vmem:[#allocation2 + $0x150] sm:$0xf0] }
  0x38   :  { %1390 = vmatpush.bf16.msrb.mxu3 %v6154_v4  ;;  %v6757_v20 = vld [vmem:[#allocation2 + $0x580] sm:$0xf]  ;;  %1313 = vmatmul.bf16.vlgmr.msra.gmra.mxu1 %v9938_v8  ;;  %v9193_v21 = vld [vmem:[#allocation2 + $0x58c] sm:$0xf0]  ;;  %v6630_v25 = vor.u32 %v9161_v19, %v6629_v18  ;;  %v9019_v0 = vld [vmem:[#allocation2 + $0x24] sm:$0xf]  ;;  %v6218_v4 = vor.u32 %v9055_v53, %v6215_v56 }
  0x39   :  { %1403 = vmatpush.bf16.msra.mxu2 %v6298_v63  ;;  %v6758_v28 = vor.u32 %v9193_v21, %v6757_v20  ;;  %v6613_v30 = vld [vmem:[#allocation2 + $0x460] sm:$0xf]  ;;  %v9157_v31 = vld [vmem:[#allocation2 + $0x46c] sm:$0xf0]  ;;  %v6071_v1 = vld [vmem:[#allocation2 + $0x30] sm:$0xf0] }
  0x3a   :  { %1349 = vmatpush.bf16.msrb.mxu0 %v6646_v13  ;;  %v6741_v32 = vld [vmem:[#allocation2 + $0x560] sm:$0xf]  ;;  %v9189_v33 = vld [vmem:[#allocation2 + $0x56c] sm:$0xf0]  ;;  %v6614_v39 = vor.u32 %v9157_v31, %v6613_v30  ;;  %v9051_v2 = vld [vmem:[#allocation2 + $0x124] sm:$0xf]  ;;  %v6074_v11 = vor.u32 %v9019_v0, %v6071_v1 }
  0x3b   :  { %1363 = vmatpush.bf16.msrb.mxu1 %v6774_v16  ;;  %v86_v36 = vld [vmem:[%s10275_s0 + $0x30] sm:$0xff]  ;;  %v6742_v42 = vor.u32 %v9189_v33, %v6741_v32  ;;  %v6597_v44 = vld [vmem:[#allocation2 + $0x440] sm:$0xf]  ;;  %v9015_v13 = vld [vmem:[#allocation2 + $0x4] sm:$0xf] }
  0x3c   :  { %1391 = vmatpush.bf16.msrb.mxu3 %v6138_v17  ;;  %v9153_v45 = vld [vmem:[#allocation2 + $0x44c] sm:$0xf0]  ;;  %v6725_v46 = vld [vmem:[#allocation2 + $0x540] sm:$0xf]  ;;  %v9948_v50 = vpack.c.bf16 %v93_v37, %v86_v36  ;;  %v6199_v3 = vld [vmem:[#allocation2 + $0x130] sm:$0xf0] }
  0x3d   :  { %1404 = vmatpush.bf16.msra.mxu2 %v6282_v12  ;;  %v9185_v47 = vld [vmem:[#allocation2 + $0x54c] sm:$0xf0]  ;;  %v6598_v52 = vor.u32 %v9153_v45, %v6597_v44  ;;  %v6581_v59 = vld [vmem:[#allocation2 + $0x420] sm:$0xf]  ;;  %v6055_v14 = vld [vmem:[#allocation2 + $0x10] sm:$0xf0]  ;;  %v6202_v21 = vor.u32 %v9051_v2, %v6199_v3 }
  0x3e   :  { %1350 = vmatpush.bf16.msrb.mxu0 %v6630_v25  ;;  %v6726_v57 = vor.u32 %v9185_v47, %v6725_v46  ;;  %v9149_v61 = vld [vmem:[#allocation2 + $0x42c] sm:$0xf0]  ;;  %v6709_v62 = vld [vmem:[#allocation2 + $0x520] sm:$0xf]  ;;  %v9107_v15 = vld [vmem:[#allocation2 + $0x2e4] sm:$0xf]  ;;  %v6058_v27 = vor.u32 %v9015_v13, %v6055_v14 }
  0x3f   :  { %1364 = vmatpush.bf16.msrb.mxu1 %v6758_v28  ;;  %v9181_v63 = vld [vmem:[#allocation2 + $0x52c] sm:$0xf0]  ;;  %v6582_v5 = vor.u32 %v9149_v61, %v6581_v59  ;;  %v6565_v6 = vld [vmem:[#allocation2 + $0x400] sm:$0xf]  ;;  %v6423_v16 = vld [vmem:[#allocation2 + $0x2f0] sm:$0xf0] }
  0x40   :  { %1392 = vmatpush.bf16.msrb.mxu3 %v6122_v29  ;;  %v9145_v7 = vld [vmem:[#allocation2 + $0x40c] sm:$0xf0]  ;;  %v6693_v9 = vld [vmem:[#allocation2 + $0x500] sm:$0xf]  ;;  %v6710_v10 = vor.u32 %v9181_v63, %v6709_v62  ;;  %v9139_v17 = vld [vmem:[#allocation2 + $0x3e4] sm:$0xf]  ;;  %v6426_v31 = vor.u32 %v9107_v15, %v6423_v16 }
  0x41   :  { %1405 = vmatpush.bf16.msra.mxu2 %v6266_v24  ;;  %v9177_v12 = vld [vmem:[#allocation2 + $0x50c] sm:$0xf0]  ;;  %v6551_v18 = vld [vmem:[#allocation2 + $0x3f0] sm:$0xf0]  ;;  %v9171_v19 = vld [vmem:[#allocation2 + $0x4e4] sm:$0xf]  ;;  %v6566_v22 = vor.u32 %v9145_v7, %v6565_v6 }
  0x42   :  { %1351 = vmatpush.bf16.msrb.mxu0 %v6614_v39  ;;  %v6679_v20 = vld [vmem:[#allocation2 + $0x4f0] sm:$0xf0]  ;;  %v84_v23 = vld [vmem:[%s10275_s0 + $0x20] sm:$0xff]  ;;  %v91_v24 = vld [vmem:[%s10275_s0 + $0x58] sm:$0xff]  ;;  %v6694_v26 = vor.u32 %v9177_v12, %v6693_v9  ;;  %v6554_v32 = vor.u32 %v9139_v17, %v6551_v18 }
  0x43   :  { %1365 = vmatpush.bf16.msrb.mxu1 %v6742_v42  ;;  %6835 = vmatmul.msk.bf16.vlgmr.msrb.gmra.mxu2 %vm1287_vm0, %v9948_v50  ;;  %v9047_v25 = vld [vmem:[#allocation2 + $0x104] sm:$0xf]  ;;  %v6183_v28 = vld [vmem:[#allocation2 + $0x110] sm:$0xf0]  ;;  %v85_v29 = vld [vmem:[%s10275_s0 + $0x28] sm:$0xff]  ;;  %v6682_v36 = vor.u32 %v9171_v19, %v6679_v20  ;;  %v9964_v37 = vpack.c.bf16 %v91_v24, %v84_v23 }
  0x44   :  { %1393 = vmatpush.bf16.msrb.mxu3 %v6106_v43  ;;  %v92_v30 = vld [vmem:[%s10275_s0 + $0x60] sm:$0xff]  ;;  %v6807_v34 = vld [vmem:[#allocation2 + $0x5f0] sm:$0xf0]  ;;  %v6186_v41 = vor.u32 %v9047_v25, %v6183_v28 }
  0x45   :  { %1406 = vmatpush.bf16.msra.mxu2 %v6250_v38  ;;  %v9203_v33 = vld [vmem:[#allocation2 + $0x5e4] sm:$0xf]  ;;  %v6407_v38 = vld [vmem:[#allocation2 + $0x2d0] sm:$0xf0]  ;;  %v9966_v42 = vpack.c.bf16 %v92_v30, %v85_v29 }
  0x46   :  { %1352 = vmatpush.bf16.msrb.mxu0 %v6598_v52  ;;  %v9103_v35 = vld [vmem:[#allocation2 + $0x2c4] sm:$0xf]  ;;  %v6535_v40 = vld [vmem:[#allocation2 + $0x3d0] sm:$0xf0]  ;;  %v6810_v45 = vor.u32 %v9203_v33, %v6807_v34 }
  0x47   :  { %1366 = vmatpush.bf16.msrb.mxu1 %v6726_v57  ;;  %v9135_v39 = vld [vmem:[#allocation2 + $0x3c4] sm:$0xf]  ;;  %v6663_v44 = vld [vmem:[#allocation2 + $0x4d0] sm:$0xf0]  ;;  %v6410_v46 = vor.u32 %v9103_v35, %v6407_v38 }
  0x48   :  { %1394 = vmatpush.bf16.msrb.mxu3 %v6090_v58  ;;  %v9167_v43 = vld [vmem:[#allocation2 + $0x4c4] sm:$0xf]  ;;  %v6538_v47 = vor.u32 %v9135_v39, %v6535_v40  ;;  %v6791_v49 = vld [vmem:[#allocation2 + $0x5d0] sm:$0xf0] }
  0x49   :  { %1407 = vmatpush.bf16.msra.mxu2 %v6234_v51  ;;  %v9199_v48 = vld [vmem:[#allocation2 + $0x5c4] sm:$0xf]  ;;  %v6666_v52 = vor.u32 %v9167_v43, %v6663_v44  ;;  %v6391_v53 = vld [vmem:[#allocation2 + $0x2b0] sm:$0xf0] }
  0x4a   :  { %1353 = vmatpush.bf16.msrb.mxu0 %v6582_v5  ;;  %v9099_v51 = vld [vmem:[#allocation2 + $0x2a4] sm:$0xf]  ;;  %v6519_v57 = vld [vmem:[#allocation2 + $0x3b0] sm:$0xf0]  ;;  %v6794_v61 = vor.u32 %v9199_v48, %v6791_v49 }
  0x4b   :  { %1367 = vmatpush.bf16.msrb.mxu1 %v6710_v10  ;;  %v9131_v56 = vld [vmem:[#allocation2 + $0x3a4] sm:$0xf]  ;;  %v6647_v59 = vld [vmem:[#allocation2 + $0x4b0] sm:$0xf0]  ;;  %v6394_v62 = vor.u32 %v9099_v51, %v6391_v53 }
  0x4c   :  { %1395 = vmatpush.bf16.msrb.mxu3 %v6074_v11  ;;  %v9163_v58 = vld [vmem:[#allocation2 + $0x4a4] sm:$0xf]  ;;  %v6522_v63 = vor.u32 %v9131_v56, %v6519_v57  ;;  %v6775_v1 = vld [vmem:[#allocation2 + $0x5b0] sm:$0xf0] }
  0x4d   :  { %1408 = vmatpush.bf16.msra.mxu2 %v6218_v4  ;;  %v9195_v0 = vld [vmem:[#allocation2 + $0x5a4] sm:$0xf]  ;;  %v6650_v3 = vor.u32 %v9163_v58, %v6647_v59  ;;  %v6375_v4 = vld [vmem:[#allocation2 + $0x290] sm:$0xf0] }
  0x4e   :  { %1354 = vmatpush.bf16.msrb.mxu0 %v6566_v22  ;;  %v9095_v2 = vld [vmem:[#allocation2 + $0x284] sm:$0xf]  ;;  %v6503_v6 = vld [vmem:[#allocation2 + $0x390] sm:$0xf0]  ;;  %v6778_v10 = vor.u32 %v9195_v0, %v6775_v1  ;;  %v6173_v0 = vld [vmem:[#allocation2 + $0xe8] sm:$0xf] }
  0x4f   :  { %1368 = vmatpush.bf16.msrb.mxu1 %v6694_v26  ;;  %v9127_v5 = vld [vmem:[#allocation2 + $0x384] sm:$0xf]  ;;  %v6631_v9 = vld [vmem:[#allocation2 + $0x490] sm:$0xf0]  ;;  %v6378_v11 = vor.u32 %v9095_v2, %v6375_v4  ;;  %v9046_v1 = vld [vmem:[#allocation2 + $0xf4] sm:$0xf0] }
  0x50   :  { %1396 = vmatpush.bf16.msrb.mxu3 %v6058_v27  ;;  %v9159_v7 = vld [vmem:[#allocation2 + $0x484] sm:$0xf]  ;;  %v6506_v12 = vor.u32 %v9127_v5, %v6503_v6  ;;  %v6759_v14 = vld [vmem:[#allocation2 + $0x590] sm:$0xf0]  ;;  %v6429_v5 = vld [vmem:[#allocation2 + $0x2e8] sm:$0xf] }
  0x51   :  { %1409 = vmatpush.bf16.msra.mxu2 %v6202_v21  ;;  %1355 = vmatmul.bf16.vlgmr.msrb.gmra.mxu0 %v9964_v37  ;;  %v9191_v13 = vld [vmem:[#allocation2 + $0x584] sm:$0xf]  ;;  %v6634_v16 = vor.u32 %v9159_v7, %v6631_v9  ;;  %v6359_v17 = vld [vmem:[#allocation2 + $0x270] sm:$0xf0]  ;;  %v9110_v6 = vld [vmem:[#allocation2 + $0x2f4] sm:$0xf0] }
  0x52   :  { %1417 = vmatpush.bf16.msra.mxu0 %v6426_v31  ;;  %1369 = vmatmul.bf16.vlgmr.msrb.gmra.mxu1 %v9966_v42  ;;  %v9091_v15 = vld [vmem:[#allocation2 + $0x264] sm:$0xf]  ;;  %v6487_v19 = vld [vmem:[#allocation2 + $0x370] sm:$0xf0]  ;;  %v6762_v22 = vor.u32 %v9191_v13, %v6759_v14  ;;  %v6174_v13 = vor.u32 %v9046_v1, %v6173_v0  ;;  %v6557_v14 = vld [vmem:[#allocation2 + $0x3e8] sm:$0xf] }
  0x53   :  { %1431 = vmatpush.bf16.msra.mxu1 %v6554_v32  ;;  %1397 = vmatmul.bf16.vlgmr.msrb.gmra.mxu3 %v9926_v55  ;;  %v9123_v18 = vld [vmem:[#allocation2 + $0x364] sm:$0xf]  ;;  %v6615_v21 = vld [vmem:[#allocation2 + $0x470] sm:$0xf0]  ;;  %v6362_v23 = vor.u32 %v9091_v15, %v6359_v17  ;;  %v9142_v15 = vld [vmem:[#allocation2 + $0x3f4] sm:$0xf0] }
  0x54   :  { %1445 = vmatpush.bf16.msra.mxu3 %v6682_v36  ;;  %v9155_v20 = vld [vmem:[#allocation2 + $0x464] sm:$0xf]  ;;  %v6490_v24 = vor.u32 %v9123_v18, %v6487_v19  ;;  %v6743_v26 = vld [vmem:[#allocation2 + $0x570] sm:$0xf0]  ;;  %v6301_v17 = vld [vmem:[#allocation2 + $0x1e8] sm:$0xf]  ;;  %v6430_v19 = vor.u32 %v9110_v6, %v6429_v5 }
  0x55   :  { %1410 = vmatpush.bf16.msra.mxu2 %v6186_v41  ;;  %v9187_v25 = vld [vmem:[#allocation2 + $0x564] sm:$0xf]  ;;  %v6618_v28 = vor.u32 %v9155_v20, %v6615_v21  ;;  %v6343_v29 = vld [vmem:[#allocation2 + $0x250] sm:$0xf0]  ;;  %v9078_v18 = vld [vmem:[#allocation2 + $0x1f4] sm:$0xf0] }
  0x56   :  { %1418 = vmatpush.bf16.msra.mxu0 %v6410_v46  ;;  %v9087_v27 = vld [vmem:[#allocation2 + $0x244] sm:$0xf]  ;;  %v6471_v31 = vld [vmem:[#allocation2 + $0x350] sm:$0xf0]  ;;  %v6746_v34 = vor.u32 %v9187_v25, %v6743_v26  ;;  %v6157_v21 = vld [vmem:[#allocation2 + $0xc8] sm:$0xf]  ;;  %v6302_v26 = vor.u32 %v9078_v18, %v6301_v17 }
  0x57   :  { %1432 = vmatpush.bf16.msra.mxu1 %v6538_v47  ;;  %v9119_v30 = vld [vmem:[#allocation2 + $0x344] sm:$0xf]  ;;  %v6599_v33 = vld [vmem:[#allocation2 + $0x450] sm:$0xf0]  ;;  %v6346_v35 = vor.u32 %v9087_v27, %v6343_v29  ;;  %v9106_v25 = vld [vmem:[#allocation2 + $0x2d4] sm:$0xf0] }
  0x58   :  { %1446 = vmatpush.bf16.msra.mxu3 %v6666_v52  ;;  %1411 = vmatmul.bf16.vlgmr.msra.gmra.mxu2 %v9938_v8  ;;  %v9151_v32 = vld [vmem:[#allocation2 + $0x444] sm:$0xf]  ;;  %v6474_v36 = vor.u32 %v9119_v30, %v6471_v31  ;;  %v6727_v39 = vld [vmem:[#allocation2 + $0x550] sm:$0xf0]  ;;  %v6541_v27 = vld [vmem:[#allocation2 + $0x3c8] sm:$0xf] }
  0x59   :  { %1459 = vmatpush.bf16.msrb.mxu2 %v6810_v45  ;;  %v9183_v38 = vld [vmem:[#allocation2 + $0x544] sm:$0xf]  ;;  %v6602_v41 = vor.u32 %v9151_v32, %v6599_v33  ;;  %v6327_v43 = vld [vmem:[#allocation2 + $0x230] sm:$0xf0]  ;;  %v6285_v30 = vld [vmem:[#allocation2 + $0x1c8] sm:$0xf] }
  0x5a   :  { %1419 = vmatpush.bf16.msra.mxu0 %v6394_v62  ;;  %v9083_v40 = vld [vmem:[#allocation2 + $0x224] sm:$0xf]  ;;  %v6455_v45 = vld [vmem:[#allocation2 + $0x330] sm:$0xf0]  ;;  %v6730_v48 = vor.u32 %v9183_v38, %v6727_v39  ;;  %v9074_v31 = vld [vmem:[#allocation2 + $0x1d4] sm:$0xf0] }
  0x5b   :  { %1433 = vmatpush.bf16.msra.mxu1 %v6522_v63  ;;  %v9115_v44 = vld [vmem:[#allocation2 + $0x324] sm:$0xf]  ;;  %v6583_v47 = vld [vmem:[#allocation2 + $0x430] sm:$0xf0]  ;;  %v6330_v52 = vor.u32 %v9083_v40, %v6327_v43  ;;  %v6141_v33 = vld [vmem:[#allocation2 + $0xa8] sm:$0xf]  ;;  %v6286_v39 = vor.u32 %v9074_v31, %v6285_v30 }
  0x5c   :  { %1447 = vmatpush.bf16.msra.mxu3 %v6650_v3  ;;  %v9147_v46 = vld [vmem:[#allocation2 + $0x424] sm:$0xf]  ;;  %v6711_v51 = vld [vmem:[#allocation2 + $0x530] sm:$0xf0]  ;;  %v6458_v53 = vor.u32 %v9115_v44, %v6455_v45  ;;  %v9102_v38 = vld [vmem:[#allocation2 + $0x2b4] sm:$0xf0] }
  0x5d   :  { %1460 = vmatpush.bf16.msrb.mxu2 %v6794_v61  ;;  %v9179_v49 = vld [vmem:[#allocation2 + $0x524] sm:$0xf]  ;;  %v6311_v57 = vld [vmem:[#allocation2 + $0x210] sm:$0xf0]  ;;  %v6586_v59 = vor.u32 %v9147_v46, %v6583_v47  ;;  %v6525_v40 = vld [vmem:[#allocation2 + $0x3a8] sm:$0xf] }
  0x5e   :  { %1420 = vmatpush.bf16.msra.mxu0 %v6378_v11  ;;  %v9079_v56 = vld [vmem:[#allocation2 + $0x204] sm:$0xf]  ;;  %v6439_v61 = vld [vmem:[#allocation2 + $0x310] sm:$0xf0]  ;;  %v6714_v3 = vor.u32 %v9179_v49, %v6711_v51  ;;  %v6269_v44 = vld [vmem:[#allocation2 + $0x1a8] sm:$0xf] }
  0x5f   :  { %1434 = vmatpush.bf16.msra.mxu1 %v6506_v12  ;;  %v9111_v58 = vld [vmem:[#allocation2 + $0x304] sm:$0xf]  ;;  %v6567_v63 = vld [vmem:[#allocation2 + $0x410] sm:$0xf0]  ;;  %v6314_v7 = vor.u32 %v9079_v56, %v6311_v57  ;;  %v9070_v45 = vld [vmem:[#allocation2 + $0x1b4] sm:$0xf0] }
  0x60   :  { %1448 = vmatpush.bf16.msra.mxu3 %v6634_v16  ;;  %v9143_v62 = vld [vmem:[#allocation2 + $0x404] sm:$0xf]  ;;  %v6823_v4 = vld [vmem:[#allocation2 + $0x610] sm:$0xf0]  ;;  %v6442_v9 = vor.u32 %v9111_v58, %v6439_v61  ;;  %v6125_v47 = vld [vmem:[#allocation2 + $0x88] sm:$0xf] }
  0x61   :  { %1461 = vmatpush.bf16.msrb.mxu2 %v6778_v10  ;;  %v9207_v2 = vld [vmem:[#allocation2 + $0x604] sm:$0xf]  ;;  %v6695_v11 = vld [vmem:[#allocation2 + $0x510] sm:$0xf0]  ;;  %v6570_v12 = vor.u32 %v9143_v62, %v6567_v63  ;;  %v6381_v51 = vld [vmem:[#allocation2 + $0x288] sm:$0xf] }
  0x62   :  { %1421 = vmatpush.bf16.msra.mxu0 %v6362_v23  ;;  %v9175_v10 = vld [vmem:[#allocation2 + $0x504] sm:$0xf]  ;;  %v6826_v16 = vor.u32 %v9207_v2, %v6823_v4  ;;  %v6558_v23 = vor.u32 %v9142_v15, %v6557_v14  ;;  %v6509_v56 = vld [vmem:[#allocation2 + $0x388] sm:$0xf]  ;;  %v9130_v57 = vld [vmem:[#allocation2 + $0x394] sm:$0xf0] }
  0x63   :  { %1435 = vmatpush.bf16.msra.mxu1 %v6490_v24  ;;  %v6698_v20 = vor.u32 %v9175_v10, %v6695_v11  ;;  %v6413_v24 = vld [vmem:[#allocation2 + $0x2c8] sm:$0xf]  ;;  %v9066_v61 = vld [vmem:[#allocation2 + $0x194] sm:$0xf0]  ;;  %v6510_v1 = vor.u32 %v9130_v57, %v6509_v56  ;;  %v9044_v56 = vld [vmem:[#allocation2 + $0xec] sm:$0xf] }
  0x64   :  { %1449 = vmatpush.bf16.msra.mxu3 %v6618_v28  ;;  %v9138_v28 = vld [vmem:[#allocation2 + $0x3d4] sm:$0xf0]  ;;  %v6414_v32 = vor.u32 %v9106_v25, %v6413_v24  ;;  %v6109_v63 = vld [vmem:[#allocation2 + $0x68] sm:$0xf]  ;;  %v6175_v57 = vld [vmem:[#allocation2 + $0xf8] sm:$0xf0] }
  0x65   :  { %1462 = vmatpush.bf16.msrb.mxu2 %v6762_v22  ;;  %v9042_v22 = vld [vmem:[#allocation2 + $0xd4] sm:$0xf0]  ;;  %v6365_v2 = vld [vmem:[#allocation2 + $0x268] sm:$0xf] }
  0x66   :  { %1422 = vmatpush.bf16.msra.mxu0 %v6346_v35  ;;  %v6158_v29 = vor.u32 %v9042_v22, %v6157_v21  ;;  %v6542_v35 = vor.u32 %v9138_v28, %v6541_v27  ;;  %v9030_v0 = vld [vmem:[#allocation2 + $0x74] sm:$0xf0]  ;;  %v6493_v5 = vld [vmem:[#allocation2 + $0x368] sm:$0xf] }
  0x67   :  { %1436 = vmatpush.bf16.msra.mxu1 %v6474_v36  ;;  %v6397_v36 = vld [vmem:[#allocation2 + $0x2a8] sm:$0xf]  ;;  %v9126_v6 = vld [vmem:[#allocation2 + $0x374] sm:$0xf0] }
  0x68   :  { %1450 = vmatpush.bf16.msra.mxu3 %v6602_v41  ;;  %v9134_v41 = vld [vmem:[#allocation2 + $0x3b4] sm:$0xf0]  ;;  %v6398_v46 = vor.u32 %v9102_v38, %v6397_v36  ;;  %v6494_v14 = vor.u32 %v9126_v6, %v6493_v5  ;;  %v6349_v15 = vld [vmem:[#allocation2 + $0x248] sm:$0xf]  ;;  %v6178_v6 = vor.u32 %v9044_v56, %v6175_v57 }
  0x69   :  { %1463 = vmatpush.bf16.msrb.mxu2 %v6746_v34  ;;  %v9038_v34 = vld [vmem:[#allocation2 + $0xb4] sm:$0xf0]  ;;  %v6526_v49 = vor.u32 %v9134_v41, %v6525_v40  ;;  %v6477_v18 = vld [vmem:[#allocation2 + $0x348] sm:$0xf] }
  0x6a   :  { %1423 = vmatpush.bf16.msra.mxu0 %v6330_v52  ;;  %v6142_v43 = vor.u32 %v9038_v34, %v6141_v33  ;;  %v9098_v52 = vld [vmem:[#allocation2 + $0x294] sm:$0xf0]  ;;  %v6221_v21 = vld [vmem:[#allocation2 + $0x148] sm:$0xf] }
  0x6b   :  { %1437 = vmatpush.bf16.msra.mxu1 %v6458_v53  ;;  %v6270_v53 = vor.u32 %v9070_v45, %v6269_v44  ;;  %v6382_v62 = vor.u32 %v9098_v52, %v6381_v51  ;;  %v9062_v10 = vld [vmem:[#allocation2 + $0x174] sm:$0xf0]  ;;  %v6077_v24 = vld [vmem:[#allocation2 + $0x28] sm:$0xf] }
  0x6c   :  { %1451 = vmatpush.bf16.msra.mxu3 %v6586_v59  ;;  %v6253_v59 = vld [vmem:[#allocation2 + $0x188] sm:$0xf]  ;;  %v9058_v22 = vld [vmem:[#allocation2 + $0x154] sm:$0xf0] }
  0x6d   :  { %1464 = vmatpush.bf16.msrb.mxu2 %v6730_v48  ;;  %v9034_v48 = vld [vmem:[#allocation2 + $0x94] sm:$0xf0]  ;;  %v6254_v4 = vor.u32 %v9066_v61, %v6253_v59  ;;  %v6333_v27 = vld [vmem:[#allocation2 + $0x228] sm:$0xf] }
  0x6e   :  { %1424 = vmatpush.bf16.msra.mxu0 %v6314_v7  ;;  %v6126_v58 = vor.u32 %v9034_v48, %v6125_v47  ;;  %v6110_v7 = vor.u32 %v9030_v0, %v6109_v63  ;;  %v9022_v25 = vld [vmem:[#allocation2 + $0x34] sm:$0xf0]  ;;  %v6461_v30 = vld [vmem:[#allocation2 + $0x328] sm:$0xf] }
  0x6f   :  { %1438 = vmatpush.bf16.msra.mxu1 %v6442_v9  ;;  %v6237_v9 = vld [vmem:[#allocation2 + $0x168] sm:$0xf]  ;;  %v9086_v28 = vld [vmem:[#allocation2 + $0x234] sm:$0xf0] }
  0x70   :  { %1452 = vmatpush.bf16.msra.mxu3 %v6570_v12  ;;  %v6093_v12 = vld [vmem:[#allocation2 + $0x48] sm:$0xf]  ;;  %v6238_v17 = vor.u32 %v9062_v10, %v6237_v9  ;;  %v9118_v31 = vld [vmem:[#allocation2 + $0x334] sm:$0xf0]  ;;  %v6334_v36 = vor.u32 %v9086_v28, %v6333_v27  ;;  %v9040_v9 = vld [vmem:[#allocation2 + $0xcc] sm:$0xf] }
  0x71   :  { %1465 = vmatpush.bf16.msrb.mxu2 %v6714_v3  ;;  %1425 = vmatmul.bf16.vlgmr.msra.gmra.mxu0 %v9924_v54  ;;  %v9094_v3 = vld [vmem:[#allocation2 + $0x274] sm:$0xf0]  ;;  %v6205_v33 = vld [vmem:[#allocation2 + $0x128] sm:$0xf]  ;;  %v6462_v41 = vor.u32 %v9118_v31, %v6461_v30  ;;  %v6159_v10 = vld [vmem:[#allocation2 + $0xd8] sm:$0xf0] }
  0x72   :  { %1515 = vmatpush.bf16.msrb.mxu0 %v6430_v19  ;;  %1439 = vmatmul.bf16.vlgmr.msra.gmra.mxu1 %v9928_v60  ;;  %v6366_v11 = vor.u32 %v9094_v3, %v6365_v2  ;;  %v9122_v19 = vld [vmem:[#allocation2 + $0x354] sm:$0xf0]  ;;  %v6317_v44 = vld [vmem:[#allocation2 + $0x208] sm:$0xf]  ;;  %v9076_v3 = vld [vmem:[#allocation2 + $0x1ec] sm:$0xf] }
  0x73   :  { %1487 = vmatpush.bf16.msrb.mxu1 %v6174_v13  ;;  %1453 = vmatmul.bf16.vlgmr.msra.gmra.mxu3 %v9964_v37  ;;  %v9026_v13 = vld [vmem:[#allocation2 + $0x54] sm:$0xf0]  ;;  %v6813_v61 = vld [vmem:[#allocation2 + $0x5e8] sm:$0xf]  ;;  %v6271_v30 = vld [vmem:[#allocation2 + $0x1b8] sm:$0xf0] }
  0x74   :  { %1480 = vmatpush.bf16.msrb.mxu3 %v6826_v16  ;;  %v9090_v16 = vld [vmem:[#allocation2 + $0x254] sm:$0xf0]  ;;  %v6669_v63 = vld [vmem:[#allocation2 + $0x4c8] sm:$0xf] }
  0x75   :  { %1466 = vmatpush.bf16.msrb.mxu2 %v6698_v20  ;;  %v6094_v20 = vor.u32 %v9026_v13, %v6093_v12  ;;  %v9054_v34 = vld [vmem:[#allocation2 + $0x134] sm:$0xf0]  ;;  %v6797_v13 = vld [vmem:[#allocation2 + $0x5c8] sm:$0xf] }
  0x76   :  { %1516 = vmatpush.bf16.msrb.mxu0 %v6414_v32  ;;  %v6078_v32 = vor.u32 %v9022_v25, %v6077_v24  ;;  %v9018_v38 = vld [vmem:[#allocation2 + $0x14] sm:$0xf0]  ;;  %v6206_v47 = vor.u32 %v9054_v34, %v6205_v33  ;;  %v6781_v25 = vld [vmem:[#allocation2 + $0x5a8] sm:$0xf]  ;;  %v9032_v33 = vld [vmem:[#allocation2 + $0x8c] sm:$0xf] }
  0x77   :  { %1488 = vmatpush.bf16.msrb.mxu1 %v6158_v29  ;;  %v6222_v29 = vor.u32 %v9058_v22, %v6221_v21  ;;  %v9174_v40 = vld [vmem:[#allocation2 + $0x4f4] sm:$0xf0]  ;;  %v9036_v21 = vld [vmem:[#allocation2 + $0xac] sm:$0xf]  ;;  %v6143_v22 = vld [vmem:[#allocation2 + $0xb8] sm:$0xf0] }
  0x78   :  { %1501 = vmatpush.bf16.msra.mxu3 %v6302_v26  ;;  %1467 = vmatmul.bf16.vlgmr.msrb.gmra.mxu2 %v9966_v42  ;;  %v6478_v26 = vor.u32 %v9122_v19, %v6477_v18  ;;  %v9082_v45 = vld [vmem:[#allocation2 + $0x214] sm:$0xf0]  ;;  %v6287_v18 = vld [vmem:[#allocation2 + $0x1d8] sm:$0xf0]  ;;  %v6162_v19 = vor.u32 %v9040_v9, %v6159_v10  ;;  %v6637_v27 = vld [vmem:[#allocation2 + $0x488] sm:$0xf]  ;;  %v6146_v31 = vor.u32 %v9036_v21, %v6143_v22 }
  0x79   :  { %1529 = vmatpush.bf16.msra.mxu2 %v6558_v23  ;;  %v6350_v23 = vor.u32 %v9090_v16, %v6349_v15  ;;  %v9114_v48 = vld [vmem:[#allocation2 + $0x314] sm:$0xf0]  ;;  %v6318_v59 = vor.u32 %v9082_v45, %v6317_v44  ;;  %v6653_v15 = vld [vmem:[#allocation2 + $0x4a8] sm:$0xf]  ;;  %v6127_v34 = vld [vmem:[#allocation2 + $0x98] sm:$0xf0] }
  0x7a   :  { %1517 = vmatpush.bf16.msrb.mxu0 %v6398_v46  ;;  %v6445_v46 = vld [vmem:[#allocation2 + $0x308] sm:$0xf]  ;;  %v9210_v51 = vld [vmem:[#allocation2 + $0x614] sm:$0xf0]  ;;  %v6255_v44 = vld [vmem:[#allocation2 + $0x198] sm:$0xf0]  ;;  %v6130_v45 = vor.u32 %v9032_v33, %v6127_v34 }
  0x7b   :  { %1489 = vmatpush.bf16.msrb.mxu1 %v6142_v43  ;;  %v6189_v43 = vld [vmem:[#allocation2 + $0x108] sm:$0xf]  ;;  %v6446_v0 = vor.u32 %v9114_v48, %v6445_v46  ;;  %v9166_v16 = vld [vmem:[#allocation2 + $0x4b4] sm:$0xf0]  ;;  %v6111_v48 = vld [vmem:[#allocation2 + $0x78] sm:$0xf0] }
  0x7c   :  { %1502 = vmatpush.bf16.msra.mxu3 %v6286_v39  ;;  %v6685_v39 = vld [vmem:[#allocation2 + $0x4e8] sm:$0xf]  ;;  %v9162_v28 = vld [vmem:[#allocation2 + $0x494] sm:$0xf0]  ;;  %v6223_v9 = vld [vmem:[#allocation2 + $0x158] sm:$0xf0] }
  0x7d   :  { %1530 = vmatpush.bf16.msra.mxu2 %v6542_v35  ;;  %v6061_v35 = vld [vmem:[#allocation2 + $0x8] sm:$0xf]  ;;  %v9154_v57 = vld [vmem:[#allocation2 + $0x454] sm:$0xf0]  ;;  %v6207_v21 = vld [vmem:[#allocation2 + $0x138] sm:$0xf0] }
  0x7e   :  { %1518 = vmatpush.bf16.msrb.mxu0 %v6382_v62  ;;  %v6062_v52 = vor.u32 %v9018_v38, %v6061_v35  ;;  %v9206_v62 = vld [vmem:[#allocation2 + $0x5f4] sm:$0xf0]  ;;  %v6638_v35 = vor.u32 %v9162_v28, %v6637_v27  ;;  %v6765_v38 = vld [vmem:[#allocation2 + $0x588] sm:$0xf]  ;;  %v9016_v27 = vld [vmem:[#allocation2 + $0xc] sm:$0xf] }
  0x7f   :  { %1490 = vmatpush.bf16.msrb.mxu1 %v6126_v58  ;;  %v6686_v58 = vor.u32 %v9174_v40, %v6685_v39  ;;  %v9194_v39 = vld [vmem:[#allocation2 + $0x594] sm:$0xf0]  ;;  %v6621_v40 = vld [vmem:[#allocation2 + $0x468] sm:$0xf]  ;;  %v6063_v28 = vld [vmem:[#allocation2 + $0x18] sm:$0xf0] }
  0x80   :  { %1503 = vmatpush.bf16.msra.mxu3 %v6270_v53  ;;  %v9050_v53 = vld [vmem:[#allocation2 + $0x114] sm:$0xf0]  ;;  %v6766_v46 = vor.u32 %v9194_v39, %v6765_v38  ;;  %v6605_v56 = vld [vmem:[#allocation2 + $0x448] sm:$0xf]  ;;  %v6559_v33 = vld [vmem:[#allocation2 + $0x3f8] sm:$0xf0]  ;;  %v6066_v39 = vor.u32 %v9016_v27, %v6063_v28 }
  0x81   :  { %1531 = vmatpush.bf16.msra.mxu2 %v6526_v49  ;;  %v6829_v49 = vld [vmem:[#allocation2 + $0x608] sm:$0xf]  ;;  %v6190_v5 = vor.u32 %v9050_v53, %v6189_v43  ;;  %v9064_v43 = vld [vmem:[#allocation2 + $0x18c] sm:$0xf]  ;;  %v9190_v53 = vld [vmem:[#allocation2 + $0x574] sm:$0xf0] }
  0x82   :  { %1519 = vmatpush.bf16.msrb.mxu0 %v6366_v11  ;;  %v6830_v2 = vor.u32 %v9210_v51, %v6829_v49  ;;  %v6258_v51 = vor.u32 %v9064_v43, %v6255_v44  ;;  %v9104_v38 = vld [vmem:[#allocation2 + $0x2cc] sm:$0xf]  ;;  %v6191_v43 = vld [vmem:[#allocation2 + $0x118] sm:$0xf0] }
  0x83   :  { %1491 = vmatpush.bf16.msrb.mxu1 %v6110_v7  ;;  %6836 = vmatmul.msk.bf16.vlgmr.msrb.gmra.mxu3 %vm1287_vm0, %v9948_v50  ;;  %v6814_v7 = vor.u32 %v9206_v62, %v6813_v61  ;;  %v6495_v28 = vld [vmem:[#allocation2 + $0x378] sm:$0xf0] }
  0x84   :  { %1504 = vmatpush.bf16.msra.mxu3 %v6254_v4  ;;  %v6303_v4 = vld [vmem:[#allocation2 + $0x1f8] sm:$0xf0] }
  0x85   :  { %1532 = vmatpush.bf16.msra.mxu2 %v6510_v1  ;;  %v9170_v1 = vld [vmem:[#allocation2 + $0x4d4] sm:$0xf0]  ;;  %v6306_v12 = vor.u32 %v9076_v3, %v6303_v4  ;;  %v6733_v3 = vld [vmem:[#allocation2 + $0x548] sm:$0xf] }
  0x86   :  { %1520 = vmatpush.bf16.msrb.mxu0 %v6350_v23  ;;  %v6670_v11 = vor.u32 %v9170_v1, %v6669_v63  ;;  %v6654_v23 = vor.u32 %v9166_v16, %v6653_v15  ;;  %v9024_v63 = vld [vmem:[#allocation2 + $0x4c] sm:$0xf]  ;;  %v6606_v1 = vor.u32 %v9154_v57, %v6605_v56  ;;  %v9186_v4 = vld [vmem:[#allocation2 + $0x554] sm:$0xf0]  ;;  %v6717_v16 = vld [vmem:[#allocation2 + $0x528] sm:$0xf] }
  0x87   :  { %1492 = vmatpush.bf16.msrb.mxu1 %v6094_v20  ;;  %v9168_v56 = vld [vmem:[#allocation2 + $0x4cc] sm:$0xf]  ;;  %v6671_v57 = vld [vmem:[#allocation2 + $0x4d8] sm:$0xf0] }
  0x88   :  { %1505 = vmatpush.bf16.msra.mxu3 %v6238_v17  ;;  %v9072_v17 = vld [vmem:[#allocation2 + $0x1cc] sm:$0xf] }
  0x89   :  { %1533 = vmatpush.bf16.msra.mxu2 %v6494_v14  ;;  %v9202_v14 = vld [vmem:[#allocation2 + $0x5d4] sm:$0xf0]  ;;  %v6290_v24 = vor.u32 %v9072_v17, %v6287_v18  ;;  %v6573_v18 = vld [vmem:[#allocation2 + $0x408] sm:$0xf] }
  0x8a   :  { %1521 = vmatpush.bf16.msrb.mxu0 %v6334_v36  ;;  %v6798_v20 = vor.u32 %v9202_v14, %v6797_v13  ;;  %v6079_v13 = vld [vmem:[#allocation2 + $0x38] sm:$0xf0]  ;;  %v9182_v17 = vld [vmem:[#allocation2 + $0x534] sm:$0xf0] }
  0x8b   :  { %1493 = vmatpush.bf16.msrb.mxu1 %v6078_v32 }
  0x8c   :  { %1506 = vmatpush.bf16.msra.mxu3 %v6222_v29  ;;  %v9068_v29 = vld [vmem:[#allocation2 + $0x1ac] sm:$0xf] }
  0x8d   :  { %1534 = vmatpush.bf16.msra.mxu2 %v6478_v26  ;;  %v9198_v26 = vld [vmem:[#allocation2 + $0x5b4] sm:$0xf0]  ;;  %v6274_v36 = vor.u32 %v9068_v29, %v6271_v30 }
  0x8e   :  { %1522 = vmatpush.bf16.msrb.mxu0 %v6318_v59  ;;  %v6782_v32 = vor.u32 %v9198_v26, %v6781_v25  ;;  %v6239_v59 = vld [vmem:[#allocation2 + $0x178] sm:$0xf0]  ;;  %v6718_v25 = vor.u32 %v9182_v17, %v6717_v16  ;;  %v6701_v26 = vld [vmem:[#allocation2 + $0x508] sm:$0xf] }
  0x8f   :  { %1494 = vmatpush.bf16.msrb.mxu1 %v6062_v52  ;;  %v6749_v52 = vld [vmem:[#allocation2 + $0x568] sm:$0xf]  ;;  %v6511_v17 = vld [vmem:[#allocation2 + $0x398] sm:$0xf0] }
  0x90   :  { %1507 = vmatpush.bf16.msra.mxu3 %v6206_v47  ;;  %v9028_v47 = vld [vmem:[#allocation2 + $0x6c] sm:$0xf]  ;;  %v6750_v62 = vor.u32 %v9190_v53, %v6749_v52  ;;  %v6543_v53 = vld [vmem:[#allocation2 + $0x3d8] sm:$0xf0] }
  0x91   :  { %1535 = vmatpush.bf16.msra.mxu2 %v6462_v41  ;;  %1523 = vmatmul.bf16.vlgmr.msrb.gmra.mxu0 %v9924_v54  ;;  %v9158_v41 = vld [vmem:[#allocation2 + $0x474] sm:$0xf0]  ;;  %v6114_v61 = vor.u32 %v9028_v47, %v6111_v48 }
  0x92   :  { %1578 = vmatpush.bf16.msra.mxu0 %v6830_v2  ;;  %1495 = vmatmul.bf16.vlgmr.msrb.gmra.mxu1 %v9926_v55  ;;  %v6622_v49 = vor.u32 %v9158_v41, %v6621_v40  ;;  %v6415_v40 = vld [vmem:[#allocation2 + $0x2d8] sm:$0xf0]  ;;  %v9048_v41 = vld [vmem:[#allocation2 + $0x10c] sm:$0xf] }
  0x93   :  { %1543 = vmatpush.bf16.msra.mxu1 %v6686_v58  ;;  %v9060_v58 = vld [vmem:[#allocation2 + $0x16c] sm:$0xf]  ;;  %v6194_v52 = vor.u32 %v9048_v41, %v6191_v43  ;;  %v6607_v43 = vld [vmem:[#allocation2 + $0x458] sm:$0xf0] }
  0x94   :  { %1508 = vmatpush.bf16.msra.mxu3 %v6190_v5  ;;  %v6242_v2 = vor.u32 %v9060_v58, %v6239_v59  ;;  %v6589_v5 = vld [vmem:[#allocation2 + $0x428] sm:$0xf]  ;;  %v9100_v59 = vld [vmem:[#allocation2 + $0x2ac] sm:$0xf] }
  0x95   :  { %1536 = vmatpush.bf16.msra.mxu2 %v6446_v0  ;;  %v6095_v0 = vld [vmem:[#allocation2 + $0x58] sm:$0xf0]  ;;  %v9152_v41 = vld [vmem:[#allocation2 + $0x44c] sm:$0xf] }
  0x96   :  { %1599 = vmatpush.bf16.msrb.mxu0 %v6306_v12  ;;  %v6098_v10 = vor.u32 %v9024_v63, %v6095_v0  ;;  %v9020_v12 = vld [vmem:[#allocation2 + $0x2c] sm:$0xf]  ;;  %v6799_v63 = vld [vmem:[#allocation2 + $0x5d8] sm:$0xf0] }
  0x97   :  { %1544 = vmatpush.bf16.msra.mxu1 %v6670_v11  ;;  %1509 = vmatmul.bf16.vlgmr.msra.gmra.mxu3 %v9938_v8  ;;  %v6734_v11 = vor.u32 %v9186_v4, %v6733_v3  ;;  %v6082_v22 = vor.u32 %v9020_v12, %v6079_v13  ;;  %v6527_v4 = vld [vmem:[#allocation2 + $0x3b8] sm:$0xf0] }
  0x98   :  { %1557 = vmatpush.bf16.msrb.mxu3 %v6814_v7  ;;  %1537 = vmatmul.bf16.vlgmr.msra.gmra.mxu2 %v9928_v60  ;;  %v9056_v7 = vld [vmem:[#allocation2 + $0x14c] sm:$0xf]  ;;  %v6783_v12 = vld [vmem:[#allocation2 + $0x5b8] sm:$0xf0] }
  0x99   :  { %1585 = vmatpush.bf16.msrb.mxu2 %v6178_v6  ;;  %v9150_v6 = vld [vmem:[#allocation2 + $0x434] sm:$0xf0]  ;;  %v6226_v15 = vor.u32 %v9056_v7, %v6223_v9  ;;  %v9096_v9 = vld [vmem:[#allocation2 + $0x28c] sm:$0xf] }
  0x9a   :  { %1600 = vmatpush.bf16.msrb.mxu0 %v6290_v24  ;;  %v6590_v14 = vor.u32 %v9150_v6, %v6589_v5  ;;  %v6431_v24 = vld [vmem:[#allocation2 + $0x2f8] sm:$0xf0]  ;;  %v9164_v5 = vld [vmem:[#allocation2 + $0x4ac] sm:$0xf] }
  0x9b   :  { %1545 = vmatpush.bf16.msra.mxu1 %v6654_v23  ;;  %v9108_v23 = vld [vmem:[#allocation2 + $0x2ec] sm:$0xf]  ;;  %v6655_v6 = vld [vmem:[#allocation2 + $0x4b8] sm:$0xf0] }
  0x9c   :  { %1558 = vmatpush.bf16.msrb.mxu3 %v6798_v20  ;;  %v9052_v20 = vld [vmem:[#allocation2 + $0x12c] sm:$0xf]  ;;  %v6434_v34 = vor.u32 %v9108_v23, %v6431_v24 }
  0x9d   :  { %1586 = vmatpush.bf16.msrb.mxu2 %v6162_v19  ;;  %v9146_v19 = vld [vmem:[#allocation2 + $0x414] sm:$0xf0]  ;;  %v6210_v30 = vor.u32 %v9052_v20, %v6207_v21  ;;  %v9092_v21 = vld [vmem:[#allocation2 + $0x26c] sm:$0xf] }
  0x9e   :  { %1601 = vmatpush.bf16.msrb.mxu0 %v6274_v36  ;;  %v6574_v29 = vor.u32 %v9146_v19, %v6573_v18  ;;  %v6687_v36 = vld [vmem:[#allocation2 + $0x4f8] sm:$0xf0]  ;;  %v9160_v18 = vld [vmem:[#allocation2 + $0x48c] sm:$0xf] }
  0x9f   :  { %1546 = vmatpush.bf16.msra.mxu1 %v6638_v35  ;;  %v9172_v35 = vld [vmem:[#allocation2 + $0x4ec] sm:$0xf]  ;;  %v6639_v19 = vld [vmem:[#allocation2 + $0x498] sm:$0xf0] }
  0xa0   :  { %1559 = vmatpush.bf16.msrb.mxu3 %v6782_v32  ;;  %v9140_v32 = vld [vmem:[#allocation2 + $0x3ec] sm:$0xf]  ;;  %v6690_v48 = vor.u32 %v9172_v35, %v6687_v36 }
  0xa1   :  { %1587 = vmatpush.bf16.msrb.mxu2 %v6146_v31  ;;  %6837 = vmatmul.msk.bf16.vlgmr.msra.gmra.mxu0 %vm1287_vm0, %v9948_v50  ;;  %v9178_v31 = vld [vmem:[#allocation2 + $0x514] sm:$0xf0]  ;;  %v6562_v47 = vor.u32 %v9140_v32, %v6559_v33  ;;  %v9192_v23 = vld [vmem:[#allocation2 + $0x58c] sm:$0xf] }
  0xa2   :  { %1602 = vmatpush.bf16.msrb.mxu0 %v6258_v51  ;;  %v6702_v44 = vor.u32 %v9178_v31, %v6701_v26  ;;  %v6418_v51 = vor.u32 %v9104_v38, %v6415_v40  ;;  %v9124_v26 = vld [vmem:[#allocation2 + $0x36c] sm:$0xf]  ;;  %v6479_v40 = vld [vmem:[#allocation2 + $0x358] sm:$0xf0] }
  0xa3   :  { %1547 = vmatpush.bf16.msra.mxu1 %v6622_v49  ;;  %v9136_v49 = vld [vmem:[#allocation2 + $0x3cc] sm:$0xf]  ;;  %v6498_v35 = vor.u32 %v9124_v26, %v6495_v28  ;;  %v9263_v28 = vld [vmem:[#allocation4 + $0x19c] sm:$0xf0] }
  0xa4   :  { %1560 = vmatpush.bf16.msrb.mxu3 %v6766_v46  ;;  %v6815_v46 = vld [vmem:[#allocation2 + $0x5f8] sm:$0xf0]  ;;  %v6546_v0 = vor.u32 %v9136_v49, %v6543_v53  ;;  %v9088_v32 = vld [vmem:[#allocation2 + $0x24c] sm:$0xf] }
  0xa5   :  { %1588 = vmatpush.bf16.msrb.mxu2 %v6130_v45  ;;  %v9204_v45 = vld [vmem:[#allocation2 + $0x5ec] sm:$0xf] }
  0xa6   :  { %1603 = vmatpush.bf16.msrb.mxu0 %v6242_v2  ;;  %v6818_v58 = vor.u32 %v9204_v45, %v6815_v46  ;;  %v9132_v2 = vld [vmem:[#allocation2 + $0x3ac] sm:$0xf]  ;;  %v6335_v46 = vld [vmem:[#allocation2 + $0x238] sm:$0xf0] }
  0xa7   :  { %1548 = vmatpush.bf16.msra.mxu1 %v6606_v1  ;;  %v6674_v1 = vor.u32 %v9168_v56, %v6671_v57  ;;  %v6530_v13 = vor.u32 %v9132_v2, %v6527_v4  ;;  %v9188_v33 = vld [vmem:[#allocation2 + $0x56c] sm:$0xf]  ;;  %v6463_v57 = vld [vmem:[#allocation2 + $0x338] sm:$0xf0] }
  0xa8   :  { %1561 = vmatpush.bf16.msrb.mxu3 %v6750_v62  ;;  %v9200_v62 = vld [vmem:[#allocation2 + $0x5cc] sm:$0xf]  ;;  %v6719_v2 = vld [vmem:[#allocation2 + $0x538] sm:$0xf0] }
  0xa9   :  { %1589 = vmatpush.bf16.msrb.mxu2 %v6114_v61  ;;  %v6399_v61 = vld [vmem:[#allocation2 + $0x2b8] sm:$0xf0]  ;;  %v6802_v7 = vor.u32 %v9200_v62, %v6799_v63  ;;  %v9120_v38 = vld [vmem:[#allocation2 + $0x34c] sm:$0xf] }
  0xaa   :  { %1604 = vmatpush.bf16.msrb.mxu0 %v6226_v15  ;;  %v6402_v3 = vor.u32 %v9100_v59, %v6399_v61  ;;  %v9128_v15 = vld [vmem:[#allocation2 + $0x38c] sm:$0xf]  ;;  %v6482_v49 = vor.u32 %v9120_v38, %v6479_v40  ;;  %v6591_v59 = vld [vmem:[#allocation2 + $0x438] sm:$0xf0]  ;;  %v7001_v38 = vld [vmem:[#allocation4 + $0x140] sm:$0xf] }
  0xab   :  { %1549 = vmatpush.bf16.msra.mxu1 %v6590_v14  ;;  %v6658_v14 = vor.u32 %v9164_v5, %v6655_v6  ;;  %v6514_v24 = vor.u32 %v9128_v15, %v6511_v17  ;;  %v9084_v45 = vld [vmem:[#allocation2 + $0x22c] sm:$0xf]  ;;  %v6831_v4 = vld [vmem:[#allocation2 + $0x618] sm:$0xf0]  ;;  %v9271_v17 = vld [vmem:[#allocation4 + $0x1dc] sm:$0xf0] }
  0xac   :  { %1562 = vmatpush.bf16.msrb.mxu3 %v6734_v11  ;;  %v9196_v11 = vld [vmem:[#allocation2 + $0x5ac] sm:$0xf]  ;;  %v6338_v56 = vor.u32 %v9084_v45, %v6335_v46 }
  0xad   :  { %1590 = vmatpush.bf16.msrb.mxu2 %v6098_v10  ;;  %v6383_v10 = vld [vmem:[#allocation2 + $0x298] sm:$0xf0]  ;;  %v6786_v20 = vor.u32 %v9196_v11, %v6783_v12  ;;  %v9080_v63 = vld [vmem:[#allocation2 + $0x20c] sm:$0xf] }
  0xae   :  { %1605 = vmatpush.bf16.msrb.mxu0 %v6210_v30  ;;  %v6386_v16 = vor.u32 %v9096_v9, %v6383_v10  ;;  %v6623_v30 = vld [vmem:[#allocation2 + $0x478] sm:$0xf0]  ;;  %v9993_v9 = vld [vmem:[%s10277_s2] sm:$0xf] }
  0xaf   :  { %1550 = vmatpush.bf16.msra.mxu1 %v6574_v29  ;;  %v9156_v29 = vld [vmem:[#allocation2 + $0x46c] sm:$0xf]  ;;  %v6447_v12 = vld [vmem:[#allocation2 + $0x318] sm:$0xf0] }
  0xb0   :  { %1563 = vmatpush.bf16.msrb.mxu3 %v6718_v25  ;;  %v6642_v25 = vor.u32 %v9160_v18, %v6639_v19  ;;  %v6626_v36 = vor.u32 %v9156_v29, %v6623_v30  ;;  %v9176_v18 = vld [vmem:[#allocation2 + $0x50c] sm:$0xf] }
  0xb1   :  { %1591 = vmatpush.bf16.msrb.mxu2 %v6082_v22  ;;  %v6367_v22 = vld [vmem:[#allocation2 + $0x278] sm:$0xf0]  ;;  %v1300_v53 = vpop.f32.mrf.mxu0 }
  0xb2   :  { %1551 = vmatmul.bf16.vlgmr.msra.gmra.mxu1 %v9964_v37  ;;  %1606 = vmatpush.bf16.msrb.mxu0 %v6194_v52  ;;  %v6370_v27 = vor.u32 %v9092_v21, %v6367_v22  ;;  %v9116_v52 = vld [vmem:[#allocation2 + $0x32c] sm:$0xf]  ;;  %v7321_v21 = vld [vmem:[#allocation4 + $0x3c0] sm:$0xf] }
  0xb3   :  { %1613 = vmatpush.bf16.msrb.mxu1 %v6434_v34  ;;  %v6751_v34 = vld [vmem:[#allocation2 + $0x578] sm:$0xf0]  ;;  %v6466_v5 = vor.u32 %v9116_v52, %v6463_v57  ;;  %v9335_v22 = vld [vmem:[#allocation4 + $0x3dc] sm:$0xf0] }
  0xb4   :  { %1564 = vmatpush.bf16.msrb.mxu3 %v6702_v44  ;;  %v6754_v44 = vor.u32 %v9188_v33, %v6751_v34  ;;  %v7322_v29 = vor.u32 %v9335_v22, %v7321_v21  ;;  %v7225_v52 = vld [vmem:[#allocation4 + $0x300] sm:$0xf] }
  0xb5   :  { %1592 = vmatpush.bf16.msrb.mxu2 %v6066_v39  ;;  %1607 = vmatmul.bf16.vlgmr.msrb.gmra.mxu0 %v9938_v8  ;;  %v6351_v8 = vld [vmem:[#allocation2 + $0x258] sm:$0xf0]  ;;  %v9988_v61 = vpop.f32.mrf.mxu1  ;;  %v9287_v21 = vld [vmem:[#allocation4 + $0x25c] sm:$0xf0] }
  0xb6   :  { %1655 = vmatpush.bf16.msra.mxu0 %v6818_v58  ;;  %v6354_v39 = vor.u32 %v9088_v32, %v6351_v8  ;;  %v9148_v58 = vld [vmem:[#allocation2 + $0x42c] sm:$0xf]  ;;  %v9995_v10 = vpop.f32.mrf.mxu2  ;;  %v9327_v32 = vld [vmem:[#allocation4 + $0x39c] sm:$0xf0] }
  0xb7   :  { %1614 = vmatpush.bf16.msrb.mxu1 %v6418_v51  ;;  %1565 = vmatmul.bf16.vlgmr.msrb.gmra.mxu3 %v9966_v42  ;;  %v6610_v51 = vor.u32 %v9152_v41, %v6607_v43  ;;  %v6594_v6 = vor.u32 %v9148_v58, %v6591_v59  ;;  %v7257_v43 = vld [vmem:[#allocation4 + $0x340] sm:$0xf] }
  0xb8   :  { %1627 = vmatpush.bf16.msra.mxu3 %v6562_v47  ;;  %1593 = vmatmul.bf16.vlgmr.msrb.gmra.mxu2 %v9926_v55  ;;  %v6767_v55 = vld [vmem:[#allocation2 + $0x598] sm:$0xf0]  ;;  %v9184_v47 = vld [vmem:[#allocation2 + $0x54c] sm:$0xf]  ;;  %v1342_v33 = vpop.f32.mrf.mxu3  ;;  %v6937_v58 = vld [vmem:[#allocation4 + $0xc0] sm:$0xf] }
  0xb9   :  { %1641 = vmatpush.bf16.msra.mxu2 %v6690_v48  ;;  %v6770_v31 = vor.u32 %v9192_v23, %v6767_v55  ;;  %v6735_v48 = vld [vmem:[#allocation2 + $0x558] sm:$0xf0]  ;;  %v1302_v30 = vpop.f32.mrf.mxu0  ;;  %v9239_v59 = vld [vmem:[#allocation4 + $0xdc] sm:$0xf0] }
  0xba   :  { %1656 = vmatpush.bf16.msra.mxu0 %v6802_v7  ;;  %v6738_v62 = vor.u32 %v9184_v47, %v6735_v48  ;;  %v9112_v7 = vld [vmem:[#allocation2 + $0x30c] sm:$0xf]  ;;  %v6969_v47 = vld [vmem:[#allocation4 + $0x100] sm:$0xf] }
  0xbb   :  { %1615 = vmatpush.bf16.msrb.mxu1 %v6402_v3  ;;  %v9208_v3 = vld [vmem:[#allocation2 + $0x60c] sm:$0xf]  ;;  %v6450_v23 = vor.u32 %v9112_v7, %v6447_v12  ;;  %v9247_v48 = vld [vmem:[#allocation4 + $0x11c] sm:$0xf0] }
  0xbc   :  { %1628 = vmatpush.bf16.msra.mxu3 %v6546_v0  ;;  %v6319_v0 = vld [vmem:[#allocation2 + $0x218] sm:$0xf0]  ;;  %v6834_v19 = vor.u32 %v9208_v3, %v6831_v4  ;;  %v6905_v4 = vld [vmem:[#allocation4 + $0x80] sm:$0xf] }
  0xbd   :  { %1642 = vmatpush.bf16.msra.mxu2 %v6674_v1  ;;  %v9180_v1 = vld [vmem:[#allocation2 + $0x52c] sm:$0xf]  ;;  %v6322_v11 = vor.u32 %v9080_v63, %v6319_v0  ;;  %v1316_v8 = vpop.f32.mrf.mxu1  ;;  %v7193_v63 = vld [vmem:[#allocation4 + $0x2c0] sm:$0xf] }
  0xbe   :  { %1657 = vmatpush.bf16.msra.mxu0 %v6786_v20  ;;  %v6722_v15 = vor.u32 %v9180_v1, %v6719_v2  ;;  %v6703_v20 = vld [vmem:[#allocation2 + $0x518] sm:$0xf0]  ;;  %v1330_v41 = vpop.f32.mrf.mxu2  ;;  %v9303_v0 = vld [vmem:[#allocation4 + $0x2dc] sm:$0xf0]  ;;  %v6938_v1 = vor.u32 %v9239_v59, %v6937_v58  ;;  %v9243_v59 = vld [vmem:[#allocation4 + $0x104] sm:$0xf] }
  0xbf   :  { %1616 = vmatpush.bf16.msrb.mxu1 %v6386_v16  ;;  %v7065_v16 = vld [vmem:[#allocation4 + $0x1c0] sm:$0xf]  ;;  %v6706_v26 = vor.u32 %v9176_v18, %v6703_v20 }
  0xc0   :  { %1629 = vmatpush.bf16.msra.mxu3 %v6530_v13  ;;  %v9144_v13 = vld [vmem:[#allocation2 + $0x40c] sm:$0xf]  ;;  %v9223_v18 = vld [vmem:[#allocation4 + $0x5c] sm:$0xf0] }
  0xc1   :  { %1643 = vmatpush.bf16.msra.mxu2 %v6658_v14  ;;  %v6575_v14 = vld [vmem:[#allocation2 + $0x418] sm:$0xf0]  ;;  %v7129_v20 = vld [vmem:[#allocation4 + $0x240] sm:$0xf] }
  0xc2   :  { %1658 = vmatpush.bf16.msra.mxu0 %v6770_v31  ;;  %v6578_v55 = vor.u32 %v9144_v13, %v6575_v14  ;;  %v7289_v31 = vld [vmem:[#allocation4 + $0x380] sm:$0xf] }
  0xc3   :  { %1617 = vmatpush.bf16.msrb.mxu1 %v6370_v27  ;;  %v7033_v27 = vld [vmem:[#allocation4 + $0x180] sm:$0xf]  ;;  %v7290_v40 = vor.u32 %v9327_v32, %v7289_v31  ;;  %v9331_v32 = vld [vmem:[#allocation4 + $0x3c4] sm:$0xf] }
  0xc4   :  { %1630 = vmatpush.bf16.msra.mxu3 %v6514_v24  ;;  %v7066_v24 = vor.u32 %v9271_v17, %v7065_v16  ;;  %v7034_v34 = vor.u32 %v9263_v28, %v7033_v27  ;;  %v6873_v17 = vld [vmem:[#allocation4 + $0x40] sm:$0xf]  ;;  %v9267_v27 = vld [vmem:[#allocation4 + $0x1c4] sm:$0xf] }
  0xc5   :  { %1644 = vmatpush.bf16.msra.mxu2 %v6642_v25  ;;  %v299_v25 = vperm.slane %v9993_v9, 0  ;;  %v7067_v28 = vld [vmem:[#allocation4 + $0x1e0] sm:$0xf0]  ;;  %v9391_v58 = vld [vmem:[#allocation4 + $0x59c] sm:$0xf0] }
  0xc6   :  { %1659 = vmatpush.bf16.msra.mxu0 %v6754_v44  ;;  %v9319_v44 = vld [vmem:[#allocation4 + $0x35c] sm:$0xf0] }
  0xc7   :  { %1618 = vmatpush.bf16.msrb.mxu1 %v6354_v39  ;;  %v9255_v39 = vld [vmem:[#allocation4 + $0x15c] sm:$0xf0] }
  0xc8   :  { %1631 = vmatpush.bf16.msra.mxu3 %v6498_v35  ;;  %v1301_v35 = vadd.f32 %v1300_v53, %v299_v25  ;;  %v9311_v53 = vld [vmem:[#allocation4 + $0x31c] sm:$0xf0] }
  0xc9   :  { %1645 = vmatpush.bf16.msra.mxu2 %v6626_v36  ;;  %v1303_v36 = vadd.f32 %v1302_v30, %v299_v25  ;;  %v6841_v25 = vld [vmem:[#allocation4] sm:$0xf] }
  0xca   :  { %1660 = vmatpush.bf16.msra.mxu0 %v6738_v62  ;;  %v1315_v45 = vadd.f32 %v9988_v61, %v1301_v35  ;;  %v1344_v62 = vpop.f32.mrf.mxu3  ;;  %v1384_v61 = vpop.f32.mrf.mxu2  ;;  %v9279_v30 = vld [vmem:[#allocation4 + $0x21c] sm:$0xf0] }
  0xcb   :  { %1619 = vmatpush.bf16.msrb.mxu1 %v6338_v56  ;;  %v1317_v46 = vadd.f32 %v1316_v8, %v1303_v36  ;;  %v7323_v8 = vld [vmem:[#allocation4 + $0x3e0] sm:$0xf0]  ;;  %v7070_v36 = vor.u32 %v9267_v27, %v7067_v28  ;;  %v7449_v27 = vld [vmem:[#allocation4 + $0x4c0] sm:$0xf] }
  0xcc   :  { %1632 = vmatpush.bf16.msra.mxu3 %v6482_v49  ;;  %v7258_v49 = vor.u32 %v9319_v44, %v7257_v43  ;;  %v1329_v57 = vadd.f32 %v9995_v10, %v1315_v45  ;;  %v9295_v10 = vld [vmem:[#allocation4 + $0x29c] sm:$0xf0]  ;;  %v9323_v44 = vld [vmem:[#allocation4 + $0x384] sm:$0xf] }
  0xcd   :  { %1646 = vmatpush.bf16.msra.mxu2 %v6610_v51  ;;  %v9219_v28 = vld [vmem:[#allocation4 + $0x44] sm:$0xf] }
  0xce   :  { %1661 = vmatpush.bf16.msra.mxu0 %v6722_v15  ;;  %v1356_v51 = vpop.f32.mrf.mxu0  ;;  %v1343_v2 = vadd.f32 %v1342_v33, %v1329_v57 }
  0xcf   :  { %1620 = vmatpush.bf16.msrb.mxu1 %v6322_v11  ;;  %v1370_v56 = vpop.f32.mrf.mxu1  ;;  %v7161_v11 = vld [vmem:[#allocation4 + $0x280] sm:$0xf] }
  0xd0   :  { %1633 = vmatpush.bf16.msra.mxu3 %v6466_v5  ;;  %v9231_v5 = vld [vmem:[#allocation4 + $0x9c] sm:$0xf0]  ;;  %v1357_v12 = vadd.f32 %v1356_v51, %v1343_v2  ;;  %v7003_v51 = vld [vmem:[#allocation4 + $0x160] sm:$0xf0] }
  0xd1   :  { %1647 = vmatpush.bf16.msra.mxu2 %v6594_v6  ;;  %v7194_v6 = vor.u32 %v9303_v0, %v7193_v63  ;;  %v6906_v15 = vor.u32 %v9231_v5, %v6905_v4  ;;  %v7227_v2 = vld [vmem:[#allocation4 + $0x320] sm:$0xf0]  ;;  %v7513_v4 = vld [vmem:[#allocation4 + $0x540] sm:$0xf] }
  0xd2   :  { %1621 = vmatmul.bf16.vlgmr.msrb.gmra.mxu1 %v9924_v54  ;;  %1662 = vmatpush.bf16.msra.mxu0 %v6706_v26  ;;  %v7002_v54 = vor.u32 %v9255_v39, %v7001_v38  ;;  %v1371_v22 = vadd.f32 %v1370_v56, %v1357_v12  ;;  %v9215_v26 = vld [vmem:[#allocation4 + $0x1c] sm:$0xf0]  ;;  %v9259_v39 = vld [vmem:[#allocation4 + $0x184] sm:$0xf] }
  0xd3   :  { %1676 = vmatpush.bf16.msra.mxu1 %v6834_v19  ;;  %v7162_v19 = vor.u32 %v9295_v10, %v7161_v11  ;;  %v6842_v33 = vor.u32 %v9215_v26, %v6841_v25  ;;  %v9315_v56 = vld [vmem:[#allocation4 + $0x344] sm:$0xf]  ;;  %v9383_v5 = vld [vmem:[#allocation4 + $0x55c] sm:$0xf0] }
  0xd4   :  { %1634 = vmatpush.bf16.msra.mxu3 %v6450_v23  ;;  %v1386_v23 = vpop.f32.mrf.mxu2  ;;  %v1385_v31 = vadd.f32 %v1384_v61, %v1371_v22  ;;  %v7514_v10 = vor.u32 %v9383_v5, %v7513_v4  ;;  %v9299_v12 = vld [vmem:[#allocation4 + $0x2c4] sm:$0xf] }
  0xd5   :  { %1648 = vmatpush.bf16.msra.mxu2 %v6578_v55  ;;  %1663 = vmatmul.bf16.vlgmr.msra.gmra.mxu0 %v9966_v42  ;;  %v7226_v42 = vor.u32 %v9311_v53, %v7225_v52  ;;  %v6874_v55 = vor.u32 %v9223_v18, %v6873_v17  ;;  %v6907_v17 = vld [vmem:[#allocation4 + $0xa0] sm:$0xf0] }
  0xd6   :  { %v1358_v7 = vpop.f32.mrf.mxu0  ;;  %v10006_v35 = vpop.f32.mrf.mxu3  ;;  %v1683_v43 = vmax.f32 %v1385_v31, 0.0  ;;  %v9291_v22 = vld [vmem:[#allocation4 + $0x284] sm:$0xf] }
  0xd7   :  { %3263 = vmatpush.bf16.msrb.mxu1 %v7322_v29  ;;  %1635 = vmatmul.bf16.vlgmr.msra.gmra.mxu3 %v9928_v60  ;;  %v6970_v60 = vor.u32 %v9247_v48, %v6969_v47  ;;  %v1372_v14 = vpop.f32.mrf.mxu1  ;;  %v7097_v29 = vld [vmem:[#allocation4 + $0x200] sm:$0xf] }
  0xd8   :  { %3249 = vmatpush.bf16.msrb.mxu3 %v7066_v24  ;;  %1649 = vmatmul.bf16.vlgmr.msra.gmra.mxu2 %v9964_v37  ;;  %v1331_v37 = vadd.f32 %v1330_v41, %v1317_v46  ;;  %v7098_v38 = vor.u32 %v9279_v30, %v7097_v29  ;;  %v7326_v41 = vor.u32 %v9331_v32, %v7323_v8  ;;  %v7577_v47 = vld [vmem:[#allocation4 + $0x5c0] sm:$0xf]  ;;  %v6875_v29 = vld [vmem:[#allocation4 + $0x60] sm:$0xf0] }
  0xd9   :  { %v9399_v48 = vld [vmem:[#allocation4 + $0x5dc] sm:$0xf0]  ;;  %v9283_v8 = vld [vmem:[#allocation4 + $0x244] sm:$0xf] }
  0xda   :  { %v1345_v3 = vadd.f32 %v1344_v62, %v1331_v37  ;;  %v7578_v53 = vor.u32 %v9399_v48, %v7577_v47  ;;  %v7545_v37 = vld [vmem:[#allocation4 + $0x580] sm:$0xf]  ;;  %v9272_v48 = vld [vmem:[#allocation4 + $0x1e4] sm:$0xf0] }
  0xdb   :  { %3264 = vmatpush.bf16.msrb.mxu1 %v7290_v40  ;;  %v7035_v40 = vld [vmem:[#allocation4 + $0x1a0] sm:$0xf0]  ;;  %v7546_v61 = vor.u32 %v9391_v58, %v7545_v37  ;;  %v9351_v37 = vld [vmem:[#allocation4 + $0x45c] sm:$0xf0] }
  0xdc   :  { %3250 = vmatpush.bf16.msrb.mxu3 %v7034_v34  ;;  %v1359_v13 = vadd.f32 %v1358_v7, %v1345_v3  ;;  %v7038_v46 = vor.u32 %v9259_v39, %v7035_v40  ;;  %3277 = vmatpush.bf16.msrb.mxu2 %v7578_v53  ;;  %v1412_v63 = vpop.f32.mrf.mxu2  ;;  %v6939_v7 = vld [vmem:[#allocation4 + $0xe0] sm:$0xf0]  ;;  %v7417_v39 = vld [vmem:[#allocation4 + $0x480] sm:$0xf] }
  0xdd   :  { %v9359_v40 = vld [vmem:[#allocation4 + $0x49c] sm:$0xf0] }
  0xde   :  { %v1373_v16 = vadd.f32 %v1372_v14, %v1359_v13  ;;  %v1400_v0 = vpop.f32.mrf.mxu3  ;;  %v7195_v13 = vld [vmem:[#allocation4 + $0x2e0] sm:$0xf0] }
  0xdf   :  { %3265 = vmatpush.bf16.msrb.mxu1 %v7258_v49  ;;  %v9251_v49 = vld [vmem:[#allocation4 + $0x144] sm:$0xf]  ;;  %v7198_v18 = vor.u32 %v9299_v12, %v7195_v13  ;;  %v7009_v12 = vld [vmem:[#allocation4 + $0x148] sm:$0xf] }
  0xe0   :  { %3251 = vmatpush.bf16.msrb.mxu3 %v7002_v54  ;;  %v1387_v24 = vadd.f32 %v1386_v23, %v1373_v16  ;;  %v7291_v54 = vld [vmem:[#allocation4 + $0x3a0] sm:$0xf0]  ;;  %v7006_v57 = vor.u32 %v9251_v49, %v7003_v51  ;;  %3278 = vmatpush.bf16.msrb.mxu2 %v7546_v61  ;;  %v7041_v61 = vld [vmem:[#allocation4 + $0x188] sm:$0xf] }
  0xe1   :  { %v7294_v52 = vor.u32 %v9323_v44, %v7291_v54  ;;  %v9227_v16 = vld [vmem:[#allocation4 + $0x84] sm:$0xf]  ;;  %v7073_v44 = vld [vmem:[#allocation4 + $0x1c8] sm:$0xf] }
  0xe2   :  { %6838 = vmatmul.msk.bf16.vlgmr.msra.gmra.mxu1 %vm1287_vm0, %v9948_v50  ;;  %v7130_v50 = vor.u32 %v9287_v21, %v7129_v20  ;;  %v1687_v34 = vmax.f32 %v1387_v24, 0.0  ;;  %v7163_v23 = vld [vmem:[#allocation4 + $0x2a0] sm:$0xf0]  ;;  %v300_v24 = vperm.slane %v9993_v9, 1  ;;  %v6910_v26 = vor.u32 %v9227_v16, %v6907_v17  ;;  %v9256_v13 = vld [vmem:[#allocation4 + $0x164] sm:$0xf0] }
  0xe3   :  { %3266 = vmatpush.bf16.msrb.mxu1 %v7226_v42  ;;  %v6971_v42 = vld [vmem:[#allocation4 + $0x120] sm:$0xf0]  ;;  %v7166_v30 = vor.u32 %v9291_v22, %v7163_v23 }
  0xe4   :  { %3252 = vmatpush.bf16.msrb.mxu3 %v6970_v60  ;;  %v10008_v45 = vpack.c.bf16 %v1687_v34, %v1683_v43  ;;  %v7259_v60 = vld [vmem:[#allocation4 + $0x360] sm:$0xf0]  ;;  %v6974_v3 = vor.u32 %v9243_v59, %v6971_v42  ;;  %3279 = vmatpush.bf16.msrb.mxu2 %v7514_v10  ;;  %v1414_v25 = vpop.f32.mrf.mxu2  ;;  %v1399_v34 = vadd.f32 %v10006_v35, %v300_v24 }
  0xe5   :  { %v7262_v62 = vor.u32 %v9315_v56, %v7259_v60  ;;  %v6843_v43 = vld [vmem:[#allocation4 + $0x20] sm:$0xf0]  ;;  %v7074_v59 = vor.u32 %v9272_v48, %v7073_v44  ;;  %v6913_v44 = vld [vmem:[#allocation4 + $0x88] sm:$0xf] }
  0xe6   :  { %v9275_v49 = vld [vmem:[#allocation4 + $0x204] sm:$0xf]  ;;  %v9232_v48 = vld [vmem:[#allocation4 + $0xa4] sm:$0xf0] }
  0xe7   :  { %3267 = vmatpush.bf16.msrb.mxu1 %v7194_v6  ;;  %v9235_v6 = vld [vmem:[#allocation4 + $0xc4] sm:$0xf] }
  0xe8   :  { %3253 = vmatpush.bf16.msrb.mxu3 %v6938_v1  ;;  %v9307_v1 = vld [vmem:[#allocation4 + $0x304] sm:$0xf]  ;;  %v6942_v14 = vor.u32 %v9235_v6, %v6939_v7 }
  0xe9   :  { %v7230_v11 = vor.u32 %v9307_v1, %v7227_v2  ;;  %v7099_v51 = vld [vmem:[#allocation4 + $0x220] sm:$0xf0] }
  0xea   :  { %v7102_v42 = vor.u32 %v9275_v49, %v7099_v51  ;;  %v9395_v7 = vld [vmem:[#allocation4 + $0x5c4] sm:$0xf] }
  0xeb   :  { %3268 = vmatpush.bf16.msrb.mxu1 %v7162_v19  ;;  %v9375_v19 = vld [vmem:[#allocation4 + $0x51c] sm:$0xf0]  ;;  %v7547_v22 = vld [vmem:[#allocation4 + $0x5a0] sm:$0xf0] }
  0xec   :  { %3254 = vmatpush.bf16.msrb.mxu3 %v6906_v15  ;;  %v7481_v15 = vld [vmem:[#allocation4 + $0x500] sm:$0xf]  ;;  %v9371_v49 = vld [vmem:[#allocation4 + $0x504] sm:$0xf] }
  0xee   :  { %v1426_v20 = vpop.f32.mrf.mxu0 }
  0xef   :  { %3269 = vmatpush.bf16.msrb.mxu1 %v7130_v50  ;;  %v9367_v50 = vld [vmem:[#allocation4 + $0x4dc] sm:$0xf0]  ;;  %v1440_v32 = vpop.f32.mrf.mxu1 }
  0xf0   :  { %3255 = vmatpush.bf16.msrb.mxu3 %v6874_v55  ;;  %v7482_v55 = vor.u32 %v9375_v19, %v7481_v15  ;;  %v7450_v31 = vor.u32 %v9367_v50, %v7449_v27  ;;  %v6977_v19 = vld [vmem:[#allocation4 + $0x108] sm:$0xf] }
  0xf2   :  { %3280 = vmatpush.bf16.msrb.mxu2 %v7482_v55  ;;  %v9248_v55 = vld [vmem:[#allocation4 + $0x124] sm:$0xf0] }
  0xf3   :  { %3270 = vmatpush.bf16.msrb.mxu1 %v7098_v38  ;;  %v6878_v38 = vor.u32 %v9219_v28, %v6875_v29  ;;  %v6978_v29 = vor.u32 %v9248_v55, %v6977_v19  ;;  %v9431_v19 = vld [vmem:[#allocation4 + $0x6dc] sm:$0xf0]  ;;  %v7075_v55 = vld [vmem:[#allocation4 + $0x1e8] sm:$0xf0] }
  0xf4   :  { %3256 = vmatpush.bf16.msrb.mxu3 %v6842_v33  ;;  %v7131_v33 = vld [vmem:[#allocation4 + $0x260] sm:$0xf0] }
  0xf5   :  { %v7134_v54 = vor.u32 %v9283_v8, %v7131_v33  ;;  %v9240_v33 = vld [vmem:[#allocation4 + $0xe4] sm:$0xf0] }
  0xf6   :  { %v10011_v21 = vpop.f32.mrf.mxu3  ;;  %3281 = vmatpush.bf16.msrb.mxu2 %v7450_v31  ;;  %v1428_v56 = vpop.f32.mrf.mxu0  ;;  %v9379_v31 = vld [vmem:[#allocation4 + $0x544] sm:$0xf] }
  0xf7   :  { %3319 = vmatpush.bf16.msra.mxu1 %v7326_v41  ;;  %3257 = vmatmul.bf16.vlgmr.msrb.gmra.mxu3 %v10008_v45  ;;  %v9211_v41 = vld [vmem:[#allocation4 + $0x4] sm:$0xf]  ;;  %v1442_v2 = vpop.f32.mrf.mxu1 }
  0xf8   :  { %3305 = vmatpush.bf16.msra.mxu3 %v7070_v36  ;;  %v1401_v36 = vadd.f32 %v1400_v0, %v300_v24  ;;  %v6846_v60 = vor.u32 %v9211_v41, %v6843_v43  ;;  %v9264_v0 = vld [vmem:[#allocation4 + $0x1a4] sm:$0xf0] }
  0xf9   :  { %v7042_v5 = vor.u32 %v9264_v0, %v7041_v61  ;;  %v9336_v41 = vld [vmem:[#allocation4 + $0x3e4] sm:$0xf0]  ;;  %v7451_v61 = vld [vmem:[#allocation4 + $0x4e0] sm:$0xf0] }
  0xfa   :  { %v1415_v53 = vadd.f32 %v1414_v25, %v1401_v36  ;;  %v7833_v25 = vld [vmem:[#allocation4 + $0x7c0] sm:$0xf] }
  0xfb   :  { %3320 = vmatpush.bf16.msra.mxu1 %v7294_v52  ;;  %v1413_v52 = vadd.f32 %v1412_v63, %v1399_v34  ;;  %v1468_v35 = vpop.f32.mrf.mxu2  ;;  %v7353_v63 = vld [vmem:[#allocation4 + $0x400] sm:$0xf] }
  0xfc   :  { %3306 = vmatpush.bf16.msra.mxu3 %v7038_v46  ;;  %v7418_v46 = vor.u32 %v9359_v40, %v7417_v39  ;;  %v1429_v1 = vadd.f32 %v1428_v56, %v1415_v53  ;;  %v7801_v36 = vld [vmem:[#allocation4 + $0x780] sm:$0xf]  ;;  %v7329_v40 = vld [vmem:[#allocation4 + $0x3c8] sm:$0xf] }
  0xfd   :  { %v1427_v58 = vadd.f32 %v1426_v20, %v1413_v52  ;;  %v9387_v20 = vld [vmem:[#allocation4 + $0x584] sm:$0xf]  ;;  %v7330_v51 = vor.u32 %v9336_v41, %v7329_v40  ;;  %v7769_v53 = vld [vmem:[#allocation4 + $0x740] sm:$0xf] }
  0xfe   :  { %v1456_v47 = vpop.f32.mrf.mxu3  ;;  %3282 = vmatpush.bf16.msrb.mxu2 %v7418_v46  ;;  %v1443_v16 = vadd.f32 %v1442_v2, %v1429_v1  ;;  %v7550_v24 = vor.u32 %v9387_v20, %v7547_v22  ;;  %v7483_v52 = vld [vmem:[#allocation4 + $0x520] sm:$0xf0]  ;;  %v9447_v56 = vld [vmem:[#allocation4 + $0x75c] sm:$0xf0]  ;;  %v9224_v1 = vld [vmem:[#allocation4 + $0x64] sm:$0xf0] }
  0xff   :  { %3321 = vmatpush.bf16.msra.mxu1 %v7262_v62  ;;  %v1441_v4 = vadd.f32 %v1440_v32, %v1427_v58  ;;  %v7515_v32 = vld [vmem:[#allocation4 + $0x560] sm:$0xf0]  ;;  %v7770_v58 = vor.u32 %v9447_v56, %v7769_v53  ;;  %v9312_v22 = vld [vmem:[#allocation4 + $0x324] sm:$0xf0] }
 0x100   :  { %3307 = vmatpush.bf16.msra.mxu3 %v7006_v57  ;;  %v7385_v57 = vld [vmem:[#allocation4 + $0x440] sm:$0xf]  ;;  %v1457_v17 = vadd.f32 %v1456_v47, %v1443_v16  ;;  %v7518_v34 = vor.u32 %v9379_v31, %v7515_v32  ;;  %v7233_v16 = vld [vmem:[#allocation4 + $0x308] sm:$0xf]  ;;  %v9260_v31 = vld [vmem:[#allocation4 + $0x18c] sm:$0xf] }
 0x101   :  { %v7386_v62 = vor.u32 %v9351_v37, %v7385_v57  ;;  %v1455_v15 = vadd.f32 %v10011_v21, %v1441_v4  ;;  %v9328_v57 = vld [vmem:[#allocation4 + $0x3a4] sm:$0xf0]  ;;  %v7486_v37 = vor.u32 %v9371_v49, %v7483_v52  ;;  %v7043_v32 = vld [vmem:[#allocation4 + $0x1a8] sm:$0xf0]  ;;  %v301_v52 = vperm.slane %v9993_v9, 2 }
 0x102   :  { %v7265_v4 = vld [vmem:[#allocation4 + $0x348] sm:$0xf] }
 0x103   :  { %3322 = vmatpush.bf16.msra.mxu1 %v7230_v11  ;;  %3283 = vmatpush.bf16.msrb.mxu2 %v7386_v62  ;;  %v7579_v11 = vld [vmem:[#allocation4 + $0x5e0] sm:$0xf0]  ;;  %v1470_v23 = vpop.f32.mrf.mxu2  ;;  %v1469_v27 = vadd.f32 %v1468_v35, %v1455_v15 }
 0x104   :  { %3308 = vmatpush.bf16.msra.mxu3 %v6974_v3  ;;  %v9343_v3 = vld [vmem:[#allocation4 + $0x41c] sm:$0xf0]  ;;  %v1471_v28 = vadd.f32 %v1470_v23, %v1457_v17  ;;  %v9363_v62 = vld [vmem:[#allocation4 + $0x4c4] sm:$0xf]  ;;  %v9268_v23 = vld [vmem:[#allocation4 + $0x1cc] sm:$0xf] }
 0x105   :  { %v7354_v6 = vor.u32 %v9343_v3, %v7353_v63  ;;  %v7454_v2 = vor.u32 %v9363_v62, %v7451_v61  ;;  %v7737_v63 = vld [vmem:[#allocation4 + $0x700] sm:$0xf]  ;;  %v6979_v61 = vld [vmem:[#allocation4 + $0x128] sm:$0xf0] }
 0x106   :  { %v1482_v10 = vpop.f32.mrf.mxu3  ;;  %v9439_v3 = vld [vmem:[#allocation4 + $0x71c] sm:$0xf0] }
 0x107   :  { %3323 = vmatpush.bf16.msra.mxu1 %v7198_v18  ;;  %3284 = vmatpush.bf16.msrb.mxu2 %v7354_v6  ;;  %v7010_v18 = vor.u32 %v9256_v13, %v7009_v12  ;;  %v1483_v21 = vadd.f32 %v1482_v10, %v1469_v27  ;;  %v7738_v6 = vor.u32 %v9439_v3, %v7737_v63  ;;  %v9216_v12 = vld [vmem:[#allocation4 + $0x24] sm:$0xf0]  ;;  %v9355_v13 = vld [vmem:[#allocation4 + $0x484] sm:$0xf]  ;;  %v9407_v62 = vld [vmem:[#allocation4 + $0x61c] sm:$0xf0] }
 0x108   :  { %3309 = vmatpush.bf16.msra.mxu3 %v6942_v14  ;;  %v7582_v14 = vor.u32 %v9395_v7, %v7579_v11  ;;  %v6849_v11 = vld [vmem:[#allocation4 + $0x8] sm:$0xf]  ;;  %v7387_v27 = vld [vmem:[#allocation4 + $0x460] sm:$0xf0] }
 0x10b   :  { %3324 = vmatpush.bf16.msra.mxu1 %v7166_v30  ;;  %3333 = vmatpush.bf16.msra.mxu2 %v7582_v14  ;;  %v6945_v30 = vld [vmem:[#allocation4 + $0xc8] sm:$0xf]  ;;  %v7419_v14 = vld [vmem:[#allocation4 + $0x4a0] sm:$0xf0] }
 0x10c   :  { %3310 = vmatpush.bf16.msra.mxu3 %v6910_v26  ;;  %v9463_v26 = vld [vmem:[#allocation4 + $0x7dc] sm:$0xf0]  ;;  %v6946_v47 = vor.u32 %v9240_v33, %v6945_v30  ;;  %v7422_v17 = vor.u32 %v9355_v13, %v7419_v14 }
 0x10d   :  { %v7834_v50 = vor.u32 %v9463_v26, %v7833_v25  ;;  %v6850_v25 = vor.u32 %v9216_v12, %v6849_v11  ;;  %v9347_v26 = vld [vmem:[#allocation4 + $0x444] sm:$0xf]  ;;  %v7673_v30 = vld [vmem:[#allocation4 + $0x680] sm:$0xf]  ;;  %v7105_v11 = vld [vmem:[#allocation4 + $0x208] sm:$0xf] }
 0x10e   :  { %v1484_v8 = vpop.f32.mrf.mxu3  ;;  %v10020_v7 = vpop.f32.mrf.mxu0  ;;  %v9423_v33 = vld [vmem:[#allocation4 + $0x69c] sm:$0xf0]  ;;  %v9236_v12 = vld [vmem:[#allocation4 + $0xcc] sm:$0xf] }
 0x10f   :  { %3325 = vmatpush.bf16.msra.mxu1 %v7134_v54  ;;  %3334 = vmatpush.bf16.msra.mxu2 %v7550_v24  ;;  %v1485_v39 = vadd.f32 %v1484_v8, %v1471_v28  ;;  %v1684_v54 = vmax.f32 %v1483_v21, 0.0  ;;  %v1496_v20 = vpop.f32.mrf.mxu1  ;;  %v7078_v28 = vor.u32 %v9268_v23, %v7075_v55  ;;  %v7201_v21 = vld [vmem:[#allocation4 + $0x2c8] sm:$0xf]  ;;  %v7390_v8 = vor.u32 %v9347_v26, %v7387_v27  ;;  %v9228_v26 = vld [vmem:[#allocation4 + $0x8c] sm:$0xf] }
 0x110   :  { %3311 = vmatpush.bf16.msra.mxu3 %v6878_v38  ;;  %3291 = vmatpush.bf16.msrb.mxu0 %v7834_v50  ;;  %v9455_v38 = vld [vmem:[#allocation4 + $0x79c] sm:$0xf0]  ;;  %v7234_v50 = vor.u32 %v9312_v22, %v7233_v16  ;;  %v1497_v63 = vadd.f32 %v1496_v20, %v301_v52  ;;  %v9451_v16 = vld [vmem:[#allocation4 + $0x784] sm:$0xf]  ;;  %v9332_v22 = vld [vmem:[#allocation4 + $0x3cc] sm:$0xf] }
 0x111   :  { %v7802_v43 = vor.u32 %v9455_v38, %v7801_v36  ;;  %v1688_v46 = vmax.f32 %v1485_v39, 0.0  ;;  %v9339_v38 = vld [vmem:[#allocation4 + $0x404] sm:$0xf]  ;;  %v7331_v20 = vld [vmem:[#allocation4 + $0x3e8] sm:$0xf0] }
 0x112   :  { %v7355_v39 = vld [vmem:[#allocation4 + $0x420] sm:$0xf0]  ;;  %v7334_v27 = vor.u32 %v9332_v22, %v7331_v20  ;;  %v7585_v20 = vld [vmem:[#allocation4 + $0x5c8] sm:$0xf] }
 0x113   :  { %3326 = vmatpush.bf16.msra.mxu1 %v7102_v42  ;;  %3335 = vmatpush.bf16.msra.mxu2 %v7518_v34  ;;  %v10017_v35 = vpack.c.bf16 %v1688_v46, %v1684_v54  ;;  %v6881_v42 = vld [vmem:[#allocation4 + $0x48] sm:$0xf]  ;;  %v7674_v34 = vor.u32 %v9423_v33, %v7673_v30  ;;  %v7641_v46 = vld [vmem:[#allocation4 + $0x640] sm:$0xf]  ;;  %v7358_v49 = vor.u32 %v9339_v38, %v7355_v39  ;;  %v6883_v39 = vld [vmem:[#allocation4 + $0x68] sm:$0xf0] }
 0x114   :  { %3312 = vmatpush.bf16.msra.mxu3 %v6846_v60  ;;  %3292 = vmatpush.bf16.msrb.mxu0 %v7802_v43  ;;  %v7297_v60 = vld [vmem:[#allocation4 + $0x388] sm:$0xf]  ;;  %v6882_v10 = vor.u32 %v9224_v1, %v6881_v42  ;;  %v7046_v43 = vor.u32 %v9260_v31, %v7043_v32  ;;  %v7609_v42 = vld [vmem:[#allocation4 + $0x600] sm:$0xf]  ;;  %v9459_v1 = vld [vmem:[#allocation4 + $0x7c4] sm:$0xf] }
 0x115   :  { %3271 = vmatmul.bf16.vlgmr.msrb.gmra.mxu1 %v10017_v35  ;;  %v7298_v0 = vor.u32 %v9328_v57, %v7297_v60  ;;  %v9296_v54 = vld [vmem:[#allocation4 + $0x2a4] sm:$0xf0]  ;;  %v9324_v31 = vld [vmem:[#allocation4 + $0x38c] sm:$0xf] }
 0x116   :  { %v10022_v40 = vpop.f32.mrf.mxu0  ;;  %v7137_v60 = vld [vmem:[#allocation4 + $0x248] sm:$0xf]  ;;  %v7299_v32 = vld [vmem:[#allocation4 + $0x3a8] sm:$0xf0] }
 0x117   :  { %3313 = vmatmul.bf16.vlgmr.msra.gmra.mxu3 %v10008_v45  ;;  %3375 = vmatpush.bf16.msrb.mxu1 %v7330_v51  ;;  %v9415_v51 = vld [vmem:[#allocation4 + $0x65c] sm:$0xf0]  ;;  %v1498_v56 = vpop.f32.mrf.mxu1  ;;  %v9288_v57 = vld [vmem:[#allocation4 + $0x264] sm:$0xf0]  ;;  %v7302_v38 = vor.u32 %v9324_v31, %v7299_v32 }
 0x118   :  { %3361 = vmatpush.bf16.msrb.mxu3 %v7074_v59  ;;  %v6914_v59 = vor.u32 %v9232_v48, %v6913_v44  ;;  %3336 = vmatpush.bf16.msra.mxu2 %v7486_v37  ;;  %v7169_v44 = vld [vmem:[#allocation4 + $0x288] sm:$0xf]  ;;  %v7011_v48 = vld [vmem:[#allocation4 + $0x168] sm:$0xf0]  ;;  %v7642_v53 = vor.u32 %v9415_v51, %v7641_v46 }
 0x119   :  { %3293 = vmatpush.bf16.msrb.mxu0 %v7770_v58  ;;  %v7170_v37 = vor.u32 %v9296_v54, %v7169_v44 }
 0x11a   :  { %v1510_v36 = vpop.f32.mrf.mxu3 }
 0x11b   :  { %3376 = vmatpush.bf16.msrb.mxu1 %v7298_v0  ;;  %v7610_v0 = vor.u32 %v9407_v62, %v7609_v42  ;;  %v1538_v13 = vpop.f32.mrf.mxu2  ;;  %v7235_v62 = vld [vmem:[#allocation4 + $0x328] sm:$0xf0] }
 0x11c   :  { %3362 = vmatpush.bf16.msrb.mxu3 %v7042_v5  ;;  %v9320_v5 = vld [vmem:[#allocation4 + $0x364] sm:$0xf0]  ;;  %3337 = vmatpush.bf16.msra.mxu2 %v7454_v2  ;;  %v7835_v2 = vld [vmem:[#allocation4 + $0x7e0] sm:$0xf0] }
 0x11d   :  { %v7266_v15 = vor.u32 %v9320_v5, %v7265_v4  ;;  %3294 = vmatpush.bf16.msrb.mxu0 %v7738_v6  ;;  %v7838_v3 = vor.u32 %v9459_v1, %v7835_v2  ;;  %v7138_v5 = vor.u32 %v9288_v57, %v7137_v60 }
 0x11e   :  { %v10027_v4 = vpop.f32.mrf.mxu0 }
 0x11f   :  { %3377 = vmatpush.bf16.msrb.mxu1 %v7266_v15  ;;  %v6947_v15 = vld [vmem:[#allocation4 + $0xe8] sm:$0xf0] }
 0x120   :  { %3363 = vmatpush.bf16.msrb.mxu3 %v7010_v18  ;;  %v7705_v18 = vld [vmem:[#allocation4 + $0x6c0] sm:$0xf]  ;;  %3338 = vmatpush.bf16.msra.mxu2 %v7422_v17  ;;  %v7803_v17 = vld [vmem:[#allocation4 + $0x7a0] sm:$0xf0] }
 0x121   :  { %v7706_v24 = vor.u32 %v9431_v19, %v7705_v18  ;;  %v1511_v18 = vadd.f32 %v1510_v36, %v1497_v63  ;;  %v1499_v19 = vadd.f32 %v1498_v56, %v301_v52  ;;  %v7806_v23 = vor.u32 %v9451_v16, %v7803_v17  ;;  %v6851_v56 = vld [vmem:[#allocation4 + $0x28] sm:$0xf0]  ;;  %v9265_v16 = vld [vmem:[#allocation4 + $0x1ac] sm:$0xf0]  ;;  %v7675_v17 = vld [vmem:[#allocation4 + $0x6a0] sm:$0xf0] }
 0x122   :  { %v1512_v14 = vpop.f32.mrf.mxu3 }
 0x123   :  { %3295 = vmatpush.bf16.msrb.mxu0 %v7706_v24  ;;  %3378 = vmatpush.bf16.msrb.mxu1 %v7234_v50  ;;  %v6915_v50 = vld [vmem:[#allocation4 + $0xa8] sm:$0xf0]  ;;  %v1513_v30 = vadd.f32 %v1512_v14, %v1499_v19 }
 0x124   :  { %3364 = vmatpush.bf16.msrb.mxu3 %v6978_v29  ;;  %v9304_v29 = vld [vmem:[#allocation4 + $0x2e4] sm:$0xf0]  ;;  %3339 = vmatpush.bf16.msra.mxu2 %v7390_v8  ;;  %v6918_v33 = vor.u32 %v9228_v26, %v6915_v50  ;;  %v7643_v50 = vld [vmem:[#allocation4 + $0x660] sm:$0xf0] }
 0x125   :  { %v7202_v41 = vor.u32 %v9304_v29, %v7201_v21  ;;  %3327 = vmatmul.bf16.vlgmr.msra.gmra.mxu1 %v10017_v35  ;;  %v7771_v21 = vld [vmem:[#allocation4 + $0x760] sm:$0xf0]  ;;  %v1525_v29 = vadd.f32 %v10020_v7, %v1511_v18  ;;  %v1527_v54 = vadd.f32 %v10022_v40, %v1513_v30  ;;  %v9316_v7 = vld [vmem:[#allocation4 + $0x34c] sm:$0xf]  ;;  %v9257_v30 = vld [vmem:[#allocation4 + $0x16c] sm:$0xf0] }
 0x126   :  { %v1582_v46 = vpop.f32.mrf.mxu0 }
 0x127   :  { %3296 = vmatpush.bf16.msrb.mxu0 %v7674_v34  ;;  %3379 = vmatpush.bf16.msrb.mxu1 %v7202_v41  ;;  %v9220_v34 = vld [vmem:[#allocation4 + $0x4c] sm:$0xf]  ;;  %v9435_v41 = vld [vmem:[#allocation4 + $0x704] sm:$0xf]  ;;  %v1539_v44 = vadd.f32 %v1538_v13, %v1525_v29  ;;  %v7017_v29 = vld [vmem:[#allocation4 + $0x150] sm:$0xf] }
 0x128   :  { %3365 = vmatpush.bf16.msrb.mxu3 %v6946_v47  ;;  %v9252_v47 = vld [vmem:[#allocation4 + $0x14c] sm:$0xf]  ;;  %3340 = vmatpush.bf16.msra.mxu2 %v7358_v49  ;;  %v1540_v49 = vpop.f32.mrf.mxu2  ;;  %v6886_v52 = vor.u32 %v9220_v34, %v6883_v39  ;;  %v7553_v34 = vld [vmem:[#allocation4 + $0x588] sm:$0xf]  ;;  %v7018_v39 = vor.u32 %v9257_v30, %v7017_v29 }
 0x129   :  { %v7014_v58 = vor.u32 %v9252_v47, %v7011_v48  ;;  %v7267_v47 = vld [vmem:[#allocation4 + $0x368] sm:$0xf0]  ;;  %v1541_v40 = vadd.f32 %v1540_v49, %v1527_v54  ;;  %v7521_v49 = vld [vmem:[#allocation4 + $0x548] sm:$0xf] }
 0x12a   :  { %v7270_v57 = vor.u32 %v9316_v7, %v7267_v47  ;;  %v7139_v54 = vld [vmem:[#allocation4 + $0x268] sm:$0xf0]  ;;  %v9249_v7 = vld [vmem:[#allocation4 + $0x12c] sm:$0xf0]  ;;  %v9360_v29 = vld [vmem:[#allocation4 + $0x4a4] sm:$0xf0] }
 0x12b   :  { %3297 = vmatpush.bf16.msrb.mxu0 %v7642_v53  ;;  %3380 = vmatpush.bf16.msrb.mxu1 %v7170_v37  ;;  %v9212_v53 = vld [vmem:[#allocation4 + $0xc] sm:$0xf] }
 0x12c   :  { %3366 = vmatpush.bf16.msrb.mxu3 %v6914_v59  ;;  %v9244_v59 = vld [vmem:[#allocation4 + $0x10c] sm:$0xf]  ;;  %v6854_v63 = vor.u32 %v9212_v53, %v6851_v56 }
 0x12d   :  { %v6982_v6 = vor.u32 %v9244_v59, %v6979_v61  ;;  %v9308_v37 = vld [vmem:[#allocation4 + $0x30c] sm:$0xf]  ;;  %v7707_v59 = vld [vmem:[#allocation4 + $0x6e0] sm:$0xf0]  ;;  %v7081_v61 = vld [vmem:[#allocation4 + $0x1d0] sm:$0xf] }
 0x12f   :  { %3298 = vmatpush.bf16.msrb.mxu0 %v7610_v0  ;;  %v1552_v55 = vpop.f32.mrf.mxu1  ;;  %3381 = vmatpush.bf16.msrb.mxu1 %v7138_v5  ;;  %v9273_v0 = vld [vmem:[#allocation4 + $0x1ec] sm:$0xf0]  ;;  %v7238_v5 = vor.u32 %v9308_v37, %v7235_v62 }
 0x130   :  { %3367 = vmatpush.bf16.msrb.mxu3 %v6882_v10  ;;  %v9280_v10 = vld [vmem:[#allocation4 + $0x224] sm:$0xf0]  ;;  %v1553_v51 = vadd.f32 %v1552_v55, %v1539_v44  ;;  %v9292_v55 = vld [vmem:[#allocation4 + $0x28c] sm:$0xf]  ;;  %v7611_v44 = vld [vmem:[#allocation4 + $0x620] sm:$0xf0] }
 0x131   :  { %v7106_v24 = vor.u32 %v9280_v10, %v7105_v11  ;;  %v9300_v11 = vld [vmem:[#allocation4 + $0x2cc] sm:$0xf] }
 0x132   :  { %v7203_v10 = vld [vmem:[#allocation4 + $0x2e8] sm:$0xf0]  ;;  %v10033_v22 = vpop.f32.mrf.mxu0 }
 0x133   :  { %3347 = vmatpush.bf16.msra.mxu0 %v7838_v3  ;;  %3382 = vmatpush.bf16.msrb.mxu1 %v7106_v24 }
 0x134   :  { %3368 = vmatpush.bf16.msrb.mxu3 %v6850_v25  ;;  %v6950_v25 = vor.u32 %v9236_v12, %v6947_v15  ;;  %v9419_v12 = vld [vmem:[#allocation4 + $0x684] sm:$0xf]  ;;  %v7049_v15 = vld [vmem:[#allocation4 + $0x190] sm:$0xf] }
 0x135   :  { %v7678_v18 = vor.u32 %v9419_v12, %v7675_v17  ;;  %v7050_v26 = vor.u32 %v9265_v16, %v7049_v15  ;;  %v7457_v15 = vld [vmem:[#allocation4 + $0x4c8] sm:$0xf] }
 0x136   :  { %3383 = vmatmul.bf16.vlgmr.msrb.gmra.mxu1 %v10017_v35  ;;  %v9368_v16 = vld [vmem:[#allocation4 + $0x4e4] sm:$0xf0] }
 0x137   :  { %3369 = vmatmul.bf16.vlgmr.msrb.gmra.mxu3 %v10008_v45  ;;  %3348 = vmatpush.bf16.msra.mxu0 %v7806_v23  ;;  %v1554_v60 = vpop.f32.mrf.mxu1  ;;  %v9400_v23 = vld [vmem:[#allocation4 + $0x5e4] sm:$0xf0] }
 0x138   :  { %3417 = vmatpush.bf16.msra.mxu3 %v7078_v28  ;;  %v9443_v28 = vld [vmem:[#allocation4 + $0x744] sm:$0xf]  ;;  %3431 = vmatpush.bf16.msra.mxu1 %v7334_v27  ;;  %v1555_v2 = vadd.f32 %v1554_v60, %v1541_v40  ;;  %v7171_v27 = vld [vmem:[#allocation4 + $0x2a8] sm:$0xf0]  ;;  %v7586_v32 = vor.u32 %v9400_v23, %v7585_v20  ;;  %v9241_v40 = vld [vmem:[#allocation4 + $0xec] sm:$0xf0] }
 0x139   :  { %v7774_v8 = vor.u32 %v9443_v28, %v7771_v21  ;;  %v9276_v60 = vld [vmem:[#allocation4 + $0x20c] sm:$0xf] }
 0x13a   :  { %v1566_v36 = vpop.f32.mrf.mxu3  ;;  %v1610_v37 = vpop.f32.mrf.mxu0 }
 0x13b   :  { %3349 = vmatpush.bf16.msra.mxu0 %v7774_v8  ;;  %v1567_v42 = vadd.f32 %v1566_v36, %v1553_v51  ;;  %v1594_v24 = vpop.f32.mrf.mxu2  ;;  %v9392_v36 = vld [vmem:[#allocation4 + $0x5a4] sm:$0xf0] }
 0x13c   :  { %3418 = vmatpush.bf16.msra.mxu3 %v7046_v43  ;;  %v7739_v43 = vld [vmem:[#allocation4 + $0x720] sm:$0xf0]  ;;  %3432 = vmatpush.bf16.msra.mxu1 %v7302_v38  ;;  %v7174_v38 = vor.u32 %v9292_v55, %v7171_v27  ;;  %v9384_v51 = vld [vmem:[#allocation4 + $0x564] sm:$0xf0]  ;;  %v6889_v55 = vld [vmem:[#allocation4 + $0x50] sm:$0xf] }
 0x13d   :  { %v7742_v48 = vor.u32 %v9435_v41, %v7739_v43  ;;  %v1581_v13 = vadd.f32 %v10027_v4, %v1567_v42  ;;  %v9411_v4 = vld [vmem:[#allocation4 + $0x644] sm:$0xf]  ;;  %v9284_v41 = vld [vmem:[#allocation4 + $0x24c] sm:$0xf]  ;;  %v7522_v62 = vor.u32 %v9384_v51, %v7521_v49  ;;  %v7273_v27 = vld [vmem:[#allocation4 + $0x350] sm:$0xf] }
 0x13e   :  { %v7646_v31 = vor.u32 %v9411_v4, %v7643_v50  ;;  %v9403_v43 = vld [vmem:[#allocation4 + $0x604] sm:$0xf]  ;;  %v7142_v53 = vor.u32 %v9284_v41, %v7139_v54  ;;  %v9321_v4 = vld [vmem:[#allocation4 + $0x36c] sm:$0xf0]  ;;  %v7083_v41 = vld [vmem:[#allocation4 + $0x1f0] sm:$0xf0] }
 0x13f   :  { %3350 = vmatpush.bf16.msra.mxu0 %v7742_v48  ;;  %v1685_v28 = vmax.f32 %v1581_v13, 0.0  ;;  %v7614_v47 = vor.u32 %v9403_v43, %v7611_v44  ;;  %v7554_v48 = vor.u32 %v9392_v36, %v7553_v34  ;;  %v7305_v13 = vld [vmem:[#allocation4 + $0x390] sm:$0xf]  ;;  %v7393_v44 = vld [vmem:[#allocation4 + $0x448] sm:$0xf] }
 0x140   :  { %3419 = vmatpush.bf16.msra.mxu3 %v7014_v58  ;;  %v9427_v58 = vld [vmem:[#allocation4 + $0x6c4] sm:$0xf]  ;;  %3433 = vmatpush.bf16.msra.mxu1 %v7270_v57  ;;  %v9352_v54 = vld [vmem:[#allocation4 + $0x464] sm:$0xf0] }
 0x141   :  { %v7710_v1 = vor.u32 %v9427_v58, %v7707_v59  ;;  %v7107_v58 = vld [vmem:[#allocation4 + $0x228] sm:$0xf0]  ;;  %v6953_v59 = vld [vmem:[#allocation4 + $0xd0] sm:$0xf] }
 0x142   :  { %v1568_v3 = vpop.f32.mrf.mxu3 }
 0x143   :  { %v1569_v14 = vadd.f32 %v1568_v3, %v1555_v2  ;;  %3351 = vmatpush.bf16.msra.mxu0 %v7710_v1  ;;  %v1596_v42 = vpop.f32.mrf.mxu2  ;;  %v7489_v1 = vld [vmem:[#allocation4 + $0x508] sm:$0xf]  ;;  %v6954_v3 = vor.u32 %v9241_v40, %v6953_v59 }
 0x144   :  { %3420 = vmatpush.bf16.msra.mxu3 %v6982_v6  ;;  %v7082_v6 = vor.u32 %v9273_v0, %v7081_v61  ;;  %3434 = vmatpush.bf16.msra.mxu1 %v7238_v5  ;;  %v7337_v61 = vld [vmem:[#allocation4 + $0x3d0] sm:$0xf]  ;;  %v9376_v2 = vld [vmem:[#allocation4 + $0x524] sm:$0xf0] }
 0x145   :  { %v1583_v19 = vadd.f32 %v1582_v46, %v1569_v14  ;;  %v6985_v46 = vld [vmem:[#allocation4 + $0x110] sm:$0xf]  ;;  %v7490_v12 = vor.u32 %v9376_v2, %v7489_v1  ;;  %v7361_v40 = vld [vmem:[#allocation4 + $0x408] sm:$0xf] }
 0x146   :  { %v6986_v56 = vor.u32 %v9249_v7, %v6985_v46  ;;  %v9337_v0 = vld [vmem:[#allocation4 + $0x3ec] sm:$0xf0] }
 0x147   :  { %v1689_v21 = vmax.f32 %v1583_v19, 0.0  ;;  %3352 = vmatpush.bf16.msra.mxu0 %v7678_v18  ;;  %v9329_v14 = vld [vmem:[#allocation4 + $0x3ac] sm:$0xf0] }
 0x148   :  { %3421 = vmatpush.bf16.msra.mxu3 %v6950_v25  ;;  %v7206_v25 = vor.u32 %v9300_v11, %v7203_v10  ;;  %v6921_v11 = vld [vmem:[#allocation4 + $0x90] sm:$0xf]  ;;  %v7306_v23 = vor.u32 %v9329_v14, %v7305_v13  ;;  %v9253_v13 = vld [vmem:[#allocation4 + $0x154] sm:$0xf] }
 0x149   :  { %v10036_v8 = vpack.c.bf16 %v1689_v21, %v1685_v28  ;;  %v9233_v10 = vld [vmem:[#allocation4 + $0xac] sm:$0xf0]  ;;  %v7425_v21 = vld [vmem:[#allocation4 + $0x488] sm:$0xf]  ;;  %v7019_v14 = vld [vmem:[#allocation4 + $0x170] sm:$0xf0] }
 0x14a   :  { %3435 = vmatpush.bf16.msra.mxu1 %v7206_v25  ;;  %v6922_v18 = vor.u32 %v9233_v10, %v6921_v11  ;;  %v7426_v36 = vor.u32 %v9360_v29, %v7425_v21  ;;  %v9297_v11 = vld [vmem:[#allocation4 + $0x2ac] sm:$0xf0]  ;;  %v9380_v21 = vld [vmem:[#allocation4 + $0x54c] sm:$0xf] }
 0x14b   :  { %3285 = vmatmul.bf16.vlgmr.msrb.gmra.mxu2 %v10036_v8  ;;  %3353 = vmatpush.bf16.msra.mxu0 %v7646_v31  ;;  %v7274_v31 = vor.u32 %v9321_v4, %v7273_v27  ;;  %v9245_v4 = vld [vmem:[#allocation4 + $0x114] sm:$0xf]  ;;  %v7523_v29 = vld [vmem:[#allocation4 + $0x568] sm:$0xf0] }
 0x14c   :  { %3422 = vmatpush.bf16.msra.mxu3 %v6918_v33  ;;  %v302_v33 = vperm.slane %v9993_v9, 3  ;;  %3389 = vmatpush.bf16.msrb.mxu2 %v7586_v32  ;;  %v6857_v32 = vld [vmem:[#allocation4 + $0x10] sm:$0xf] }
 0x14d   :  { %v9217_v9 = vld [vmem:[#allocation4 + $0x2c] sm:$0xf0] }
 0x14e   :  { %3436 = vmatpush.bf16.msra.mxu1 %v7174_v38  ;;  %v1595_v57 = vadd.f32 %v1594_v24, %v302_v33  ;;  %v9225_v24 = vld [vmem:[#allocation4 + $0x6c] sm:$0xf0] }
 0x14f   :  { %3354 = vmatpush.bf16.msra.mxu0 %v7614_v47  ;;  %v6890_v30 = vor.u32 %v9225_v24, %v6889_v55  ;;  %v9313_v38 = vld [vmem:[#allocation4 + $0x32c] sm:$0xf0]  ;;  %v6858_v47 = vor.u32 %v9217_v9, %v6857_v32  ;;  %v7022_v55 = vor.u32 %v9253_v13, %v7019_v14  ;;  %v7809_v32 = vld [vmem:[#allocation4 + $0x788] sm:$0xf] }
 0x150   :  { %3423 = vmatpush.bf16.msra.mxu3 %v6886_v52  ;;  %v1622_v52 = vpop.f32.mrf.mxu1  ;;  %3390 = vmatpush.bf16.msrb.mxu2 %v7554_v48  ;;  %v1609_v5 = vadd.f32 %v10033_v22, %v1595_v57  ;;  %v1597_v22 = vadd.f32 %v1596_v42, %v302_v33  ;;  %v7241_v33 = vld [vmem:[#allocation4 + $0x310] sm:$0xf]  ;;  %v9261_v57 = vld [vmem:[#allocation4 + $0x194] sm:$0xf]  ;;  %v9344_v42 = vld [vmem:[#allocation4 + $0x424] sm:$0xf0] }
 0x151   :  { %v7242_v49 = vor.u32 %v9313_v38, %v7241_v33  ;;  %v7145_v24 = vld [vmem:[#allocation4 + $0x250] sm:$0xf]  ;;  %v9456_v9 = vld [vmem:[#allocation4 + $0x7a4] sm:$0xf0]  ;;  %v9237_v38 = vld [vmem:[#allocation4 + $0xd4] sm:$0xf] }
 0x152   :  { %3437 = vmatpush.bf16.msra.mxu1 %v7142_v53  ;;  %v1623_v19 = vadd.f32 %v1622_v52, %v1609_v5  ;;  %v1664_v50 = vpop.f32.mrf.mxu0  ;;  %v1611_v34 = vadd.f32 %v1610_v37, %v1597_v22  ;;  %v7209_v52 = vld [vmem:[#allocation4 + $0x2d0] sm:$0xf]  ;;  %v7051_v37 = vld [vmem:[#allocation4 + $0x1b0] sm:$0xf0]  ;;  %v7362_v5 = vor.u32 %v9344_v42, %v7361_v40  ;;  %v7459_v40 = vld [vmem:[#allocation4 + $0x4e8] sm:$0xf0] }
 0x153   :  { %v9289_v22 = vld [vmem:[#allocation4 + $0x26c] sm:$0xf0]  ;;  %v7745_v42 = vld [vmem:[#allocation4 + $0x708] sm:$0xf] }
 0x154   :  { %3424 = vmatpush.bf16.msra.mxu3 %v6854_v63  ;;  %v7110_v63 = vor.u32 %v9276_v60, %v7107_v58  ;;  %3391 = vmatpush.bf16.msrb.mxu2 %v7522_v62  ;;  %v9305_v60 = vld [vmem:[#allocation4 + $0x2ec] sm:$0xf0]  ;;  %v9432_v13 = vld [vmem:[#allocation4 + $0x6e4] sm:$0xf0] }
 0x155   :  { %v7210_v2 = vor.u32 %v9305_v60, %v7209_v52  ;;  %v6923_v60 = vld [vmem:[#allocation4 + $0xb0] sm:$0xf0] }
 0x156   :  { %3438 = vmatpush.bf16.msra.mxu1 %v7110_v63  ;;  %v7054_v63 = vor.u32 %v9261_v57, %v7051_v37  ;;  %v9325_v57 = vld [vmem:[#allocation4 + $0x394] sm:$0xf] }
 0x157   :  { %3425 = vmatmul.bf16.vlgmr.msra.gmra.mxu3 %v10008_v45  ;;  %v7307_v37 = vld [vmem:[#allocation4 + $0x3b0] sm:$0xf0] }
 0x158   :  { %3473 = vmatpush.bf16.msrb.mxu3 %v7082_v6  ;;  %v7338_v6 = vor.u32 %v9337_v0, %v7337_v61  ;;  %v1624_v17 = vpop.f32.mrf.mxu1  ;;  %3392 = vmatpush.bf16.msrb.mxu2 %v7490_v12  ;;  %v9396_v61 = vld [vmem:[#allocation4 + $0x5cc] sm:$0xf] }
 0x159   :  { %3439 = vmatmul.bf16.vlgmr.msra.gmra.mxu1 %v10017_v35  ;;  %v1625_v46 = vadd.f32 %v1624_v17, %v1611_v34  ;;  %v7587_v0 = vld [vmem:[#allocation4 + $0x5e8] sm:$0xf0]  ;;  %v7113_v34 = vld [vmem:[#allocation4 + $0x210] sm:$0xf] }
 0x15a   :  { %3487 = vmatpush.bf16.msrb.mxu1 %v7338_v6  ;;  %v1636_v20 = vpop.f32.mrf.mxu3  ;;  %v1666_v1 = vpop.f32.mrf.mxu0  ;;  %v7177_v6 = vld [vmem:[#allocation4 + $0x290] sm:$0xf]  ;;  %v7590_v12 = vor.u32 %v9396_v61, %v7587_v0  ;;  %v7555_v17 = vld [vmem:[#allocation4 + $0x5a8] sm:$0xf0]  ;;  %v7310_v0 = vor.u32 %v9325_v57, %v7307_v37 }
 0x15b   :  { %v1650_v25 = vpop.f32.mrf.mxu2  ;;  %v1637_v28 = vadd.f32 %v1636_v20, %v1623_v19  ;;  %3341 = vmatmul.bf16.vlgmr.msra.gmra.mxu2 %v10036_v8  ;;  %v7178_v19 = vor.u32 %v9297_v11, %v7177_v6  ;;  %v7841_v20 = vld [vmem:[#allocation4 + $0x7c8] sm:$0xf]  ;;  %v9356_v11 = vld [vmem:[#allocation4 + $0x48c] sm:$0xf]  ;;  %v9393_v57 = vld [vmem:[#allocation4 + $0x5ac] sm:$0xf0] }
 0x15c   :  { %3474 = vmatpush.bf16.msrb.mxu3 %v7050_v26  ;;  %v7458_v26 = vor.u32 %v9368_v16, %v7457_v15  ;;  %v9388_v16 = vld [vmem:[#allocation4 + $0x58c] sm:$0xf] }
 0x15d   :  { %v1651_v43 = vadd.f32 %v1650_v25, %v1637_v28  ;;  %v7558_v27 = vor.u32 %v9388_v16, %v7555_v17  ;;  %v9213_v16 = vld [vmem:[#allocation4 + $0x14] sm:$0xf] }
 0x15e   :  { %3488 = vmatpush.bf16.msrb.mxu1 %v7306_v23  ;;  %3393 = vmatpush.bf16.msrb.mxu2 %v7458_v26  ;;  %v9464_v23 = vld [vmem:[#allocation4 + $0x7e4] sm:$0xf0]  ;;  %v6859_v17 = vld [vmem:[#allocation4 + $0x30] sm:$0xf0] }
 0x15f   :  { %v1665_v58 = vadd.f32 %v1664_v50, %v1651_v43  ;;  %v6987_v50 = vld [vmem:[#allocation4 + $0x130] sm:$0xf0]  ;;  %v7842_v28 = vor.u32 %v9464_v23, %v7841_v20  ;;  %v9348_v23 = vld [vmem:[#allocation4 + $0x44c] sm:$0xf] }
 0x160   :  { %3475 = vmatpush.bf16.msrb.mxu3 %v7018_v39  ;;  %v9269_v39 = vld [vmem:[#allocation4 + $0x1d4] sm:$0xf]  ;;  %v1678_v7 = vpop.f32.mrf.mxu1  ;;  %v6990_v33 = vor.u32 %v9245_v4, %v6987_v50  ;;  %v6862_v4 = vor.u32 %v9213_v16, %v6859_v17  ;;  %v9242_v17 = vld [vmem:[#allocation4 + $0xf4] sm:$0xf0] }
 0x161   :  { %v7086_v51 = vor.u32 %v9269_v39, %v7083_v41  ;;  %v1679_v10 = vadd.f32 %v1678_v7, %v1665_v58  ;;  %v7526_v39 = vor.u32 %v9380_v21, %v7523_v29  ;;  %v6955_v41 = vld [vmem:[#allocation4 + $0xf0] sm:$0xf0]  ;;  %v7491_v7 = vld [vmem:[#allocation4 + $0x528] sm:$0xf0] }
 0x162   :  { %3489 = vmatpush.bf16.msrb.mxu1 %v7274_v31  ;;  %v1638_v48 = vpop.f32.mrf.mxu3  ;;  %3394 = vmatpush.bf16.msrb.mxu2 %v7426_v36  ;;  %v7146_v31 = vor.u32 %v9289_v22, %v7145_v24  ;;  %v9281_v36 = vld [vmem:[#allocation4 + $0x22c] sm:$0xf0]  ;;  %v9333_v43 = vld [vmem:[#allocation4 + $0x3d4] sm:$0xf]  ;;  %v7395_v24 = vld [vmem:[#allocation4 + $0x468] sm:$0xf0] }
 0x163   :  { %v1639_v53 = vadd.f32 %v1638_v48, %v1625_v46  ;;  %v1652_v59 = vpop.f32.mrf.mxu2  ;;  %v1686_v25 = vmax.f32 %v1679_v10, 0.0  ;;  %v9372_v46 = vld [vmem:[#allocation4 + $0x50c] sm:$0xf]  ;;  %v7777_v48 = vld [vmem:[#allocation4 + $0x748] sm:$0xf]  ;;  %v7398_v21 = vor.u32 %v9348_v23, %v7395_v24 }
 0x164   :  { %3476 = vmatpush.bf16.msrb.mxu3 %v6986_v56  ;;  %v7394_v56 = vor.u32 %v9352_v54, %v7393_v44  ;;  %v7339_v44 = vld [vmem:[#allocation4 + $0x3f0] sm:$0xf0]  ;;  %v7810_v54 = vor.u32 %v9456_v9, %v7809_v32  ;;  %v7427_v10 = vld [vmem:[#allocation4 + $0x4a8] sm:$0xf0]  ;;  %v7089_v22 = vld [vmem:[#allocation4 + $0x1d8] sm:$0xf] }
 0x165   :  { %v1653_v62 = vadd.f32 %v1652_v59, %v1639_v53  ;;  %v7342_v52 = vor.u32 %v9333_v43, %v7339_v44  ;;  %v9229_v53 = vld [vmem:[#allocation4 + $0x94] sm:$0xf]  ;;  %v9364_v59 = vld [vmem:[#allocation4 + $0x4cc] sm:$0xf]  ;;  %v9401_v43 = vld [vmem:[#allocation4 + $0x5ec] sm:$0xf0] }
 0x166   :  { %3490 = vmatpush.bf16.msrb.mxu1 %v7242_v49  ;;  %3395 = vmatpush.bf16.msrb.mxu2 %v7394_v56  ;;  %v9448_v49 = vld [vmem:[#allocation4 + $0x764] sm:$0xf0]  ;;  %v7494_v56 = vor.u32 %v9372_v46, %v7491_v7  ;;  %v6926_v61 = vor.u32 %v9229_v53, %v6923_v60  ;;  %v7243_v20 = vld [vmem:[#allocation4 + $0x330] sm:$0xf0]  ;;  %v9340_v32 = vld [vmem:[#allocation4 + $0x40c] sm:$0xf] }
 0x167   :  { %v7778_v58 = vor.u32 %v9448_v49, %v7777_v48  ;;  %v7363_v9 = vld [vmem:[#allocation4 + $0x428] sm:$0xf0]  ;;  %v9293_v7 = vld [vmem:[#allocation4 + $0x294] sm:$0xf]  ;;  %v7617_v53 = vld [vmem:[#allocation4 + $0x608] sm:$0xf] }
 0x168   :  { %3477 = vmatpush.bf16.msrb.mxu3 %v6954_v3  ;;  %v1667_v3 = vadd.f32 %v1666_v1, %v1653_v62  ;;  %v1680_v15 = vpop.f32.mrf.mxu1  ;;  %v9440_v62 = vld [vmem:[#allocation4 + $0x724] sm:$0xf0]  ;;  %v9221_v1 = vld [vmem:[#allocation4 + $0x54] sm:$0xf]  ;;  %v7561_v60 = vld [vmem:[#allocation4 + $0x590] sm:$0xf] }
 0x169   :  { %v7746_v6 = vor.u32 %v9440_v62, %v7745_v42  ;;  %v9285_v42 = vld [vmem:[#allocation4 + $0x254] sm:$0xf]  ;;  %v7497_v23 = vld [vmem:[#allocation4 + $0x510] sm:$0xf] }
 0x16a   :  { %3491 = vmatpush.bf16.msrb.mxu1 %v7210_v2  ;;  %3396 = vmatpush.bf16.msrb.mxu2 %v7362_v5  ;;  %v7462_v2 = vor.u32 %v9364_v59, %v7459_v40  ;;  %v7275_v5 = vld [vmem:[#allocation4 + $0x370] sm:$0xf0]  ;;  %v7843_v59 = vld [vmem:[#allocation4 + $0x7e8] sm:$0xf0] }
 0x16b   :  { %v7147_v62 = vld [vmem:[#allocation4 + $0x270] sm:$0xf0] }
 0x16c   :  { %3478 = vmatpush.bf16.msrb.mxu3 %v6922_v18  ;;  %v1681_v18 = vadd.f32 %v1680_v15, %v1667_v3  ;;  %v9317_v3 = vld [vmem:[#allocation4 + $0x354] sm:$0xf] }
 0x16d   :  { %3397 = vmatmul.bf16.vlgmr.msrb.gmra.mxu2 %v10036_v8  ;;  %v7278_v15 = vor.u32 %v9317_v3, %v7275_v5  ;;  %v7529_v3 = vld [vmem:[#allocation4 + $0x550] sm:$0xf] }
 0x16e   :  { %v1690_v26 = vmax.f32 %v1681_v18, 0.0  ;;  %3445 = vmatpush.bf16.msra.mxu2 %v7590_v12  ;;  %3492 = vmatpush.bf16.msrb.mxu1 %v7178_v19  ;;  %v7713_v12 = vld [vmem:[#allocation4 + $0x6c8] sm:$0xf]  ;;  %v7430_v18 = vor.u32 %v9356_v11, %v7427_v10  ;;  %v9309_v19 = vld [vmem:[#allocation4 + $0x314] sm:$0xf] }
 0x16f   :  { %v7246_v50 = vor.u32 %v9309_v19, %v7243_v20  ;;  %v9385_v5 = vld [vmem:[#allocation4 + $0x56c] sm:$0xf0]  ;;  %v9452_v11 = vld [vmem:[#allocation4 + $0x78c] sm:$0xf]  ;;  %v9338_v19 = vld [vmem:[#allocation4 + $0x3f4] sm:$0xf0] }
 0x170   :  { %3479 = vmatpush.bf16.msrb.mxu3 %v6890_v30  ;;  %v10048_v30 = vpack.c.bf16 %v1690_v26, %v1686_v25  ;;  %v9274_v25 = vld [vmem:[#allocation4 + $0x1f4] sm:$0xf0]  ;;  %v7681_v26 = vld [vmem:[#allocation4 + $0x688] sm:$0xf]  ;;  %v7811_v10 = vld [vmem:[#allocation4 + $0x7a8] sm:$0xf0]  ;;  %v7530_v16 = vor.u32 %v9385_v5, %v7529_v3 }
 0x171   :  { %v7090_v29 = vor.u32 %v9274_v25, %v7089_v22  ;;  %v7814_v20 = vor.u32 %v9452_v11, %v7811_v10  ;;  %v9444_v22 = vld [vmem:[#allocation4 + $0x74c] sm:$0xf]  ;;  %v7369_v11 = vld [vmem:[#allocation4 + $0x410] sm:$0xf] }
 0x172   :  { %3446 = vmatpush.bf16.msra.mxu2 %v7558_v27  ;;  %3299 = vmatmul.bf16.vlgmr.msrb.gmra.mxu0 %v10048_v30  ;;  %v9424_v27 = vld [vmem:[#allocation4 + $0x6a4] sm:$0xf0]  ;;  %v7779_v25 = vld [vmem:[#allocation4 + $0x768] sm:$0xf0]  ;;  %v9345_v10 = vld [vmem:[#allocation4 + $0x42c] sm:$0xf0] }
 0x173   :  { %3403 = vmatpush.bf16.msrb.mxu0 %v7842_v28  ;;  %3493 = vmatpush.bf16.msrb.mxu1 %v7146_v31  ;;  %v9301_v28 = vld [vmem:[#allocation4 + $0x2d4] sm:$0xf] }
 0x174   :  { %3480 = vmatpush.bf16.msrb.mxu3 %v6858_v47  ;;  %v7114_v47 = vor.u32 %v9281_v36, %v7113_v34  ;;  %v7211_v31 = vld [vmem:[#allocation4 + $0x2f0] sm:$0xf0]  ;;  %v7057_v34 = vld [vmem:[#allocation4 + $0x198] sm:$0xf] }
 0x175   :  { %v9266_v36 = vld [vmem:[#allocation4 + $0x1b4] sm:$0xf0]  ;;  %v7214_v44 = vor.u32 %v9301_v28, %v7211_v31  ;;  %v7782_v31 = vor.u32 %v9444_v22, %v7779_v25 }
 0x176   :  { %3447 = vmatpush.bf16.msra.mxu2 %v7526_v39  ;;  %v9416_v39 = vld [vmem:[#allocation4 + $0x664] sm:$0xf0]  ;;  %v7058_v46 = vor.u32 %v9266_v36, %v7057_v34  ;;  %v9234_v28 = vld [vmem:[#allocation4 + $0xb4] sm:$0xf0]  ;;  %v7747_v34 = vld [vmem:[#allocation4 + $0x728] sm:$0xf0] }
 0x177   :  { %3481 = vmatmul.bf16.vlgmr.msrb.gmra.mxu3 %v10008_v45  ;;  %3404 = vmatpush.bf16.msrb.mxu0 %v7810_v54  ;;  %v7366_v54 = vor.u32 %v9340_v32, %v7363_v9  ;;  %v7465_v32 = vld [vmem:[#allocation4 + $0x4d0] sm:$0xf] }
 0x178   :  { %3529 = vmatpush.bf16.msra.mxu3 %v7086_v51  ;;  %v6958_v51 = vor.u32 %v9237_v38, %v6955_v41  ;;  %3494 = vmatpush.bf16.msrb.mxu1 %v7114_v47  ;;  %v7649_v38 = vld [vmem:[#allocation4 + $0x648] sm:$0xf]  ;;  %v7593_v41 = vld [vmem:[#allocation4 + $0x5d0] sm:$0xf]  ;;  %v7179_v47 = vld [vmem:[#allocation4 + $0x2b0] sm:$0xf0] }
 0x179   :  { %v7650_v48 = vor.u32 %v9416_v39, %v7649_v38  ;;  %v7594_v49 = vor.u32 %v9401_v43, %v7593_v41  ;;  %v7182_v37 = vor.u32 %v9293_v7, %v7179_v47  ;;  %v9369_v9 = vld [vmem:[#allocation4 + $0x4ec] sm:$0xf0]  ;;  %v6897_v39 = vld [vmem:[#allocation4 + $0x58] sm:$0xf] }
 0x17a   :  { %3448 = vmatpush.bf16.msra.mxu2 %v7494_v56  ;;  %v9408_v56 = vld [vmem:[#allocation4 + $0x624] sm:$0xf0]  ;;  %v7466_v41 = vor.u32 %v9369_v9, %v7465_v32  ;;  %v9226_v43 = vld [vmem:[#allocation4 + $0x74] sm:$0xf0]  ;;  %v7433_v7 = vld [vmem:[#allocation4 + $0x490] sm:$0xf] }
 0x17b   :  { %3405 = vmatpush.bf16.msrb.mxu0 %v7778_v58  ;;  %3495 = vmatmul.bf16.vlgmr.msrb.gmra.mxu1 %v10017_v35  ;;  %v9460_v58 = vld [vmem:[#allocation4 + $0x7cc] sm:$0xf]  ;;  %v9361_v47 = vld [vmem:[#allocation4 + $0x4ac] sm:$0xf0] }
 0x17c   :  { %3530 = vmatpush.bf16.msra.mxu3 %v7054_v63  ;;  %3543 = vmatpush.bf16.msra.mxu1 %v7342_v52  ;;  %v6891_v63 = vld [vmem:[#allocation4 + $0x70] sm:$0xf0]  ;;  %v9258_v52 = vld [vmem:[#allocation4 + $0x174] sm:$0xf0]  ;;  %v9465_v32 = vld [vmem:[#allocation4 + $0x7ec] sm:$0xf0] }
 0x17d   :  { %v6894_v14 = vor.u32 %v9221_v1, %v6891_v63  ;;  %v6993_v1 = vld [vmem:[#allocation4 + $0x118] sm:$0xf]  ;;  %v7846_v63 = vor.u32 %v9460_v58, %v7843_v59  ;;  %v7401_v58 = vld [vmem:[#allocation4 + $0x450] sm:$0xf] }
 0x17e   :  { %3449 = vmatpush.bf16.msra.mxu2 %v7462_v2  ;;  %v9250_v2 = vld [vmem:[#allocation4 + $0x134] sm:$0xf0] }
 0x17f   :  { %3406 = vmatpush.bf16.msrb.mxu0 %v7746_v6  ;;  %v7150_v6 = vor.u32 %v9285_v42, %v7147_v62  ;;  %v9270_v42 = vld [vmem:[#allocation4 + $0x1dc] sm:$0xf] }
 0x180   :  { %3531 = vmatpush.bf16.msra.mxu3 %v7022_v55  ;;  %3544 = vmatpush.bf16.msra.mxu1 %v7310_v0  ;;  %v7714_v55 = vor.u32 %v9432_v13, %v7713_v12  ;;  %v7562_v0 = vor.u32 %v9393_v57, %v7561_v60  ;;  %v6994_v12 = vor.u32 %v9250_v2, %v6993_v1  ;;  %v9277_v13 = vld [vmem:[#allocation4 + $0x214] sm:$0xf]  ;;  %v7249_v57 = vld [vmem:[#allocation4 + $0x318] sm:$0xf]  ;;  %v7091_v62 = vld [vmem:[#allocation4 + $0x1f8] sm:$0xf0] }
 0x181   :  { %v7434_v60 = vor.u32 %v9361_v47, %v7433_v7  ;;  %v7094_v5 = vor.u32 %v9270_v42, %v7091_v62  ;;  %v7817_v7 = vld [vmem:[#allocation4 + $0x790] sm:$0xf] }
 0x182   :  { %3450 = vmatpush.bf16.msra.mxu2 %v7430_v18  ;;  %3355 = vmatmul.bf16.vlgmr.msra.gmra.mxu0 %v10048_v30  ;;  %v7345_v18 = vld [vmem:[#allocation4 + $0x3d8] sm:$0xf]  ;;  %v9457_v47 = vld [vmem:[#allocation4 + $0x7ac] sm:$0xf0] }
 0x183   :  { %3407 = vmatpush.bf16.msrb.mxu0 %v7714_v55  ;;  %v9377_v55 = vld [vmem:[#allocation4 + $0x52c] sm:$0xf0] }
 0x184   :  { %3532 = vmatpush.bf16.msra.mxu3 %v6990_v33  ;;  %3545 = vmatpush.bf16.msra.mxu1 %v7278_v15  ;;  %v7682_v33 = vor.u32 %v9424_v27, %v7681_v26  ;;  %v6961_v15 = vld [vmem:[#allocation4 + $0xd8] sm:$0xf]  ;;  %v7346_v27 = vor.u32 %v9338_v19, %v7345_v18  ;;  %v7595_v18 = vld [vmem:[#allocation4 + $0x5f0] sm:$0xf0]  ;;  %v7785_v42 = vld [vmem:[#allocation4 + $0x750] sm:$0xf] }
 0x185   :  { %v6962_v26 = vor.u32 %v9242_v17, %v6961_v15  ;;  %v9412_v15 = vld [vmem:[#allocation4 + $0x64c] sm:$0xf]  ;;  %v9397_v17 = vld [vmem:[#allocation4 + $0x5d4] sm:$0xf]  ;;  %v9449_v62 = vld [vmem:[#allocation4 + $0x76c] sm:$0xf0] }
 0x186   :  { %3451 = vmatpush.bf16.msra.mxu2 %v7398_v21  ;;  %v7313_v21 = vld [vmem:[#allocation4 + $0x398] sm:$0xf]  ;;  %v7598_v25 = vor.u32 %v9397_v17, %v7595_v18  ;;  %v6899_v18 = vld [vmem:[#allocation4 + $0x78] sm:$0xf0] }
 0x187   :  { %3408 = vmatpush.bf16.msrb.mxu0 %v7682_v33  ;;  %v9436_v33 = vld [vmem:[#allocation4 + $0x70c] sm:$0xf] }
 0x188   :  { %3533 = vmatpush.bf16.msra.mxu3 %v6958_v51  ;;  %3546 = vmatpush.bf16.msra.mxu1 %v7246_v50  ;;  %v7025_v51 = vld [vmem:[#allocation4 + $0x158] sm:$0xf]  ;;  %v7498_v50 = vor.u32 %v9377_v55, %v7497_v23 }
 0x189   :  { %v7026_v40 = vor.u32 %v9258_v52, %v7025_v51  ;;  %v6898_v51 = vor.u32 %v9226_v43, %v6897_v39  ;;  %v7185_v55 = vld [vmem:[#allocation4 + $0x298] sm:$0xf]  ;;  %v9246_v39 = vld [vmem:[#allocation4 + $0x11c] sm:$0xf] }
 0x18a   :  { %3452 = vmatpush.bf16.msra.mxu2 %v7366_v54  ;;  %v9322_v54 = vld [vmem:[#allocation4 + $0x374] sm:$0xf0] }
 0x18b   :  { %3409 = vmatpush.bf16.msrb.mxu0 %v7650_v48  ;;  %v9428_v48 = vld [vmem:[#allocation4 + $0x6cc] sm:$0xf] }
 0x18c   :  { %3534 = vmatpush.bf16.msra.mxu3 %v6926_v61  ;;  %3547 = vmatpush.bf16.msra.mxu1 %v7214_v44  ;;  %v7618_v61 = vor.u32 %v9408_v56, %v7617_v53  ;;  %v7281_v44 = vld [vmem:[#allocation4 + $0x358] sm:$0xf] }
 0x18d   :  { %3453 = vmatmul.bf16.vlgmr.msra.gmra.mxu2 %v10036_v8  ;;  %v7282_v52 = vor.u32 %v9322_v54, %v7281_v44  ;;  %v6865_v53 = vld [vmem:[#allocation4 + $0x18] sm:$0xf]  ;;  %v9381_v44 = vld [vmem:[#allocation4 + $0x554] sm:$0xf] }
 0x18e   :  { %3501 = vmatpush.bf16.msrb.mxu2 %v7594_v49  ;;  %v7715_v49 = vld [vmem:[#allocation4 + $0x6e8] sm:$0xf0]  ;;  %v9218_v56 = vld [vmem:[#allocation4 + $0x34] sm:$0xf0]  ;;  %v7531_v54 = vld [vmem:[#allocation4 + $0x570] sm:$0xf0] }
 0x18f   :  { %3410 = vmatpush.bf16.msrb.mxu0 %v7618_v61  ;;  %v7718_v59 = vor.u32 %v9428_v48, %v7715_v49  ;;  %v9420_v61 = vld [vmem:[#allocation4 + $0x68c] sm:$0xf]  ;;  %v6866_v1 = vor.u32 %v9218_v56, %v6865_v53  ;;  %v7121_v49 = vld [vmem:[#allocation4 + $0x218] sm:$0xf]  ;;  %v7534_v53 = vor.u32 %v9381_v44, %v7531_v54  ;;  %v6963_v56 = vld [vmem:[#allocation4 + $0xf8] sm:$0xf0] }
 0x190   :  { %3535 = vmatpush.bf16.msra.mxu3 %v6894_v14  ;;  %3548 = vmatpush.bf16.msra.mxu1 %v7182_v37  ;;  %v7115_v14 = vld [vmem:[#allocation4 + $0x230] sm:$0xf0]  ;;  %v9314_v37 = vld [vmem:[#allocation4 + $0x334] sm:$0xf0] }
 0x191   :  { %v7118_v24 = vor.u32 %v9277_v13, %v7115_v14  ;;  %v7250_v2 = vor.u32 %v9314_v37, %v7249_v57  ;;  %v9262_v13 = vld [vmem:[#allocation4 + $0x19c] sm:$0xf]  ;;  %v7818_v37 = vor.u32 %v9457_v47, %v7817_v7  ;;  %v9341_v44 = vld [vmem:[#allocation4 + $0x414] sm:$0xf]  ;;  %v7657_v7 = vld [vmem:[#allocation4 + $0x650] sm:$0xf] }
 0x192   :  { %3502 = vmatpush.bf16.msrb.mxu2 %v7562_v0  ;;  %3411 = vmatmul.bf16.vlgmr.msrb.gmra.mxu0 %v10048_v30  ;;  %v7683_v0 = vld [vmem:[#allocation4 + $0x6a8] sm:$0xf0]  ;;  %v7059_v14 = vld [vmem:[#allocation4 + $0x1b8] sm:$0xf0]  ;;  %v7371_v54 = vld [vmem:[#allocation4 + $0x430] sm:$0xf0] }
 0x193   :  { %3459 = vmatpush.bf16.msra.mxu0 %v7846_v63  ;;  %v7217_v63 = vld [vmem:[#allocation4 + $0x2d8] sm:$0xf]  ;;  %v7062_v23 = vor.u32 %v9262_v13, %v7059_v14  ;;  %v7347_v57 = vld [vmem:[#allocation4 + $0x3f8] sm:$0xf0]  ;;  %v9441_v13 = vld [vmem:[#allocation4 + $0x72c] sm:$0xf0] }
 0x194   :  { %3536 = vmatpush.bf16.msra.mxu3 %v6862_v4  ;;  %3549 = vmatpush.bf16.msra.mxu1 %v7150_v6  ;;  %v6929_v4 = vld [vmem:[#allocation4 + $0x98] sm:$0xf]  ;;  %v7977_v47 = vld [vmem:[#allocation6 + $0xe0] sm:$0xf] }
 0x195   :  { %v6930_v36 = vor.u32 %v9234_v28, %v6929_v4  ;;  %v9306_v6 = vld [vmem:[#allocation4 + $0x2f4] sm:$0xf0]  ;;  %v9404_v4 = vld [vmem:[#allocation4 + $0x60c] sm:$0xf]  ;;  %v9389_v28 = vld [vmem:[#allocation4 + $0x594] sm:$0xf] }
 0x196   :  { %3503 = vmatpush.bf16.msrb.mxu2 %v7530_v16  ;;  %v7651_v16 = vld [vmem:[#allocation4 + $0x668] sm:$0xf0]  ;;  %v7218_v19 = vor.u32 %v9306_v6, %v7217_v63  ;;  %v6931_v63 = vld [vmem:[#allocation4 + $0xb8] sm:$0xf0]  ;;  %v7786_v6 = vor.u32 %v9449_v62, %v7785_v42  ;;  %v7961_v42 = vld [vmem:[#allocation6 + $0xc0] sm:$0xf] }
 0x197   :  { %3537 = vmatmul.bf16.vlgmr.msra.gmra.mxu3 %v10008_v45  ;;  %3460 = vmatpush.bf16.msra.mxu0 %v7814_v20  ;;  %v7370_v20 = vor.u32 %v9345_v10, %v7369_v11  ;;  %v7654_v22 = vor.u32 %v9412_v15, %v7651_v16  ;;  %v9365_v11 = vld [vmem:[#allocation4 + $0x4d4] sm:$0xf]  ;;  %v9222_v16 = vld [vmem:[#allocation4 + $0x5c] sm:$0xf]  ;;  %v9493_v62 = vld [vmem:[#allocation6 + $0xcc] sm:$0xf0] }
 0x198   :  { %3585 = vmatpush.bf16.msrb.mxu3 %v7090_v29  ;;  %v9330_v29 = vld [vmem:[#allocation4 + $0x3b4] sm:$0xf0]  ;;  %3550 = vmatpush.bf16.msra.mxu1 %v7118_v24  ;;  %v7467_v10 = vld [vmem:[#allocation4 + $0x4f0] sm:$0xf0] }
 0x199   :  { %v7314_v38 = vor.u32 %v9330_v29, %v7313_v21  ;;  %v9298_v24 = vld [vmem:[#allocation4 + $0x2b4] sm:$0xf0]  ;;  %v7563_v21 = vld [vmem:[#allocation4 + $0x5b0] sm:$0xf0]  ;;  %v7470_v17 = vor.u32 %v9365_v11, %v7467_v10  ;;  %v7155_v11 = vld [vmem:[#allocation4 + $0x278] sm:$0xf0] }
 0x19a   :  { %3504 = vmatpush.bf16.msrb.mxu2 %v7498_v50  ;;  %v7619_v50 = vld [vmem:[#allocation4 + $0x628] sm:$0xf0]  ;;  %v7186_v29 = vor.u32 %v9298_v24, %v7185_v55  ;;  %v9357_v55 = vld [vmem:[#allocation4 + $0x494] sm:$0xf] }
 0x19b   :  { %3461 = vmatpush.bf16.msra.mxu0 %v7782_v31  ;;  %3551 = vmatmul.bf16.vlgmr.msra.gmra.mxu1 %v10017_v35  ;;  %v7849_v31 = vld [vmem:[#allocation4 + $0x7d0] sm:$0xf]  ;;  %v7435_v24 = vld [vmem:[#allocation4 + $0x4b0] sm:$0xf0] }
 0x19c   :  { %3586 = vmatpush.bf16.msrb.mxu3 %v7058_v46  ;;  %3599 = vmatpush.bf16.msrb.mxu1 %v7346_v27  ;;  %v7750_v46 = vor.u32 %v9436_v33, %v7747_v34  ;;  %v7027_v27 = vld [vmem:[#allocation4 + $0x178] sm:$0xf0]  ;;  %v7153_v33 = vld [vmem:[#allocation4 + $0x258] sm:$0xf]  ;;  %v7850_v43 = vor.u32 %v9465_v32, %v7849_v31  ;;  %v9349_v32 = vld [vmem:[#allocation4 + $0x454] sm:$0xf] }
 0x19d   :  { %v9290_v34 = vld [vmem:[#allocation4 + $0x274] sm:$0xf0] }
 0x19e   :  { %3505 = vmatpush.bf16.msrb.mxu2 %v7466_v41  ;;  %v6995_v41 = vld [vmem:[#allocation4 + $0x138] sm:$0xf0] }
 0x19f   :  { %3462 = vmatpush.bf16.msra.mxu0 %v7750_v46  ;;  %v7154_v46 = vor.u32 %v9290_v34, %v7153_v33  ;;  %v6998_v48 = vor.u32 %v9246_v39, %v6995_v41  ;;  %v7689_v33 = vld [vmem:[#allocation4 + $0x690] sm:$0xf]  ;;  %v9302_v39 = vld [vmem:[#allocation4 + $0x2dc] sm:$0xf] }
 0x1a0   :  { %3587 = vmatpush.bf16.msrb.mxu3 %v7026_v40  ;;  %3600 = vmatpush.bf16.msrb.mxu1 %v7314_v38  ;;  %v9353_v40 = vld [vmem:[#allocation4 + $0x46c] sm:$0xf0]  ;;  %v7566_v38 = vor.u32 %v9389_v28, %v7563_v21  ;;  %v6867_v28 = vld [vmem:[#allocation4 + $0x38] sm:$0xf0] }
 0x1a1   :  { %v7402_v3 = vor.u32 %v9353_v40, %v7401_v58  ;;  %v9373_v58 = vld [vmem:[#allocation4 + $0x514] sm:$0xf]  ;;  %v9310_v21 = vld [vmem:[#allocation4 + $0x31c] sm:$0xf]  ;;  %v9425_v34 = vld [vmem:[#allocation4 + $0x6ac] sm:$0xf0] }
 0x1a2   :  { %3506 = vmatpush.bf16.msrb.mxu2 %v7434_v60  ;;  %v9334_v60 = vld [vmem:[#allocation4 + $0x3dc] sm:$0xf] }
 0x1a3   :  { %3463 = vmatpush.bf16.msra.mxu0 %v7718_v59  ;;  %v7499_v59 = vld [vmem:[#allocation4 + $0x530] sm:$0xf0] }
 0x1a4   :  { %3588 = vmatpush.bf16.msrb.mxu3 %v6994_v12  ;;  %3601 = vmatpush.bf16.msrb.mxu1 %v7282_v52  ;;  %v7686_v12 = vor.u32 %v9420_v61, %v7683_v0  ;;  %v9238_v52 = vld [vmem:[#allocation4 + $0xdc] sm:$0xf]  ;;  %v7350_v0 = vor.u32 %v9334_v60, %v7347_v57  ;;  %v7374_v60 = vor.u32 %v9341_v44, %v7371_v54  ;;  %v7755_v44 = vld [vmem:[#allocation4 + $0x730] sm:$0xf0] }
 0x1a5   :  { %v6966_v61 = vor.u32 %v9238_v52, %v6963_v56  ;;  %v9402_v52 = vld [vmem:[#allocation4 + $0x5f4] sm:$0xf0]  ;;  %v9294_v57 = vld [vmem:[#allocation4 + $0x29c] sm:$0xf] }
 0x1a6   :  { %3507 = vmatpush.bf16.msrb.mxu2 %v7402_v3  ;;  %v9326_v3 = vld [vmem:[#allocation4 + $0x39c] sm:$0xf] }
 0x1a7   :  { %3464 = vmatpush.bf16.msra.mxu0 %v7686_v12  ;;  %v7753_v12 = vld [vmem:[#allocation4 + $0x710] sm:$0xf] }
 0x1a8   :  { %3589 = vmatpush.bf16.msrb.mxu3 %v6962_v26  ;;  %3602 = vmatpush.bf16.msrb.mxu1 %v7250_v2  ;;  %v9254_v26 = vld [vmem:[#allocation4 + $0x15c] sm:$0xf]  ;;  %v7502_v2 = vor.u32 %v9373_v58, %v7499_v59 }
 0x1a9   :  { %v7030_v9 = vor.u32 %v9254_v26, %v7027_v27  ;;  %v6902_v26 = vor.u32 %v9222_v16, %v6899_v18  ;;  %v9386_v16 = vld [vmem:[#allocation4 + $0x574] sm:$0xf0] }
 0x1aa   :  { %3508 = vmatpush.bf16.msrb.mxu2 %v7370_v20  ;;  %v7283_v20 = vld [vmem:[#allocation4 + $0x378] sm:$0xf0] }
 0x1ab   :  { %3465 = vmatpush.bf16.msra.mxu0 %v7654_v22  ;;  %v7721_v22 = vld [vmem:[#allocation4 + $0x6d0] sm:$0xf] }
 0x1ac   :  { %3590 = vmatpush.bf16.msrb.mxu3 %v6930_v36  ;;  %3603 = vmatpush.bf16.msrb.mxu1 %v7218_v19  ;;  %v7622_v36 = vor.u32 %v9404_v4, %v7619_v50  ;;  %v9318_v19 = vld [vmem:[#allocation4 + $0x35c] sm:$0xf]  ;;  %v7438_v50 = vor.u32 %v9357_v55, %v7435_v24 }
 0x1ad   :  { %3509 = vmatmul.bf16.vlgmr.msrb.gmra.mxu2 %v10036_v8  ;;  %v7286_v27 = vor.u32 %v9318_v19, %v7283_v20  ;;  %v9214_v4 = vld [vmem:[#allocation4 + $0x1c] sm:$0xf]  ;;  %v9453_v19 = vld [vmem:[#allocation4 + $0x794] sm:$0xf] }
 0x1ae   :  { %3557 = vmatpush.bf16.msra.mxu2 %v7598_v25  ;;  %v9433_v25 = vld [vmem:[#allocation4 + $0x6ec] sm:$0xf0]  ;;  %v7819_v20 = vld [vmem:[#allocation4 + $0x7b0] sm:$0xf0]  ;;  %v7123_v55 = vld [vmem:[#allocation4 + $0x238] sm:$0xf0] }
 0x1af   :  { %3466 = vmatpush.bf16.msra.mxu0 %v7622_v36  ;;  %v7722_v31 = vor.u32 %v9433_v25, %v7721_v22  ;;  %v6870_v36 = vor.u32 %v9214_v4, %v6867_v28  ;;  %v7929_v22 = vld [vmem:[#allocation6 + $0x80] sm:$0xf]  ;;  %v9485_v25 = vld [vmem:[#allocation6 + $0x8c] sm:$0xf0]  ;;  %v9378_v4 = vld [vmem:[#allocation4 + $0x534] sm:$0xf0] }
 0x1b0   :  { %3591 = vmatpush.bf16.msrb.mxu3 %v6898_v51  ;;  %3604 = vmatpush.bf16.msrb.mxu1 %v7186_v29  ;;  %v9282_v51 = vld [vmem:[#allocation4 + $0x234] sm:$0xf0]  ;;  %v7251_v29 = vld [vmem:[#allocation4 + $0x338] sm:$0xf0] }
 0x1b1   :  { %v7122_v40 = vor.u32 %v9282_v51, %v7121_v49  ;;  %v9417_v49 = vld [vmem:[#allocation4 + $0x66c] sm:$0xf0]  ;;  %v7601_v51 = vld [vmem:[#allocation4 + $0x5d8] sm:$0xf] }
 0x1b2   :  { %3558 = vmatpush.bf16.msra.mxu2 %v7566_v38  ;;  %3467 = vmatmul.bf16.vlgmr.msra.gmra.mxu0 %v10048_v30  ;;  %v7254_v38 = vor.u32 %v9310_v21, %v7251_v29  ;;  %v7658_v58 = vor.u32 %v9417_v49, %v7657_v7  ;;  %v7602_v59 = vor.u32 %v9402_v52, %v7601_v51  ;;  %v9445_v21 = vld [vmem:[#allocation4 + $0x754] sm:$0xf]  ;;  %v7897_v7 = vld [vmem:[#allocation6 + $0x40] sm:$0xf]  ;;  %v7441_v51 = vld [vmem:[#allocation4 + $0x498] sm:$0xf] }
 0x1b3   :  { %3515 = vmatpush.bf16.msrb.mxu0 %v7850_v43  ;;  %v7219_v43 = vld [vmem:[#allocation4 + $0x2f8] sm:$0xf0]  ;;  %v7787_v29 = vld [vmem:[#allocation4 + $0x770] sm:$0xf0]  ;;  %v9362_v52 = vld [vmem:[#allocation4 + $0x4b4] sm:$0xf0] }
 0x1b4   :  { %3592 = vmatpush.bf16.msrb.mxu3 %v6866_v1  ;;  %3605 = vmatpush.bf16.msrb.mxu1 %v7154_v46  ;;  %v9230_v1 = vld [vmem:[#allocation4 + $0x9c] sm:$0xf]  ;;  %v7690_v46 = vor.u32 %v9425_v34, %v7689_v33  ;;  %v7222_v56 = vor.u32 %v9302_v39, %v7219_v43  ;;  %v8105_v33 = vld [vmem:[#allocation6 + $0x1e0] sm:$0xf]  ;;  %v7790_v34 = vor.u32 %v9445_v21, %v7787_v29  ;;  %v9437_v43 = vld [vmem:[#allocation4 + $0x714] sm:$0xf]  ;;  %v3258_v29 = vpop.f32.mrf.mxu3 }
 0x1b5   :  { %v6934_v14 = vor.u32 %v9230_v1, %v6931_v63  ;;  %v9394_v1 = vld [vmem:[#allocation4 + $0x5b4] sm:$0xf0]  ;;  %v7758_v49 = vor.u32 %v9437_v43, %v7755_v44  ;;  %v7571_v21 = vld [vmem:[#allocation4 + $0x5b8] sm:$0xf0] }
 0x1b6   :  { %3559 = vmatpush.bf16.msra.mxu2 %v7534_v53  ;;  %v7539_v43 = vld [vmem:[#allocation4 + $0x578] sm:$0xf0] }
 0x1b7   :  { %3593 = vmatmul.bf16.vlgmr.msrb.gmra.mxu3 %v10008_v45  ;;  %3516 = vmatpush.bf16.msrb.mxu0 %v7818_v37  ;;  %v7187_v37 = vld [vmem:[#allocation4 + $0x2b8] sm:$0xf0] }
 0x1b8   :  { %3641 = vmatpush.bf16.msra.mxu3 %v7094_v5  ;;  %v7315_v5 = vld [vmem:[#allocation4 + $0x3b8] sm:$0xf0]  ;;  %3606 = vmatpush.bf16.msrb.mxu1 %v7122_v40  ;;  %v7625_v40 = vld [vmem:[#allocation4 + $0x610] sm:$0xf]  ;;  %v7190_v63 = vor.u32 %v9294_v57, %v7187_v37  ;;  %v7723_v57 = vld [vmem:[#allocation4 + $0x6f0] sm:$0xf0] }
 0x1b9   :  { %v7318_v15 = vor.u32 %v9326_v3, %v7315_v5  ;;  %v9461_v3 = vld [vmem:[#allocation4 + $0x7d4] sm:$0xf] }
 0x1ba   :  { %3560 = vmatpush.bf16.msra.mxu2 %v7502_v2  ;;  %v7962_v2 = vor.u32 %v9493_v62, %v7961_v42  ;;  %v7851_v5 = vld [vmem:[#allocation4 + $0x7f0] sm:$0xf0]  ;;  %v8073_v42 = vld [vmem:[#allocation6 + $0x1a0] sm:$0xf] }
 0x1bb   :  { %3517 = vmatpush.bf16.msrb.mxu0 %v7786_v6  ;;  %3607 = vmatmul.bf16.vlgmr.msrb.gmra.mxu1 %v10017_v35  ;;  %v9286_v6 = vld [vmem:[#allocation4 + $0x25c] sm:$0xf] }
 0x1bc   :  { %3642 = vmatpush.bf16.msra.mxu3 %v7062_v23  ;;  %3655 = vmatpush.bf16.msra.mxu1 %v7350_v0  ;;  %v7754_v23 = vor.u32 %v9441_v13, %v7753_v12  ;;  %v7569_v0 = vld [vmem:[#allocation4 + $0x598] sm:$0xf]  ;;  %v7945_v13 = vld [vmem:[#allocation6 + $0xa0] sm:$0xf]  ;;  %v7158_v18 = vor.u32 %v9286_v6, %v7155_v11 }
 0x1bd   :  { %v7570_v12 = vor.u32 %v9394_v1, %v7569_v0  ;;  %v9354_v0 = vld [vmem:[#allocation4 + $0x474] sm:$0xf0]  ;;  %v9521_v1 = vld [vmem:[#allocation6 + $0x1ac] sm:$0xf0]  ;;  %v7865_v11 = vld [vmem:[#allocation6] sm:$0xf] }
 0x1be   :  { %3561 = vmatpush.bf16.msra.mxu2 %v7470_v17 }
 0x1bf   :  { %3518 = vmatpush.bf16.msrb.mxu0 %v7754_v23  ;;  %v9278_v23 = vld [vmem:[#allocation4 + $0x21c] sm:$0xf] }
 0x1c0   :  { %3643 = vmatpush.bf16.msra.mxu3 %v7030_v9  ;;  %3656 = vmatpush.bf16.msra.mxu1 %v7318_v15  ;;  %v7403_v9 = vld [vmem:[#allocation4 + $0x470] sm:$0xf0]  ;;  %v7854_v15 = vor.u32 %v9461_v3, %v7851_v5  ;;  %v7126_v28 = vor.u32 %v9278_v23, %v7123_v55  ;;  %v8074_v3 = vor.u32 %v9521_v1, %v8073_v42  ;;  %v7377_v5 = vld [vmem:[#allocation4 + $0x418] sm:$0xf]  ;;  %v8041_v55 = vld [vmem:[#allocation6 + $0x160] sm:$0xf] }
 0x1c1   :  { %v7406_v41 = vor.u32 %v9349_v32, %v7403_v9  ;;  %v7913_v32 = vld [vmem:[#allocation6 + $0x60] sm:$0xf]  ;;  %v9481_v9 = vld [vmem:[#allocation6 + $0x6c] sm:$0xf0] }
 0x1c2   :  { %3562 = vmatpush.bf16.msra.mxu2 %v7438_v50  ;;  %v7930_v50 = vor.u32 %v9485_v25, %v7929_v22  ;;  %v7914_v39 = vor.u32 %v9481_v9, %v7913_v32  ;;  %v10066_v22 = vpop.f32.mrf.mxu1  ;;  %v9466_v32 = vld [vmem:[#allocation4 + $0x7f4] sm:$0xf0]  ;;  %v9501_v42 = vld [vmem:[#allocation6 + $0x10c] sm:$0xf0] }
 0x1c3   :  { %3519 = vmatpush.bf16.msrb.mxu0 %v7722_v31 }
 0x1c4   :  { %3644 = vmatpush.bf16.msra.mxu3 %v6998_v48  ;;  %3657 = vmatpush.bf16.msra.mxu1 %v7286_v27  ;;  %v9497_v48 = vld [vmem:[#allocation6 + $0xec] sm:$0xf0]  ;;  %v7505_v27 = vld [vmem:[#allocation4 + $0x518] sm:$0xf] }
 0x1c5   :  { %v7978_v53 = vor.u32 %v9497_v48, %v7977_v47  ;;  %v7506_v31 = vor.u32 %v9378_v4, %v7505_v27  ;;  %v9477_v47 = vld [vmem:[#allocation6 + $0x4c] sm:$0xf0]  ;;  %v8089_v48 = vld [vmem:[#allocation6 + $0x1c0] sm:$0xf]  ;;  %v9405_v27 = vld [vmem:[#allocation4 + $0x614] sm:$0xf] }
 0x1c6   :  { %3563 = vmatpush.bf16.msra.mxu2 %v7406_v41  ;;  %v9529_v41 = vld [vmem:[#allocation6 + $0x1ec] sm:$0xf0] }
 0x1c7   :  { %3520 = vmatpush.bf16.msrb.mxu0 %v7690_v46  ;;  %v8106_v54 = vor.u32 %v9529_v41, %v8105_v33  ;;  %v8025_v33 = vld [vmem:[#allocation6 + $0x140] sm:$0xf]  ;;  %v9382_v41 = vld [vmem:[#allocation4 + $0x55c] sm:$0xf] }
 0x1c8   :  { %3645 = vmatpush.bf16.msra.mxu3 %v6966_v61  ;;  %3658 = vmatpush.bf16.msra.mxu1 %v7254_v38  ;;  %v9409_v61 = vld [vmem:[#allocation4 + $0x62c] sm:$0xf0]  ;;  %v9370_v38 = vld [vmem:[#allocation4 + $0x4f4] sm:$0xf0] }
 0x1c9   :  { %v7626_v10 = vor.u32 %v9409_v61, %v7625_v40  ;;  %v9473_v40 = vld [vmem:[#allocation6 + $0x2c] sm:$0xf0]  ;;  %v7409_v61 = vld [vmem:[#allocation4 + $0x458] sm:$0xf] }
 0x1ca   :  { %3564 = vmatpush.bf16.msra.mxu2 %v7374_v60  ;;  %v9429_v60 = vld [vmem:[#allocation4 + $0x6d4] sm:$0xf]  ;;  %v7410_v6 = vor.u32 %v9354_v0, %v7409_v61  ;;  %v9366_v0 = vld [vmem:[#allocation4 + $0x4dc] sm:$0xf] }
 0x1cb   :  { %3521 = vmatpush.bf16.msrb.mxu0 %v7658_v58  ;;  %v7442_v58 = vor.u32 %v9362_v52, %v7441_v51  ;;  %v7726_v62 = vor.u32 %v9429_v60, %v7723_v57  ;;  %v9374_v51 = vld [vmem:[#allocation4 + $0x51c] sm:$0xf]  ;;  %v7793_v60 = vld [vmem:[#allocation4 + $0x758] sm:$0xf] }
 0x1cc   :  { %3646 = vmatpush.bf16.msra.mxu3 %v6934_v14  ;;  %3659 = vmatpush.bf16.msra.mxu1 %v7222_v56  ;;  %v9489_v14 = vld [vmem:[#allocation6 + $0xac] sm:$0xf0]  ;;  %v7507_v52 = vld [vmem:[#allocation4 + $0x538] sm:$0xf0]  ;;  %v9450_v57 = vld [vmem:[#allocation4 + $0x774] sm:$0xf0] }
 0x1cd   :  { %v7946_v17 = vor.u32 %v9489_v14, %v7945_v13  ;;  %3565 = vmatmul.bf16.vlgmr.msra.gmra.mxu2 %v10036_v8  ;;  %v9525_v56 = vld [vmem:[#allocation6 + $0x1cc] sm:$0xf0]  ;;  %v9346_v14 = vld [vmem:[#allocation4 + $0x434] sm:$0xf0]  ;;  %v7794_v61 = vor.u32 %v9450_v57, %v7793_v60 }
 0x1ce   :  { %3613 = vmatpush.bf16.msrb.mxu2 %v7602_v59  ;;  %v8090_v37 = vor.u32 %v9525_v56, %v8089_v48  ;;  %v7881_v59 = vld [vmem:[#allocation6 + $0x20] sm:$0xf]  ;;  %v7378_v23 = vor.u32 %v9346_v14, %v7377_v5  ;;  %v10068_v9 = vpop.f32.mrf.mxu2  ;;  %v9505_v48 = vld [vmem:[#allocation6 + $0x12c] sm:$0xf0]  ;;  %v3274_v56 = vpop.f32.mrf.mxu1  ;;  %v7729_v14 = vld [vmem:[#allocation4 + $0x6d8] sm:$0xf] }
 0x1cf   :  { %3522 = vmatpush.bf16.msrb.mxu0 %v7626_v10  ;;  %v9469_v10 = vld [vmem:[#allocation6 + $0xc] sm:$0xf0] }
 0x1d0   :  { %3647 = vmatpush.bf16.msra.mxu3 %v6902_v26  ;;  %3660 = vmatpush.bf16.msra.mxu1 %v7190_v63  ;;  %v7822_v26 = vor.u32 %v9453_v19, %v7819_v20  ;;  %v7691_v63 = vld [vmem:[#allocation4 + $0x6b0] sm:$0xf0]  ;;  %v7603_v19 = vld [vmem:[#allocation4 + $0x5f8] sm:$0xf0]  ;;  %v9557_v60 = vld [vmem:[#allocation6 + $0x2cc] sm:$0xf0] }
 0x1d2   :  { %3614 = vmatpush.bf16.msrb.mxu2 %v7570_v12  ;;  %3523 = vmatmul.bf16.vlgmr.msrb.gmra.mxu0 %v10048_v30  ;;  %v8057_v12 = vld [vmem:[#allocation6 + $0x180] sm:$0xf] }
 0x1d3   :  { %3571 = vmatpush.bf16.msra.mxu0 %v7854_v15  ;;  %v9413_v15 = vld [vmem:[#allocation4 + $0x654] sm:$0xf] }
 0x1d4   :  { %3648 = vmatpush.bf16.msra.mxu3 %v6870_v36  ;;  %3661 = vmatpush.bf16.msra.mxu1 %v7158_v18  ;;  %v7473_v36 = vld [vmem:[#allocation4 + $0x4d8] sm:$0xf]  ;;  %v9398_v18 = vld [vmem:[#allocation4 + $0x5dc] sm:$0xf] }
 0x1d5   :  { %v7474_v46 = vor.u32 %v9370_v38, %v7473_v36  ;;  %v9509_v38 = vld [vmem:[#allocation6 + $0x14c] sm:$0xf0] }
 0x1d6   :  { %v8026_v44 = vor.u32 %v9509_v38, %v8025_v33  ;;  %v7665_v33 = vld [vmem:[#allocation4 + $0x658] sm:$0xf]  ;;  %v8233_v38 = vld [vmem:[#allocation6 + $0x2e0] sm:$0xf] }
 0x1d7   :  { %3649 = vmatmul.bf16.vlgmr.msra.gmra.mxu3 %v10008_v45  ;;  %v7537_v45 = vld [vmem:[#allocation4 + $0x558] sm:$0xf]  ;;  %3572 = vmatpush.bf16.msra.mxu0 %v7822_v26  ;;  %v7606_v26 = vor.u32 %v9398_v18, %v7603_v19  ;;  %v10079_v18 = vpop.f32.mrf.mxu1 }
 0x1d8   :  { %5267 = vmatpush.bf16.msrb.mxu3 %v7978_v53  ;;  %v7538_v24 = vor.u32 %v9386_v16, %v7537_v45  ;;  %3662 = vmatpush.bf16.msra.mxu1 %v7126_v28  ;;  %v7898_v53 = vor.u32 %v9477_v47, %v7897_v7  ;;  %v7866_v45 = vor.u32 %v9469_v10, %v7865_v11  ;;  %v9517_v16 = vld [vmem:[#allocation6 + $0x18c] sm:$0xf0]  ;;  %v9390_v28 = vld [vmem:[#allocation4 + $0x59c] sm:$0xf]  ;;  %v8009_v7 = vld [vmem:[#allocation6 + $0x120] sm:$0xf] }
 0x1d9   :  { %v8058_v20 = vor.u32 %v9517_v16, %v8057_v12  ;;  %v7574_v36 = vor.u32 %v9390_v28, %v7571_v21  ;;  %v7542_v47 = vor.u32 %v9382_v41, %v7539_v43  ;;  %v9358_v10 = vld [vmem:[#allocation4 + $0x49c] sm:$0xf] }
 0x1da   :  { %3615 = vmatpush.bf16.msrb.mxu2 %v7538_v24  ;;  %v9513_v24 = vld [vmem:[#allocation6 + $0x16c] sm:$0xf0]  ;;  %v7443_v12 = vld [vmem:[#allocation4 + $0x4b8] sm:$0xf0] }
 0x1db   :  { %3573 = vmatpush.bf16.msra.mxu0 %v7790_v34  ;;  %3663 = vmatmul.bf16.vlgmr.msra.gmra.mxu1 %v10017_v35  ;;  %v7882_v35 = vor.u32 %v9473_v40, %v7881_v59  ;;  %v8042_v4 = vor.u32 %v9513_v24, %v8041_v55  ;;  %v3260_v59 = vpop.f32.mrf.mxu3  ;;  %v7510_v40 = vor.u32 %v9374_v51, %v7507_v52  ;;  %v7411_v55 = vld [vmem:[#allocation4 + $0x478] sm:$0xf0] }
 0x1dc   :  { %5268 = vmatpush.bf16.msrb.mxu3 %v7962_v2  ;;  %5281 = vmatpush.bf16.msrb.mxu1 %v8106_v54  ;;  %v9421_v2 = vld [vmem:[#allocation4 + $0x694] sm:$0xf]  ;;  %v7825_v54 = vld [vmem:[#allocation4 + $0x798] sm:$0xf]  ;;  %v7446_v19 = vor.u32 %v9358_v10, %v7443_v12  ;;  %v7827_v10 = vld [vmem:[#allocation4 + $0x7b8] sm:$0xf0] }
 0x1dd   :  { %v7694_v13 = vor.u32 %v9421_v2, %v7691_v63  ;;  %v7761_v63 = vld [vmem:[#allocation4 + $0x718] sm:$0xf] }
 0x1de   :  { %3616 = vmatpush.bf16.msrb.mxu2 %v7506_v31  ;;  %v7857_v31 = vld [vmem:[#allocation4 + $0x7d8] sm:$0xf] }
 0x1df   :  { %3574 = vmatpush.bf16.msra.mxu0 %v7758_v49  ;;  %v3330_v51 = vpop.f32.mrf.mxu1 }
 0x1e0   :  { %5269 = vmatpush.bf16.msrb.mxu3 %v7946_v17  ;;  %5282 = vmatpush.bf16.msrb.mxu1 %v8090_v37  ;;  %v7659_v17 = vld [vmem:[#allocation4 + $0x670] sm:$0xf0]  ;;  %v10074_v37 = vld [vmem:[%s10279_s4] sm:$0xff] }
 0x1e1   :  { %v7662_v25 = vor.u32 %v9413_v15, %v7659_v17  ;;  %v1953_v2 = vperm.slane %v10074_v37, 0  ;;  %v9434_v15 = vld [vmem:[#allocation4 + $0x6f4] sm:$0xf0] }
 0x1e2   :  { %3617 = vmatpush.bf16.msrb.mxu2 %v7474_v46  ;;  %v9458_v46 = vld [vmem:[#allocation4 + $0x7b4] sm:$0xf0] }
 0x1e3   :  { %3575 = vmatpush.bf16.msra.mxu0 %v7726_v62  ;;  %v7826_v49 = vor.u32 %v9458_v46, %v7825_v54  ;;  %v3288_v62 = vpop.f32.mrf.mxu2  ;;  %v3314_v16 = vpop.f32.mrf.mxu3 }
 0x1e4   :  { %5270 = vmatpush.bf16.msrb.mxu3 %v7930_v50  ;;  %5283 = vmatpush.bf16.msrb.mxu1 %v8074_v3  ;;  %v7627_v50 = vld [vmem:[#allocation4 + $0x630] sm:$0xf0]  ;;  %v9442_v3 = vld [vmem:[#allocation4 + $0x734] sm:$0xf0] }
 0x1e5   :  { %v7630_v34 = vor.u32 %v9405_v27, %v7627_v50  ;;  %v7762_v11 = vor.u32 %v9442_v3, %v7761_v63  ;;  %v9426_v27 = vld [vmem:[#allocation4 + $0x6b4] sm:$0xf0]  ;;  %v8201_v63 = vld [vmem:[#allocation6 + $0x2a0] sm:$0xf]  ;;  %v9553_v3 = vld [vmem:[#allocation6 + $0x2ac] sm:$0xf0] }
 0x1e6   :  { %3618 = vmatpush.bf16.msrb.mxu2 %v7442_v58  ;;  %v7993_v58 = vld [vmem:[#allocation6 + $0x100] sm:$0xf] }
 0x1e7   :  { %3576 = vmatpush.bf16.msra.mxu0 %v7694_v13  ;;  %v7994_v1 = vor.u32 %v9501_v42, %v7993_v58  ;;  %v3259_v13 = vadd.f32 %v3258_v29, %v1953_v2  ;;  %v9462_v58 = vld [vmem:[#allocation4 + $0x7dc] sm:$0xf] }
 0x1e8   :  { %5271 = vmatpush.bf16.msrb.mxu3 %v7914_v39  ;;  %5284 = vmatpush.bf16.msrb.mxu1 %v8058_v20  ;;  %v7858_v39 = vor.u32 %v9466_v32, %v7857_v31  ;;  %v7730_v20 = vor.u32 %v9434_v15, %v7729_v14  ;;  %v9342_v31 = vld [vmem:[#allocation4 + $0x41c] sm:$0xf]  ;;  %v8202_v14 = vor.u32 %v9553_v3, %v8201_v63  ;;  %v8457_v15 = vld [vmem:[#allocation6 + $0x4a0] sm:$0xf] }
 0x1e9   :  { %v3273_v17 = vadd.f32 %v10066_v22, %v3259_v13  ;;  %v7379_v32 = vld [vmem:[#allocation4 + $0x438] sm:$0xf0] }
 0x1ea   :  { %3619 = vmatpush.bf16.msrb.mxu2 %v7410_v6 }
 0x1eb   :  { %3577 = vmatpush.bf16.msra.mxu0 %v7662_v25  ;;  %v3287_v25 = vadd.f32 %v10068_v9, %v3273_v17  ;;  %v1954_v9 = vperm.slane %v10074_v37, 1 }
 0x1ec   :  { %5272 = vmatpush.bf16.msrb.mxu3 %v7898_v53  ;;  %5285 = vmatpush.bf16.msrb.mxu1 %v8042_v4  ;;  %v8010_v53 = vor.u32 %v9505_v48, %v8009_v7  ;;  %v10082_v4 = vpop.f32.mrf.mxu2  ;;  %v7633_v7 = vld [vmem:[#allocation4 + $0x618] sm:$0xf]  ;;  %v9625_v48 = vld [vmem:[#allocation6 + $0x4ec] sm:$0xf0] }
 0x1ee   :  { %3620 = vmatpush.bf16.msrb.mxu2 %v7378_v23  ;;  %v9350_v23 = vld [vmem:[#allocation4 + $0x45c] sm:$0xf] }
 0x1ef   :  { %3578 = vmatpush.bf16.msra.mxu0 %v7630_v34  ;;  %v3300_v6 = vpop.f32.mrf.mxu0  ;;  %v7414_v21 = vor.u32 %v9350_v23, %v7411_v55  ;;  %v9549_v23 = vld [vmem:[#allocation6 + $0x28c] sm:$0xf0] }
 0x1f0   :  { %5273 = vmatpush.bf16.msrb.mxu3 %v7882_v35  ;;  %5286 = vmatpush.bf16.msrb.mxu1 %v8026_v44  ;;  %v7475_v35 = vld [vmem:[#allocation4 + $0x4f8] sm:$0xf0]  ;;  %v3301_v28 = vadd.f32 %v3300_v6, %v3287_v25  ;;  %v7382_v44 = vor.u32 %v9342_v31, %v7379_v32  ;;  %v3384_v25 = vpop.f32.mrf.mxu1  ;;  %v9545_v31 = vld [vmem:[#allocation6 + $0x26c] sm:$0xf0] }
 0x1f1   :  { %3621 = vmatmul.bf16.vlgmr.msrb.gmra.mxu2 %v10036_v8  ;;  %v7478_v5 = vor.u32 %v9366_v0, %v7475_v35  ;;  %v8473_v0 = vld [vmem:[#allocation6 + $0x4c0] sm:$0xf]  ;;  %v9621_v35 = vld [vmem:[#allocation6 + $0x4cc] sm:$0xf0] }
 0x1f2   :  { %3669 = vmatpush.bf16.msra.mxu2 %v7606_v26  ;;  %3579 = vmatmul.bf16.vlgmr.msra.gmra.mxu0 %v10048_v30  ;;  %v7697_v26 = vld [vmem:[#allocation4 + $0x698] sm:$0xf]  ;;  %v3697_v41 = vmax.f32 %v3301_v28, 0.0  ;;  %v8441_v28 = vld [vmem:[#allocation6 + $0x480] sm:$0xf] }
 0x1f3   :  { %3627 = vmatpush.bf16.msrb.mxu0 %v7858_v39  ;;  %v7698_v29 = vor.u32 %v9426_v27, %v7697_v26  ;;  %v9561_v39 = vld [vmem:[#allocation6 + $0x2ec] sm:$0xf0] }
 0x1f4   :  { %5274 = vmatpush.bf16.msrb.mxu3 %v7866_v45  ;;  %5287 = vmatpush.bf16.msrb.mxu1 %v8010_v53  ;;  %v3261_v45 = vadd.f32 %v3260_v59, %v1953_v2  ;;  %v8234_v46 = vor.u32 %v9561_v39, %v8233_v38  ;;  %v9410_v53 = vld [vmem:[#allocation4 + $0x634] sm:$0xf0]  ;;  %v7859_v59 = vld [vmem:[#allocation4 + $0x7f8] sm:$0xf0] }
 0x1f5   :  { %v7862_v2 = vor.u32 %v9462_v58, %v7859_v59  ;;  %v9605_v58 = vld [vmem:[#allocation6 + $0x44c] sm:$0xf0] }
 0x1f6   :  { %3670 = vmatpush.bf16.msra.mxu2 %v7574_v36  ;;  %v3275_v24 = vadd.f32 %v3274_v56, %v3261_v45  ;;  %v9418_v36 = vld [vmem:[#allocation4 + $0x674] sm:$0xf0]  ;;  %v8217_v56 = vld [vmem:[#allocation6 + $0x2c0] sm:$0xf]  ;;  %v9617_v45 = vld [vmem:[#allocation6 + $0x4ac] sm:$0xf0] }
 0x1f7   :  { %3628 = vmatpush.bf16.msrb.mxu0 %v7826_v49  ;;  %v3302_v22 = vpop.f32.mrf.mxu0  ;;  %v7666_v54 = vor.u32 %v9418_v36, %v7665_v33  ;;  %v3316_v49 = vpop.f32.mrf.mxu3  ;;  %v8458_v55 = vor.u32 %v9617_v45, %v8457_v15  ;;  %v7763_v36 = vld [vmem:[#allocation4 + $0x738] sm:$0xf0]  ;;  %v9533_v15 = vld [vmem:[#allocation6 + $0x20c] sm:$0xf0] }
 0x1f8   :  { %5288 = vmatpush.bf16.msrb.mxu1 %v7994_v1  ;;  %v3289_v50 = vadd.f32 %v3288_v62, %v3275_v24  ;;  %v7634_v62 = vor.u32 %v9410_v53, %v7633_v7  ;;  %v3315_v1 = vadd.f32 %v3314_v16, %v1954_v9  ;;  %v3317_v6 = vadd.f32 %v3316_v49, %v1954_v9  ;;  %v7795_v24 = vld [vmem:[#allocation4 + $0x778] sm:$0xf0]  ;;  %v8153_v7 = vld [vmem:[#allocation6 + $0x240] sm:$0xf] }
 0x1f9   :  { %v9430_v49 = vld [vmem:[#allocation4 + $0x6dc] sm:$0xf] }
 0x1fa   :  { %3671 = vmatpush.bf16.msra.mxu2 %v7542_v47  ;;  %v3303_v34 = vadd.f32 %v3302_v22, %v3289_v50  ;;  %v8489_v47 = vld [vmem:[#allocation6 + $0x4e0] sm:$0xf]  ;;  %v3329_v12 = vadd.f32 %v10079_v18, %v3315_v1  ;;  %v3331_v13 = vadd.f32 %v3330_v51, %v3317_v6  ;;  %v7731_v51 = vld [vmem:[#allocation4 + $0x6f8] sm:$0xf0] }
 0x1fb   :  { %3629 = vmatpush.bf16.msrb.mxu0 %v7794_v61  ;;  %v8490_v57 = vor.u32 %v9625_v48, %v8489_v47  ;;  %v8218_v61 = vor.u32 %v9557_v60, %v8217_v56  ;;  %v9541_v47 = vld [vmem:[#allocation6 + $0x24c] sm:$0xf0]  ;;  %v9422_v1 = vld [vmem:[#allocation4 + $0x69c] sm:$0xf] }
 0x1fc   :  { %v3705_v43 = vmax.f32 %v3303_v34, 0.0  ;;  %v3343_v16 = vadd.f32 %v10082_v4, %v3329_v12  ;;  %v9438_v34 = vld [vmem:[#allocation4 + $0x71c] sm:$0xf]  ;;  %v8154_v60 = vor.u32 %v9541_v47, %v8153_v7  ;;  %v7963_v7 = vld [vmem:[#allocation6 + $0xd0] sm:$0xf0] }
 0x1fd   :  { %5323 = vmatpush.bf16.msra.mxu3 %v8490_v57  ;;  %v8409_v57 = vld [vmem:[#allocation6 + $0x440] sm:$0xf] }
 0x1fe   :  { %3672 = vmatpush.bf16.msra.mxu2 %v7510_v40  ;;  %v10085_v52 = vpack.c.bf16 %v3705_v43, %v3697_v41  ;;  %v3344_v40 = vpop.f32.mrf.mxu2  ;;  %v8425_v41 = vld [vmem:[#allocation6 + $0x460] sm:$0xf]  ;;  %v9609_v43 = vld [vmem:[#allocation6 + $0x46c] sm:$0xf0] }
 0x1ff   :  { %3630 = vmatpush.bf16.msrb.mxu0 %v7762_v11  ;;  %v3356_v42 = vpop.f32.mrf.mxu0  ;;  %v9454_v11 = vld [vmem:[#allocation4 + $0x79c] sm:$0xf]  ;;  %v3370_v17 = vpop.f32.mrf.mxu3  ;;  %v3345_v26 = vadd.f32 %v3344_v40, %v3331_v13  ;;  %v8426_v48 = vor.u32 %v9609_v43, %v8425_v41  ;;  %v9653_v41 = vld [vmem:[#allocation6 + $0x5cc] sm:$0xf0]  ;;  %v9491_v43 = vld [vmem:[#allocation6 + $0xc4] sm:$0xf] }
 0x200   :  { %5275 = vmatmul.bf16.vlgmr.msrb.gmra.mxu3 %v10085_v52  ;;  %v3357_v18 = vadd.f32 %v3356_v42, %v3343_v16  ;;  %v3386_v40 = vpop.f32.mrf.mxu1  ;;  %v7734_v42 = vor.u32 %v9430_v49, %v7731_v51  ;;  %v7667_v16 = vld [vmem:[#allocation4 + $0x678] sm:$0xf0]  ;;  %v8345_v47 = vld [vmem:[#allocation6 + $0x3c0] sm:$0xf]  ;;  %v7966_v49 = vor.u32 %v9491_v43, %v7963_v7 }
 0x201   :  { %v8585_v51 = vld [vmem:[#allocation6 + $0x5a0] sm:$0xf] }
 0x202   :  { %3673 = vmatpush.bf16.msra.mxu2 %v7478_v5  ;;  %v8474_v5 = vor.u32 %v9621_v35, %v8473_v0  ;;  %v3698_v38 = vmax.f32 %v3357_v18, 0.0  ;;  %v8410_v0 = vor.u32 %v9605_v58, %v8409_v57  ;;  %v7947_v58 = vld [vmem:[#allocation6 + $0xb0] sm:$0xf0]  ;;  %v8265_v43 = vld [vmem:[#allocation6 + $0x320] sm:$0xf] }
 0x203   :  { %3631 = vmatpush.bf16.msrb.mxu0 %v7730_v20  ;;  %v8185_v20 = vld [vmem:[#allocation6 + $0x280] sm:$0xf] }
 0x204   :  { %5324 = vmatpush.bf16.msra.mxu3 %v8474_v5  ;;  %v8186_v50 = vor.u32 %v9549_v23, %v8185_v20 }
 0x206   :  { %3674 = vmatpush.bf16.msra.mxu2 %v7446_v19  ;;  %v7830_v19 = vor.u32 %v9454_v11, %v7827_v10  ;;  %v3398_v33 = vpop.f32.mrf.mxu2  ;;  %v8393_v11 = vld [vmem:[#allocation6 + $0x420] sm:$0xf]  ;;  %v9601_v10 = vld [vmem:[#allocation6 + $0x42c] sm:$0xf0] }
 0x207   :  { %3632 = vmatpush.bf16.msrb.mxu0 %v7698_v29  ;;  %v3358_v27 = vpop.f32.mrf.mxu0  ;;  %v8169_v29 = vld [vmem:[#allocation6 + $0x260] sm:$0xf]  ;;  %v3372_v53 = vpop.f32.mrf.mxu3  ;;  %v8394_v45 = vor.u32 %v9601_v10, %v8393_v11 }
 0x208   :  { %v3359_v22 = vadd.f32 %v3358_v27, %v3345_v26  ;;  %5325 = vmatpush.bf16.msra.mxu3 %v8458_v55  ;;  %v8170_v9 = vor.u32 %v9545_v31, %v8169_v29  ;;  %v8617_v27 = vld [vmem:[#allocation6 + $0x5e0] sm:$0xf]  ;;  %v7979_v29 = vld [vmem:[#allocation6 + $0xf0] sm:$0xf0] }
 0x20a   :  { %3675 = vmatpush.bf16.msra.mxu2 %v7414_v21  ;;  %v9613_v21 = vld [vmem:[#allocation6 + $0x48c] sm:$0xf0]  ;;  %v3706_v39 = vmax.f32 %v3359_v22, 0.0  ;;  %v7635_v22 = vld [vmem:[#allocation4 + $0x638] sm:$0xf0] }
 0x20b   :  { %3633 = vmatpush.bf16.msrb.mxu0 %v7666_v54  ;;  %v8442_v32 = vor.u32 %v9613_v21, %v8441_v28  ;;  %v9495_v28 = vld [vmem:[#allocation6 + $0xe4] sm:$0xf]  ;;  %v9406_v21 = vld [vmem:[#allocation4 + $0x61c] sm:$0xf] }
 0x20c   :  { %v10093_v54 = vpack.c.bf16 %v3706_v39, %v3698_v38  ;;  %v7638_v39 = vor.u32 %v9406_v21, %v7635_v22 }
 0x20d   :  { %5326 = vmatpush.bf16.msra.mxu3 %v8442_v32 }
 0x20e   :  { %3676 = vmatpush.bf16.msra.mxu2 %v7382_v44  ;;  %v1955_v44 = vperm.slane %v10074_v37, 2  ;;  %5289 = vmatmul.bf16.vlgmr.msrb.gmra.mxu1 %v10093_v54  ;;  %v3400_v5 = vpop.f32.mrf.mxu2 }
 0x20f   :  { %3634 = vmatpush.bf16.msrb.mxu0 %v7634_v62  ;;  %v3412_v56 = vpop.f32.mrf.mxu0  ;;  %v8137_v62 = vld [vmem:[#allocation6 + $0x220] sm:$0xf] }
 0x210   :  { %v3371_v59 = vadd.f32 %v3370_v17, %v1955_v44  ;;  %v3373_v35 = vadd.f32 %v3372_v53, %v1955_v44  ;;  %v9414_v17 = vld [vmem:[#allocation4 + $0x65c] sm:$0xf]  ;;  %v9649_v53 = vld [vmem:[#allocation6 + $0x5ac] sm:$0xf0] }
 0x211   :  { %3677 = vmatmul.bf16.vlgmr.msra.gmra.mxu2 %v10036_v8  ;;  %v9446_v8 = vld [vmem:[#allocation4 + $0x75c] sm:$0xf]  ;;  %5327 = vmatpush.bf16.msra.mxu3 %v8426_v48  ;;  %v7670_v26 = vor.u32 %v9414_v17, %v7667_v16  ;;  %v9589_v48 = vld [vmem:[#allocation6 + $0x3cc] sm:$0xf0]  ;;  %v8586_v57 = vor.u32 %v9649_v53, %v8585_v51  ;;  %v8297_v17 = vld [vmem:[#allocation6 + $0x360] sm:$0xf] }
 0x212   :  { %5295 = vmatpush.bf16.msrb.mxu2 %v8234_v46  ;;  %3635 = vmatmul.bf16.vlgmr.msrb.gmra.mxu0 %v10048_v30  ;;  %v7798_v4 = vor.u32 %v9446_v8, %v7795_v24  ;;  %v7766_v46 = vor.u32 %v9438_v34, %v7763_v36  ;;  %v3385_v63 = vadd.f32 %v3384_v25, %v3371_v59  ;;  %v8377_v8 = vld [vmem:[#allocation6 + $0x400] sm:$0xf]  ;;  %v9597_v24 = vld [vmem:[#allocation6 + $0x40c] sm:$0xf0] }
 0x213   :  { %3683 = vmatpush.bf16.msra.mxu0 %v7862_v2  ;;  %v7699_v2 = vld [vmem:[#allocation4 + $0x6b8] sm:$0xf0]  ;;  %v3387_v3 = vadd.f32 %v3386_v40, %v3373_v35  ;;  %v8378_v18 = vor.u32 %v9597_v24, %v8377_v8  ;;  %v9593_v34 = vld [vmem:[#allocation6 + $0x3ec] sm:$0xf0]  ;;  %v7982_v36 = vor.u32 %v9495_v28, %v7979_v29  ;;  %v8329_v59 = vld [vmem:[#allocation6 + $0x3a0] sm:$0xf] }
 0x214   :  { %v3399_v12 = vadd.f32 %v3398_v33, %v3385_v63  ;;  %v7702_v13 = vor.u32 %v9422_v1, %v7699_v2  ;;  %v8361_v33 = vld [vmem:[#allocation6 + $0x3e0] sm:$0xf]  ;;  %v9585_v40 = vld [vmem:[#allocation6 + $0x3ac] sm:$0xf0]  ;;  %v9483_v35 = vld [vmem:[#allocation6 + $0x84] sm:$0xf]  ;;  %v3440_v1 = vpop.f32.mrf.mxu1 }
 0x215   :  { %5328 = vmatpush.bf16.msra.mxu3 %v8410_v0  ;;  %v8362_v44 = vor.u32 %v9593_v34, %v8361_v33  ;;  %v9645_v0 = vld [vmem:[#allocation6 + $0x58c] sm:$0xf0]  ;;  %v8330_v2 = vor.u32 %v9585_v40, %v8329_v59  ;;  %v9475_v8 = vld [vmem:[#allocation6 + $0x44] sm:$0xf]  ;;  %v8521_v29 = vld [vmem:[#allocation6 + $0x520] sm:$0xf] }
 0x216   :  { %5296 = vmatpush.bf16.msrb.mxu2 %v8218_v61  ;;  %v9537_v61 = vld [vmem:[#allocation6 + $0x22c] sm:$0xf0]  ;;  %v3413_v20 = vadd.f32 %v3412_v56, %v3399_v12  ;;  %v9487_v56 = vld [vmem:[#allocation6 + $0xa4] sm:$0xf]  ;;  %v3454_v10 = vpop.f32.mrf.mxu2  ;;  %v8553_v12 = vld [vmem:[#allocation6 + $0x560] sm:$0xf] }
 0x217   :  { %3684 = vmatpush.bf16.msra.mxu0 %v7830_v19  ;;  %v8138_v6 = vor.u32 %v9537_v61, %v8137_v62  ;;  %v3401_v19 = vadd.f32 %v3400_v5, %v3387_v3  ;;  %v3414_v23 = vpop.f32.mrf.mxu0  ;;  %v3426_v62 = vpop.f32.mrf.mxu3  ;;  %v8569_v61 = vld [vmem:[#allocation6 + $0x580] sm:$0xf]  ;;  %v7931_v3 = vld [vmem:[#allocation6 + $0x90] sm:$0xf0]  ;;  %v9577_v16 = vld [vmem:[#allocation6 + $0x36c] sm:$0xf0] }
 0x218   :  { %v3699_v31 = vmax.f32 %v3413_v20, 0.0  ;;  %v8570_v63 = vor.u32 %v9645_v0, %v8569_v61  ;;  %v8313_v5 = vld [vmem:[#allocation6 + $0x380] sm:$0xf]  ;;  %v7934_v11 = vor.u32 %v9483_v35, %v7931_v3  ;;  %v9573_v28 = vld [vmem:[#allocation6 + $0x34c] sm:$0xf0] }
 0x219   :  { %v3415_v25 = vadd.f32 %v3414_v23, %v3401_v19  ;;  %5329 = vmatpush.bf16.msra.mxu3 %v8394_v45  ;;  %v7915_v45 = vld [vmem:[#allocation6 + $0x70] sm:$0xf0]  ;;  %v8537_v23 = vld [vmem:[#allocation6 + $0x540] sm:$0xf]  ;;  %v9629_v53 = vld [vmem:[#allocation6 + $0x50c] sm:$0xf0] }
 0x21a   :  { %5297 = vmatpush.bf16.msrb.mxu2 %v8202_v14  ;;  %v8121_v14 = vld [vmem:[#allocation6 + $0x200] sm:$0xf]  ;;  %v9689_v40 = vld [vmem:[#allocation6 + $0x6ec] sm:$0xf0] }
 0x21b   :  { %3685 = vmatpush.bf16.msra.mxu0 %v7798_v4  ;;  %v8122_v55 = vor.u32 %v9533_v15, %v8121_v14  ;;  %v3707_v32 = vmax.f32 %v3415_v25, 0.0  ;;  %v9479_v14 = vld [vmem:[#allocation6 + $0x64] sm:$0xf]  ;;  %v8298_v25 = vor.u32 %v9577_v16, %v8297_v17  ;;  %v8505_v51 = vld [vmem:[#allocation6 + $0x500] sm:$0xf] }
 0x21c   :  { %v7918_v19 = vor.u32 %v9479_v14, %v7915_v45  ;;  %v3442_v22 = vpop.f32.mrf.mxu1  ;;  %v8745_v59 = vld [vmem:[#allocation6 + $0x6e0] sm:$0xf]  ;;  %v9565_v61 = vld [vmem:[#allocation6 + $0x30c] sm:$0xf0]  ;;  %v9519_v16 = vld [vmem:[#allocation6 + $0x1a4] sm:$0xf] }
 0x21d   :  { %v10096_v38 = vpack.c.bf16 %v3707_v32, %v3699_v31  ;;  %5330 = vmatpush.bf16.msra.mxu3 %v8378_v18  ;;  %v7899_v18 = vld [vmem:[#allocation6 + $0x50] sm:$0xf0]  ;;  %v9633_v31 = vld [vmem:[#allocation6 + $0x52c] sm:$0xf0]  ;;  %v9471_v32 = vld [vmem:[#allocation6 + $0x24] sm:$0xf]  ;;  %v8746_v35 = vor.u32 %v9689_v40, %v8745_v59 }
 0x21e   :  { %5298 = vmatpush.bf16.msrb.mxu2 %v8186_v50  ;;  %v9657_v50 = vld [vmem:[#allocation6 + $0x5ec] sm:$0xf0]  ;;  %v7902_v21 = vor.u32 %v9475_v8, %v7899_v18  ;;  %v3456_v33 = vpop.f32.mrf.mxu2  ;;  %v8713_v45 = vld [vmem:[#allocation6 + $0x6a0] sm:$0xf]  ;;  %v9515_v18 = vld [vmem:[#allocation6 + $0x184] sm:$0xf] }
 0x21f   :  { %3686 = vmatpush.bf16.msra.mxu0 %v7766_v46  ;;  %v8618_v4 = vor.u32 %v9657_v50, %v8617_v27  ;;  %v3428_v24 = vpop.f32.mrf.mxu3  ;;  %v1956_v27 = vperm.slane %v10074_v37, 3  ;;  %v8281_v50 = vld [vmem:[#allocation6 + $0x340] sm:$0xf]  ;;  %v9681_v17 = vld [vmem:[#allocation6 + $0x6ac] sm:$0xf0] }
 0x220   :  { %v8282_v34 = vor.u32 %v9573_v28, %v8281_v50  ;;  %v8059_v50 = vld [vmem:[#allocation6 + $0x190] sm:$0xf0]  ;;  %v9503_v59 = vld [vmem:[#allocation6 + $0x124] sm:$0xf] }
 0x221   :  { %5337 = vmatpush.bf16.msra.mxu1 %v8618_v4  ;;  %5379 = vmatpush.bf16.msrb.mxu3 %v7982_v36  ;;  %v3429_v4 = vadd.f32 %v3428_v24, %v1956_v27  ;;  %v8522_v36 = vor.u32 %v9633_v31, %v8521_v29  ;;  %v9673_v29 = vld [vmem:[#allocation6 + $0x66c] sm:$0xf0]  ;;  %v9511_v31 = vld [vmem:[#allocation6 + $0x164] sm:$0xf] }
 0x222   :  { %5299 = vmatpush.bf16.msrb.mxu2 %v8170_v9  ;;  %v8601_v9 = vld [vmem:[#allocation6 + $0x5c0] sm:$0xf] }
 0x223   :  { %3687 = vmatpush.bf16.msra.mxu0 %v7734_v42  ;;  %v8602_v46 = vor.u32 %v9653_v41, %v8601_v9  ;;  %v7950_v42 = vor.u32 %v9487_v56, %v7947_v58  ;;  %v3427_v9 = vadd.f32 %v3426_v62, %v1956_v27  ;;  %v3443_v41 = vadd.f32 %v3442_v22, %v3429_v4  ;;  %v9467_v56 = vld [vmem:[#allocation6 + $0x4] sm:$0xf]  ;;  %v7867_v58 = vld [vmem:[#allocation6 + $0x10] sm:$0xf0]  ;;  %v8681_v4 = vld [vmem:[#allocation6 + $0x660] sm:$0xf] }
 0x224   :  { %v7870_v0 = vor.u32 %v9467_v56, %v7867_v58  ;;  %v3496_v24 = vpop.f32.mrf.mxu1  ;;  %v1957_v22 = vperm.slane %v10074_v37, 4  ;;  %v9665_v58 = vld [vmem:[#allocation6 + $0x62c] sm:$0xf0] }
 0x225   :  { %5338 = vmatpush.bf16.msra.mxu1 %v8602_v46  ;;  %5380 = vmatpush.bf16.msrb.mxu3 %v7966_v49  ;;  %v3441_v7 = vadd.f32 %v3440_v1, %v3427_v9  ;;  %v8249_v49 = vld [vmem:[#allocation6 + $0x300] sm:$0xf]  ;;  %v8107_v1 = vld [vmem:[#allocation6 + $0x1f0] sm:$0xf0] }
 0x226   :  { %5300 = vmatpush.bf16.msrb.mxu2 %v8154_v60  ;;  %v8346_v60 = vor.u32 %v9589_v48, %v8345_v47  ;;  %v3457_v47 = vadd.f32 %v3456_v33, %v3443_v41  ;;  %v8043_v33 = vld [vmem:[#allocation6 + $0x170] sm:$0xf0]  ;;  %v8665_v9 = vld [vmem:[#allocation6 + $0x640] sm:$0xf]  ;;  %v9669_v41 = vld [vmem:[#allocation6 + $0x64c] sm:$0xf0] }
 0x227   :  { %3688 = vmatpush.bf16.msra.mxu0 %v7702_v13  ;;  %v9641_v13 = vld [vmem:[#allocation6 + $0x56c] sm:$0xf0] }
 0x228   :  { %v8554_v15 = vor.u32 %v9641_v13, %v8553_v12  ;;  %v9523_v12 = vld [vmem:[#allocation6 + $0x1c4] sm:$0xf] }
 0x229   :  { %5339 = vmatpush.bf16.msra.mxu1 %v8586_v57  ;;  %5381 = vmatpush.bf16.msrb.mxu3 %v7950_v42  ;;  %v8506_v57 = vor.u32 %v9629_v53, %v8505_v51  ;;  %v3455_v42 = vadd.f32 %v3454_v10, %v3441_v7  ;;  %v8091_v10 = vld [vmem:[#allocation6 + $0x1d0] sm:$0xf0] }
 0x22a   :  { %5301 = vmatpush.bf16.msrb.mxu2 %v8138_v6  ;;  %v9581_v6 = vld [vmem:[#allocation6 + $0x38c] sm:$0xf0]  ;;  %v8027_v7 = vld [vmem:[#allocation6 + $0x150] sm:$0xf0] }
 0x22b   :  { %3689 = vmatpush.bf16.msra.mxu0 %v7670_v26 }
 0x22d   :  { %5340 = vmatpush.bf16.msra.mxu1 %v8570_v63  ;;  %5382 = vmatpush.bf16.msrb.mxu3 %v7934_v11  ;;  %v9685_v11 = vld [vmem:[#allocation6 + $0x6cc] sm:$0xf0] }
 0x22e   :  { %5302 = vmatpush.bf16.msrb.mxu2 %v8122_v55  ;;  %v9637_v55 = vld [vmem:[#allocation6 + $0x54c] sm:$0xf0] }
 0x22f   :  { %3690 = vmatpush.bf16.msra.mxu0 %v7638_v39  ;;  %v3468_v20 = vpop.f32.mrf.mxu0  ;;  %v8538_v26 = vor.u32 %v9637_v55, %v8537_v23  ;;  %v7883_v39 = vld [vmem:[#allocation6 + $0x30] sm:$0xf0]  ;;  %v3482_v55 = vpop.f32.mrf.mxu3 }
 0x230   :  { %v7886_v46 = vor.u32 %v9471_v32, %v7883_v39  ;;  %v3469_v3 = vadd.f32 %v3468_v20, %v3455_v42  ;;  %v8714_v20 = vor.u32 %v9681_v17, %v8713_v45  ;;  %v8075_v23 = vld [vmem:[#allocation6 + $0x1b0] sm:$0xf0]  ;;  %v3510_v28 = vpop.f32.mrf.mxu2  ;;  %v8682_v32 = vor.u32 %v9673_v29, %v8681_v4  ;;  %v8841_v29 = vld [vmem:[#allocation6 + $0x7a0] sm:$0xf] }
 0x231   :  { %5303 = vmatmul.bf16.vlgmr.msrb.gmra.mxu2 %v10096_v38  ;;  %5341 = vmatpush.bf16.msra.mxu1 %v8554_v15  ;;  %v8078_v8 = vor.u32 %v9519_v16, %v8075_v23  ;;  %v8011_v42 = vld [vmem:[#allocation6 + $0x130] sm:$0xf0]  ;;  %v9559_v16 = vld [vmem:[#allocation6 + $0x2e4] sm:$0xf] }
 0x232   :  { %3691 = vmatmul.bf16.vlgmr.msra.gmra.mxu0 %v10048_v30  ;;  %v8314_v30 = vor.u32 %v9581_v6, %v8313_v5  ;;  %5383 = vmatpush.bf16.msrb.mxu3 %v7918_v19  ;;  %v8250_v5 = vor.u32 %v9565_v61, %v8249_v49  ;;  %v8729_v6 = vld [vmem:[#allocation6 + $0x6c0] sm:$0xf]  ;;  %v3700_v15 = vmax.f32 %v3469_v3, 0.0 }
 0x233   :  { %5309 = vmatpush.bf16.msrb.mxu0 %v8362_v44  ;;  %v9569_v44 = vld [vmem:[#allocation6 + $0x32c] sm:$0xf0]  ;;  %5351 = vmatpush.bf16.msra.mxu2 %v8746_v35  ;;  %v8730_v14 = vor.u32 %v9685_v11, %v8729_v6  ;;  %v8633_v3 = vld [vmem:[#allocation6 + $0x600] sm:$0xf]  ;;  %v9499_v6 = vld [vmem:[#allocation6 + $0x104] sm:$0xf] }
 0x235   :  { %5342 = vmatpush.bf16.msra.mxu1 %v8538_v26  ;;  %v9677_v26 = vld [vmem:[#allocation6 + $0x68c] sm:$0xf0] }
 0x236   :  { %5384 = vmatpush.bf16.msrb.mxu3 %v7902_v21  ;;  %v8062_v21 = vor.u32 %v9515_v18, %v8059_v50  ;;  %v9555_v18 = vld [vmem:[#allocation6 + $0x2c4] sm:$0xf]  ;;  %v8219_v50 = vld [vmem:[#allocation6 + $0x2d0] sm:$0xf0] }
 0x237   :  { %5310 = vmatpush.bf16.msrb.mxu0 %v8346_v60  ;;  %v3470_v48 = vpop.f32.mrf.mxu0  ;;  %v8266_v60 = vor.u32 %v9569_v44, %v8265_v43  ;;  %5352 = vmatpush.bf16.msra.mxu2 %v8730_v14  ;;  %v9507_v43 = vld [vmem:[#allocation6 + $0x144] sm:$0xf]  ;;  %v3483_v44 = vadd.f32 %v3482_v55, %v1957_v22  ;;  %v8222_v4 = vor.u32 %v9555_v18, %v8219_v50 }
 0x238   :  { %v3471_v62 = vadd.f32 %v3470_v48, %v3457_v47  ;;  %v3498_v47 = vpop.f32.mrf.mxu1  ;;  %v8030_v48 = vor.u32 %v9507_v43, %v8027_v7  ;;  %v3512_v53 = vpop.f32.mrf.mxu2  ;;  %v9619_v55 = vld [vmem:[#allocation6 + $0x4c4] sm:$0xf]  ;;  %v8443_v43 = vld [vmem:[#allocation6 + $0x490] sm:$0xf0]  ;;  %v9709_v7 = vld [vmem:[#allocation6 + $0x78c] sm:$0xf0] }
 0x239   :  { %5343 = vmatpush.bf16.msra.mxu1 %v8522_v36  ;;  %v3484_v36 = vpop.f32.mrf.mxu3  ;;  %v3497_v51 = vadd.f32 %v3496_v24, %v3483_v44 }
 0x23a   :  { %5385 = vmatpush.bf16.msrb.mxu3 %v7886_v46  ;;  %v3708_v13 = vmax.f32 %v3471_v62, 0.0  ;;  %v8666_v46 = vor.u32 %v9669_v41, %v8665_v9  ;;  %v3485_v49 = vadd.f32 %v3484_v36, %v1957_v22  ;;  %v8459_v22 = vld [vmem:[#allocation6 + $0x4b0] sm:$0xf0]  ;;  %v9611_v41 = vld [vmem:[#allocation6 + $0x484] sm:$0xf] }
 0x23b   :  { %5311 = vmatpush.bf16.msrb.mxu0 %v8330_v2  ;;  %v9527_v2 = vld [vmem:[#allocation6 + $0x1e4] sm:$0xf]  ;;  %5353 = vmatpush.bf16.msra.mxu2 %v8714_v20  ;;  %v8235_v20 = vld [vmem:[#allocation6 + $0x2f0] sm:$0xf0] }
 0x23c   :  { %v8110_v63 = vor.u32 %v9527_v2, %v8107_v1  ;;  %v10101_v19 = vpack.c.bf16 %v3708_v13, %v3700_v15  ;;  %v3499_v56 = vadd.f32 %v3498_v47, %v3485_v49  ;;  %v9623_v2 = vld [vmem:[#allocation6 + $0x4e4] sm:$0xf]  ;;  %v8491_v1 = vld [vmem:[#allocation6 + $0x4f0] sm:$0xf0]  ;;  %v9721_v15 = vld [vmem:[#allocation6 + $0x7ec] sm:$0xf0]  ;;  %v8238_v24 = vor.u32 %v9559_v16, %v8235_v20 }
 0x23d   :  { %5344 = vmatpush.bf16.msra.mxu1 %v8506_v57  ;;  %v8649_v57 = vld [vmem:[#allocation6 + $0x620] sm:$0xf]  ;;  %v8494_v45 = vor.u32 %v9623_v2, %v8491_v1  ;;  %v9547_v47 = vld [vmem:[#allocation6 + $0x284] sm:$0xf]  ;;  %v8187_v49 = vld [vmem:[#allocation6 + $0x290] sm:$0xf0] }
 0x23e   :  { %5386 = vmatpush.bf16.msrb.mxu3 %v7870_v0  ;;  %v8650_v40 = vor.u32 %v9665_v58, %v8649_v57  ;;  %v3513_v62 = vadd.f32 %v3512_v53, %v3499_v56  ;;  %v8014_v0 = vor.u32 %v9503_v59, %v8011_v42  ;;  %v8190_v53 = vor.u32 %v9547_v47, %v8187_v49  ;;  %v9607_v57 = vld [vmem:[#allocation6 + $0x464] sm:$0xf]  ;;  %v8427_v58 = vld [vmem:[#allocation6 + $0x470] sm:$0xf0]  ;;  %v8809_v59 = vld [vmem:[#allocation6 + $0x760] sm:$0xf] }
 0x23f   :  { %5312 = vmatpush.bf16.msrb.mxu0 %v8314_v30  ;;  %v8094_v30 = vor.u32 %v9523_v12, %v8091_v10  ;;  %v7995_v12 = vld [vmem:[#allocation6 + $0x110] sm:$0xf0]  ;;  %v8446_v56 = vor.u32 %v9611_v41, %v8443_v43  ;;  %v9543_v42 = vld [vmem:[#allocation6 + $0x264] sm:$0xf]  ;;  %v9693_v41 = vld [vmem:[#allocation6 + $0x70c] sm:$0xf0] }
 0x240   :  { %v7998_v10 = vor.u32 %v9499_v6, %v7995_v12  ;;  %v3552_v44 = vpop.f32.mrf.mxu1  ;;  %v8411_v2 = vld [vmem:[#allocation6 + $0x450] sm:$0xf0]  ;;  %v9701_v6 = vld [vmem:[#allocation6 + $0x74c] sm:$0xf0]  ;;  %v9599_v16 = vld [vmem:[#allocation6 + $0x424] sm:$0xf] }
 0x241   :  { %5393 = vmatpush.bf16.msrb.mxu1 %v8110_v63  ;;  %v3538_v36 = vpop.f32.mrf.mxu3  ;;  %v8395_v20 = vld [vmem:[#allocation6 + $0x430] sm:$0xf0]  ;;  %v9531_v43 = vld [vmem:[#allocation6 + $0x204] sm:$0xf] }
 0x243   :  { %5313 = vmatpush.bf16.msrb.mxu0 %v8298_v25  ;;  %v8697_v25 = vld [vmem:[#allocation6 + $0x680] sm:$0xf] }
 0x244   :  { %v8698_v27 = vor.u32 %v9677_v26, %v8697_v25  ;;  %v8857_v25 = vld [vmem:[#allocation6 + $0x7c0] sm:$0xf]  ;;  %v9717_v26 = vld [vmem:[#allocation6 + $0x7cc] sm:$0xf0] }
 0x245   :  { %5394 = vmatpush.bf16.msrb.mxu1 %v8094_v30  ;;  %v8873_v30 = vld [vmem:[#allocation6 + $0x7e0] sm:$0xf] }
 0x246   :  { %5354 = vmatpush.bf16.msra.mxu2 %v8698_v27  ;;  %v8874_v17 = vor.u32 %v9721_v15, %v8873_v30  ;;  %v8858_v27 = vor.u32 %v9717_v26, %v8857_v25  ;;  %v9697_v25 = vld [vmem:[#allocation6 + $0x72c] sm:$0xf0]  ;;  %v9535_v26 = vld [vmem:[#allocation6 + $0x224] sm:$0xf] }
 0x247   :  { %5314 = vmatpush.bf16.msrb.mxu0 %v8282_v34  ;;  %v8046_v34 = vor.u32 %v9511_v31, %v8043_v33  ;;  %v9713_v31 = vld [vmem:[#allocation6 + $0x7ac] sm:$0xf0] }
 0x248   :  { %v8842_v33 = vor.u32 %v9713_v31, %v8841_v29  ;;  %v9655_v29 = vld [vmem:[#allocation6 + $0x5e4] sm:$0xf] }
 0x249   :  { %5395 = vmatpush.bf16.msrb.mxu1 %v8078_v8  ;;  %v8475_v8 = vld [vmem:[#allocation6 + $0x4d0] sm:$0xf0] }
 0x24a   :  { %5355 = vmatpush.bf16.msra.mxu2 %v8682_v32  ;;  %v9551_v32 = vld [vmem:[#allocation6 + $0x2a4] sm:$0xf] }
 0x24b   :  { %5315 = vmatpush.bf16.msrb.mxu0 %v8266_v60  ;;  %v3511_v60 = vadd.f32 %v3510_v28, %v3497_v51  ;;  %v8478_v28 = vor.u32 %v9619_v55, %v8475_v8 }
 0x24d   :  { %5396 = vmatpush.bf16.msrb.mxu1 %v8062_v21  ;;  %v9615_v21 = vld [vmem:[#allocation6 + $0x4a4] sm:$0xf] }
 0x24e   :  { %5356 = vmatpush.bf16.msra.mxu2 %v8666_v46  ;;  %v8462_v9 = vor.u32 %v9615_v21, %v8459_v22  ;;  %v8825_v46 = vld [vmem:[#allocation6 + $0x780] sm:$0xf]  ;;  %v8398_v21 = vor.u32 %v9599_v16, %v8395_v20  ;;  %v9595_v22 = vld [vmem:[#allocation6 + $0x404] sm:$0xf] }
 0x24f   :  { %5316 = vmatpush.bf16.msrb.mxu0 %v8250_v5  ;;  %v3524_v39 = vpop.f32.mrf.mxu0  ;;  %v9661_v5 = vld [vmem:[#allocation6 + $0x60c] sm:$0xf0]  ;;  %v9579_v20 = vld [vmem:[#allocation6 + $0x384] sm:$0xf] }
 0x250   :  { %v3525_v61 = vadd.f32 %v3524_v39, %v3511_v60  ;;  %v8634_v11 = vor.u32 %v9661_v5, %v8633_v3  ;;  %v3566_v51 = vpop.f32.mrf.mxu2  ;;  %v1958_v60 = vperm.slane %v10074_v37, 5  ;;  %v8793_v5 = vld [vmem:[#allocation6 + $0x740] sm:$0xf] }
 0x251   :  { %5397 = vmatpush.bf16.msrb.mxu1 %v8046_v34  ;;  %v8203_v34 = vld [vmem:[#allocation6 + $0x2b0] sm:$0xf0]  ;;  %v8794_v12 = vor.u32 %v9701_v6, %v8793_v5  ;;  %v9490_v5 = vld [vmem:[#allocation6 + $0xb4] sm:$0xf0] }
 0x252   :  { %5317 = vmatmul.bf16.vlgmr.msrb.gmra.mxu0 %v10101_v19  ;;  %5357 = vmatpush.bf16.msra.mxu2 %v8650_v40  ;;  %v3701_v13 = vmax.f32 %v3525_v61, 0.0  ;;  %v8206_v39 = vor.u32 %v9551_v32, %v8203_v34  ;;  %v9705_v40 = vld [vmem:[#allocation6 + $0x76c] sm:$0xf0]  ;;  %v8171_v61 = vld [vmem:[#allocation6 + $0x270] sm:$0xf0]  ;;  %v3539_v37 = vadd.f32 %v3538_v36, %v1958_v60 }
 0x253   :  { %5365 = vmatpush.bf16.msra.mxu0 %v8874_v17  ;;  %v8174_v1 = vor.u32 %v9543_v42, %v8171_v61  ;;  %v7985_v34 = vld [vmem:[#allocation6 + $0xe8] sm:$0xf]  ;;  %v9498_v36 = vld [vmem:[#allocation6 + $0xf4] sm:$0xf0]  ;;  %v9587_v61 = vld [vmem:[#allocation6 + $0x3c4] sm:$0xf] }
 0x254   :  { %v3553_v15 = vadd.f32 %v3552_v44, %v3539_v37  ;;  %v9494_v42 = vld [vmem:[#allocation6 + $0xd4] sm:$0xf0]  ;;  %v9583_v37 = vld [vmem:[#allocation6 + $0x3a4] sm:$0xf] }
 0x255   :  { %5398 = vmatpush.bf16.msrb.mxu1 %v8030_v48  ;;  %v8826_v48 = vor.u32 %v9709_v7, %v8825_v46  ;;  %v8123_v46 = vld [vmem:[#allocation6 + $0x210] sm:$0xf0] }
 0x256   :  { %5358 = vmatpush.bf16.msra.mxu2 %v8634_v11  ;;  %v9539_v11 = vld [vmem:[#allocation6 + $0x244] sm:$0xf]  ;;  %v3567_v8 = vadd.f32 %v3566_v51, %v3553_v15  ;;  %v8126_v49 = vor.u32 %v9531_v43, %v8123_v46  ;;  %v8571_v15 = vld [vmem:[#allocation6 + $0x590] sm:$0xf0] }
 0x257   :  { %v3526_v35 = vpop.f32.mrf.mxu0  ;;  %5366 = vmatpush.bf16.msra.mxu0 %v8858_v27  ;;  %v8139_v27 = vld [vmem:[#allocation6 + $0x230] sm:$0xf0]  ;;  %v9571_v46 = vld [vmem:[#allocation6 + $0x344] sm:$0xf] }
 0x258   :  { %v3527_v63 = vadd.f32 %v3526_v35, %v3513_v62  ;;  %v8810_v62 = vor.u32 %v9705_v40, %v8809_v59  ;;  %v9603_v35 = vld [vmem:[#allocation6 + $0x444] sm:$0xf]  ;;  %v3568_v17 = vpop.f32.mrf.mxu2  ;;  %v8142_v31 = vor.u32 %v9535_v26, %v8139_v27  ;;  %v8603_v59 = vld [vmem:[#allocation6 + $0x5d0] sm:$0xf0]  ;;  %v7969_v40 = vld [vmem:[#allocation6 + $0xc8] sm:$0xf] }
 0x259   :  { %5399 = vmatpush.bf16.msrb.mxu1 %v8014_v0  ;;  %v8430_v0 = vor.u32 %v9607_v57, %v8427_v58  ;;  %v8363_v57 = vld [vmem:[#allocation6 + $0x3f0] sm:$0xf0]  ;;  %v9639_v26 = vld [vmem:[#allocation6 + $0x564] sm:$0xf]  ;;  %v7921_v27 = vld [vmem:[#allocation6 + $0x68] sm:$0xf] }
 0x25a   :  { %v3709_v14 = vmax.f32 %v3527_v63, 0.0  ;;  %5407 = vmatpush.bf16.msrb.mxu2 %v8238_v24  ;;  %v3540_v63 = vpop.f32.mrf.mxu3  ;;  %v8777_v24 = vld [vmem:[#allocation6 + $0x720] sm:$0xf] }
 0x25b   :  { %5367 = vmatpush.bf16.msra.mxu0 %v8842_v33  ;;  %v3541_v30 = vadd.f32 %v3540_v63, %v1958_v60  ;;  %v8778_v18 = vor.u32 %v9697_v25, %v8777_v24  ;;  %v8619_v33 = vld [vmem:[#allocation6 + $0x5f0] sm:$0xf0]  ;;  %v9591_v60 = vld [vmem:[#allocation6 + $0x3e4] sm:$0xf] }
 0x25c   :  { %v10105_v23 = vpack.c.bf16 %v3709_v14, %v3701_v13  ;;  %v8155_v13 = vld [vmem:[#allocation6 + $0x250] sm:$0xf0]  ;;  %v3554_v14 = vpop.f32.mrf.mxu1  ;;  %v8622_v51 = vor.u32 %v9655_v29, %v8619_v33 }
 0x25d   :  { %5400 = vmatpush.bf16.msrb.mxu1 %v7998_v10  ;;  %v8158_v10 = vor.u32 %v9539_v11, %v8155_v13  ;;  %v3555_v55 = vadd.f32 %v3554_v14, %v3541_v30  ;;  %v8587_v63 = vld [vmem:[#allocation6 + $0x5b0] sm:$0xf0] }
 0x25e   :  { %5331 = vmatmul.bf16.vlgmr.msra.gmra.mxu3 %v10105_v23  ;;  %5408 = vmatpush.bf16.msrb.mxu2 %v8222_v4  ;;  %v8379_v4 = vld [vmem:[#allocation6 + $0x410] sm:$0xf0] }
 0x25f   :  { %5435 = vmatpush.bf16.msra.mxu3 %v8494_v45  ;;  %5368 = vmatpush.bf16.msra.mxu0 %v8826_v48  ;;  %v8414_v45 = vor.u32 %v9603_v35, %v8411_v2  ;;  %v3569_v50 = vadd.f32 %v3568_v17, %v3555_v55  ;;  %v8382_v48 = vor.u32 %v9595_v22, %v8379_v4  ;;  %v9486_v17 = vld [vmem:[#allocation6 + $0x94] sm:$0xf0]  ;;  %v8315_v55 = vld [vmem:[#allocation6 + $0x390] sm:$0xf0]  ;;  %v9575_v4 = vld [vmem:[#allocation6 + $0x364] sm:$0xf] }
 0x260   :  { %v7970_v2 = vor.u32 %v9494_v42, %v7969_v40  ;;  %v8299_v29 = vld [vmem:[#allocation6 + $0x370] sm:$0xf0]  ;;  %v9474_v40 = vld [vmem:[#allocation6 + $0x34] sm:$0xf0] }
 0x261   :  { %v8302_v43 = vor.u32 %v9575_v4, %v8299_v29  ;;  %v8097_v4 = vld [vmem:[#allocation6 + $0x1c8] sm:$0xf]  ;;  %v9526_v29 = vld [vmem:[#allocation6 + $0x1d4] sm:$0xf0] }
 0x262   :  { %5409 = vmatpush.bf16.msrb.mxu2 %v8206_v39  ;;  %v3594_v11 = vpop.f32.mrf.mxu3 }
 0x263   :  { %5436 = vmatpush.bf16.msra.mxu3 %v8478_v28  ;;  %5369 = vmatpush.bf16.msra.mxu0 %v8810_v62  ;;  %v8366_v62 = vor.u32 %v9591_v60, %v8363_v57  ;;  %v8523_v60 = vld [vmem:[#allocation6 + $0x530] sm:$0xf0] }
 0x264   :  { %v3608_v30 = vpop.f32.mrf.mxu1 }
 0x266   :  { %5410 = vmatpush.bf16.msrb.mxu2 %v8190_v53  ;;  %v7986_v53 = vor.u32 %v9498_v36, %v7985_v34  ;;  %v9635_v34 = vld [vmem:[#allocation6 + $0x544] sm:$0xf] }
 0x267   :  { %5437 = vmatpush.bf16.msra.mxu3 %v8462_v9  ;;  %5370 = vmatpush.bf16.msra.mxu0 %v8794_v12  ;;  %v8761_v9 = vld [vmem:[#allocation6 + $0x700] sm:$0xf]  ;;  %v8331_v12 = vld [vmem:[#allocation6 + $0x3b0] sm:$0xf0] }
 0x268   :  { %v8762_v44 = vor.u32 %v9693_v41, %v8761_v9  ;;  %v8334_v16 = vor.u32 %v9583_v37, %v8331_v12  ;;  %v7905_v9 = vld [vmem:[#allocation6 + $0x48] sm:$0xf]  ;;  %v9478_v41 = vld [vmem:[#allocation6 + $0x54] sm:$0xf0] }
 0x269   :  { %v7873_v37 = vld [vmem:[#allocation6 + $0x8] sm:$0xf]  ;;  %v9470_v12 = vld [vmem:[#allocation6 + $0x14] sm:$0xf0] }
 0x26a   :  { %5411 = vmatpush.bf16.msrb.mxu2 %v8174_v1  ;;  %v9647_v1 = vld [vmem:[#allocation6 + $0x5a4] sm:$0xf] }
 0x26b   :  { %5438 = vmatpush.bf16.msra.mxu3 %v8446_v56  ;;  %5371 = vmatpush.bf16.msra.mxu0 %v8778_v18  ;;  %v9651_v56 = vld [vmem:[#allocation6 + $0x5c4] sm:$0xf]  ;;  %v8590_v13 = vor.u32 %v9647_v1, %v8587_v63  ;;  %v8555_v18 = vld [vmem:[#allocation6 + $0x570] sm:$0xf0] }
 0x26c   :  { %v8606_v35 = vor.u32 %v9651_v56, %v8603_v59  ;;  %v9631_v56 = vld [vmem:[#allocation6 + $0x524] sm:$0xf]  ;;  %v7889_v59 = vld [vmem:[#allocation6 + $0x28] sm:$0xf] }
 0x26e   :  { %5387 = vmatmul.bf16.vlgmr.msrb.gmra.mxu3 %v10085_v52  ;;  %5412 = vmatpush.bf16.msrb.mxu2 %v8158_v10  ;;  %v9643_v10 = vld [vmem:[#allocation6 + $0x584] sm:$0xf] }
 0x26f   :  { %v3580_v3 = vpop.f32.mrf.mxu0  ;;  %5439 = vmatpush.bf16.msra.mxu3 %v8430_v0  ;;  %5372 = vmatpush.bf16.msra.mxu0 %v8762_v44  ;;  %v8347_v0 = vld [vmem:[#allocation6 + $0x3d0] sm:$0xf0]  ;;  %v8574_v24 = vor.u32 %v9643_v10, %v8571_v15  ;;  %v9687_v10 = vld [vmem:[#allocation6 + $0x6e4] sm:$0xf]  ;;  %v9530_v15 = vld [vmem:[#allocation6 + $0x1f4] sm:$0xf0] }
 0x270   :  { %v3581_v28 = vadd.f32 %v3580_v3, %v3567_v8  ;;  %v7953_v3 = vld [vmem:[#allocation6 + $0xa8] sm:$0xf]  ;;  %v8350_v6 = vor.u32 %v9587_v61, %v8347_v0  ;;  %v8526_v0 = vor.u32 %v9631_v56, %v8523_v60  ;;  %v9675_v60 = vld [vmem:[#allocation6 + $0x684] sm:$0xf] }
 0x271   :  { %v7954_v14 = vor.u32 %v9490_v5, %v7953_v3  ;;  %v7890_v3 = vor.u32 %v9474_v40, %v7889_v59  ;;  %v9627_v5 = vld [vmem:[#allocation6 + $0x504] sm:$0xf]  ;;  %v9518_v59 = vld [vmem:[#allocation6 + $0x194] sm:$0xf0]  ;;  %v8699_v40 = vld [vmem:[#allocation6 + $0x690] sm:$0xf0] }
 0x272   :  { %5413 = vmatpush.bf16.msrb.mxu2 %v8142_v31  ;;  %v3702_v7 = vmax.f32 %v3581_v28, 0.0  ;;  %v8318_v28 = vor.u32 %v9579_v20, %v8315_v55  ;;  %v3596_v31 = vpop.f32.mrf.mxu3 }
 0x273   :  { %5440 = vmatpush.bf16.msra.mxu3 %v8414_v45  ;;  %5421 = vmatpush.bf16.msrb.mxu0 %v8366_v62  ;;  %v7937_v45 = vld [vmem:[#allocation6 + $0x88] sm:$0xf] }
 0x274   :  { %v3622_v8 = vpop.f32.mrf.mxu2  ;;  %v7938_v25 = vor.u32 %v9486_v17, %v7937_v45  ;;  %v8747_v45 = vld [vmem:[#allocation6 + $0x6f0] sm:$0xf0]  ;;  %v8497_v17 = vld [vmem:[#allocation6 + $0x4e8] sm:$0xf] }
 0x276   :  { %5414 = vmatpush.bf16.msrb.mxu2 %v8126_v49 }
 0x277   :  { %v3582_v32 = vpop.f32.mrf.mxu0  ;;  %5441 = vmatpush.bf16.msra.mxu3 %v8398_v21  ;;  %5422 = vmatpush.bf16.msrb.mxu0 %v8350_v6  ;;  %v10117_v21 = vld [vmem:[%s10279_s4] sm:$0xff] }
 0x278   :  { %v3583_v39 = vadd.f32 %v3582_v32, %v3569_v50  ;;  %v9482_v50 = vld [vmem:[#allocation6 + $0x74] sm:$0xf0]  ;;  %v1959_v22 = vperm.slane %v10117_v21, 6  ;;  %v8558_v32 = vor.u32 %v9639_v26, %v8555_v18  ;;  %v9563_v26 = vld [vmem:[#allocation6 + $0x304] sm:$0xf] }
 0x279   :  { %v7922_v33 = vor.u32 %v9482_v50, %v7921_v27  ;;  %v8251_v18 = vld [vmem:[#allocation6 + $0x310] sm:$0xf0]  ;;  %v8750_v50 = vor.u32 %v9687_v10, %v8747_v45  ;;  %v9510_v45 = vld [vmem:[#allocation6 + $0x154] sm:$0xf0] }
 0x27a   :  { %v3710_v47 = vmax.f32 %v3583_v39, 0.0  ;;  %v8539_v39 = vld [vmem:[#allocation6 + $0x550] sm:$0xf0]  ;;  %v3595_v44 = vadd.f32 %v3594_v11, %v1959_v22 }
 0x27b   :  { %5442 = vmatpush.bf16.msra.mxu3 %v8382_v48  ;;  %5423 = vmatpush.bf16.msrb.mxu0 %v8334_v16  ;;  %v3610_v48 = vpop.f32.mrf.mxu1  ;;  %v8507_v11 = vld [vmem:[#allocation6 + $0x510] sm:$0xf0]  ;;  %v9626_v16 = vld [vmem:[#allocation6 + $0x4f4] sm:$0xf0] }
 0x27c   :  { %v10110_v58 = vpack.c.bf16 %v3710_v47, %v3702_v7  ;;  %v8283_v7 = vld [vmem:[#allocation6 + $0x350] sm:$0xf0]  ;;  %v3597_v47 = vadd.f32 %v3596_v31, %v1959_v22  ;;  %v3609_v49 = vadd.f32 %v3608_v30, %v3595_v44  ;;  %v3624_v57 = vpop.f32.mrf.mxu2  ;;  %v8113_v30 = vld [vmem:[#allocation6 + $0x1e8] sm:$0xf]  ;;  %v9683_v22 = vld [vmem:[#allocation6 + $0x6c4] sm:$0xf] }
 0x27d   :  { %v8286_v42 = vor.u32 %v9571_v46, %v8283_v7  ;;  %v8731_v31 = vld [vmem:[#allocation6 + $0x6d0] sm:$0xf0]  ;;  %v9522_v44 = vld [vmem:[#allocation6 + $0x1b4] sm:$0xf0]  ;;  %v8465_v7 = vld [vmem:[#allocation6 + $0x4a8] sm:$0xf] }
 0x27e   :  { %5345 = vmatmul.bf16.vlgmr.msra.gmra.mxu1 %v10110_v58  ;;  %5443 = vmatmul.bf16.vlgmr.msra.gmra.mxu3 %v10105_v23  ;;  %v3611_v62 = vadd.f32 %v3610_v48, %v3597_v47  ;;  %v3623_v61 = vadd.f32 %v3622_v8, %v3609_v49  ;;  %v8510_v8 = vor.u32 %v9627_v5, %v8507_v11  ;;  %v8715_v46 = vld [vmem:[#allocation6 + $0x6b0] sm:$0xf0]  ;;  %v9618_v47 = vld [vmem:[#allocation6 + $0x4b4] sm:$0xf0]  ;;  %v3650_v48 = vpop.f32.mrf.mxu3  ;;  %v8433_v11 = vld [vmem:[#allocation6 + $0x468] sm:$0xf] }
 0x27f   :  { %5449 = vmatpush.bf16.msra.mxu1 %v8622_v51  ;;  %5491 = vmatpush.bf16.msrb.mxu3 %v7986_v53  ;;  %v8542_v51 = vor.u32 %v9635_v34, %v8539_v39  ;;  %v7906_v53 = vor.u32 %v9478_v41, %v7905_v9  ;;  %v8254_v34 = vor.u32 %v9563_v26, %v8251_v18  ;;  %v9679_v41 = vld [vmem:[#allocation6 + $0x6a4] sm:$0xf]  ;;  %v9514_v5 = vld [vmem:[#allocation6 + $0x174] sm:$0xf0] }
 0x280   :  { %5424 = vmatpush.bf16.msrb.mxu0 %v8318_v28  ;;  %v3625_v1 = vadd.f32 %v3624_v57, %v3611_v62  ;;  %v8498_v28 = vor.u32 %v9626_v16, %v8497_v17  ;;  %v8734_v39 = vor.u32 %v9683_v22, %v8731_v31  ;;  %v8466_v56 = vor.u32 %v9618_v47, %v8465_v7  ;;  %v8065_v57 = vld [vmem:[#allocation6 + $0x188] sm:$0xf]  ;;  %v9614_v62 = vld [vmem:[#allocation6 + $0x494] sm:$0xf0]  ;;  %v8667_v16 = vld [vmem:[#allocation6 + $0x650] sm:$0xf0] }
 0x281   :  { %v9663_v22 = vld [vmem:[#allocation6 + $0x624] sm:$0xf] }
 0x283   :  { %5450 = vmatpush.bf16.msra.mxu1 %v8606_v35  ;;  %5492 = vmatpush.bf16.msrb.mxu3 %v7970_v2  ;;  %v9567_v35 = vld [vmem:[#allocation6 + $0x324] sm:$0xf]  ;;  %v8267_v2 = vld [vmem:[#allocation6 + $0x330] sm:$0xf0] }
 0x284   :  { %5425 = vmatpush.bf16.msrb.mxu0 %v8302_v43  ;;  %v8081_v43 = vld [vmem:[#allocation6 + $0x1a8] sm:$0xf] }
 0x285   :  { %v8082_v49 = vor.u32 %v9522_v44, %v8081_v43  ;;  %v9659_v43 = vld [vmem:[#allocation6 + $0x604] sm:$0xf]  ;;  %v8635_v44 = vld [vmem:[#allocation6 + $0x610] sm:$0xf0] }
 0x287   :  { %5451 = vmatpush.bf16.msra.mxu1 %v8590_v13  ;;  %5493 = vmatpush.bf16.msrb.mxu3 %v7954_v14  ;;  %v8270_v13 = vor.u32 %v9567_v35, %v8267_v2  ;;  %v8066_v35 = vor.u32 %v9518_v59, %v8065_v57  ;;  %v8702_v2 = vor.u32 %v9675_v60, %v8699_v40  ;;  %v9719_v60 = vld [vmem:[#allocation6 + $0x7e4] sm:$0xf]  ;;  %v8875_v57 = vld [vmem:[#allocation6 + $0x7f0] sm:$0xf0]  ;;  %v8241_v59 = vld [vmem:[#allocation6 + $0x2e8] sm:$0xf] }
 0x288   :  { %5426 = vmatpush.bf16.msrb.mxu0 %v8286_v42  ;;  %v8449_v42 = vld [vmem:[#allocation6 + $0x488] sm:$0xf]  ;;  %v9562_v40 = vld [vmem:[#allocation6 + $0x2f4] sm:$0xf0] }
 0x28b   :  { %5452 = vmatpush.bf16.msra.mxu1 %v8574_v24  ;;  %5494 = vmatpush.bf16.msrb.mxu3 %v7938_v25  ;;  %v7874_v24 = vor.u32 %v9470_v12, %v7873_v37  ;;  %v8114_v25 = vor.u32 %v9530_v15, %v8113_v30  ;;  %v9610_v37 = vld [vmem:[#allocation6 + $0x474] sm:$0xf0]  ;;  %v9667_v30 = vld [vmem:[#allocation6 + $0x644] sm:$0xf]  ;;  %v8033_v15 = vld [vmem:[#allocation6 + $0x148] sm:$0xf] }
 0x28c   :  { %5427 = vmatpush.bf16.msrb.mxu0 %v8270_v13  ;;  %v3652_v13 = vpop.f32.mrf.mxu3  ;;  %v8034_v26 = vor.u32 %v9510_v45, %v8033_v15  ;;  %v9654_v15 = vld [vmem:[#allocation6 + $0x5d4] sm:$0xf0]  ;;  %v9492_v45 = vld [vmem:[#allocation6 + $0xcc] sm:$0xf] }
 0x28e   :  { %5401 = vmatmul.bf16.vlgmr.msrb.gmra.mxu1 %v10093_v54 }
 0x28f   :  { %v3636_v36 = vpop.f32.mrf.mxu0  ;;  %5453 = vmatpush.bf16.msra.mxu1 %v8558_v32  ;;  %5495 = vmatpush.bf16.msrb.mxu3 %v7922_v33  ;;  %v8481_v32 = vld [vmem:[#allocation6 + $0x4c8] sm:$0xf]  ;;  %v9622_v33 = vld [vmem:[#allocation6 + $0x4d4] sm:$0xf0] }
 0x290   :  { %v3637_v63 = vadd.f32 %v3636_v36, %v3623_v61  ;;  %v8098_v36 = vor.u32 %v9526_v29, %v8097_v4  ;;  %v8482_v9 = vor.u32 %v9622_v33, %v8481_v32  ;;  %5428 = vmatpush.bf16.msrb.mxu0 %v8254_v34  ;;  %v8017_v4 = vld [vmem:[#allocation6 + $0x128] sm:$0xf]  ;;  %v9506_v29 = vld [vmem:[#allocation6 + $0x134] sm:$0xf0]  ;;  %v8651_v33 = vld [vmem:[#allocation6 + $0x630] sm:$0xf0] }
 0x291   :  { %v8401_v34 = vld [vmem:[#allocation6 + $0x428] sm:$0xf]  ;;  %v8654_v47 = vor.u32 %v9663_v22, %v8651_v33  ;;  %v9488_v22 = vld [vmem:[#allocation6 + $0xac] sm:$0xf]  ;;  %v8827_v33 = vld [vmem:[#allocation6 + $0x790] sm:$0xf0] }
 0x292   :  { %v3703_v20 = vmax.f32 %v3637_v63, 0.0  ;;  %v9671_v63 = vld [vmem:[#allocation6 + $0x664] sm:$0xf] }
 0x293   :  { %5454 = vmatpush.bf16.msra.mxu1 %v8542_v51  ;;  %5496 = vmatpush.bf16.msrb.mxu3 %v7906_v53  ;;  %v3664_v51 = vpop.f32.mrf.mxu1  ;;  %v8718_v53 = vor.u32 %v9679_v41, %v8715_v46  ;;  %v8018_v41 = vor.u32 %v9506_v29, %v8017_v4  ;;  %v8001_v46 = vld [vmem:[#allocation6 + $0x108] sm:$0xf]  ;;  %v7955_v4 = vld [vmem:[#allocation6 + $0xb8] sm:$0xf0] }
 0x294   :  { %v3678_v61 = vpop.f32.mrf.mxu2 }
 0x297   :  { %v3638_v6 = vpop.f32.mrf.mxu0  ;;  %5455 = vmatpush.bf16.msra.mxu1 %v8526_v0  ;;  %5497 = vmatpush.bf16.msrb.mxu3 %v7890_v3  ;;  %v1960_v0 = vperm.slane %v10117_v21, 7  ;;  %v8049_v3 = vld [vmem:[#allocation6 + $0x168] sm:$0xf]  ;;  %v8434_v21 = vor.u32 %v9610_v37, %v8433_v11  ;;  %v8242_v11 = vor.u32 %v9562_v40, %v8241_v59  ;;  %v9715_v37 = vld [vmem:[#allocation6 + $0x7c4] sm:$0xf] }
 0x298   :  { %v3639_v14 = vadd.f32 %v3638_v6, %v3625_v1  ;;  %v8450_v1 = vor.u32 %v9614_v62, %v8449_v42  ;;  %v8683_v6 = vld [vmem:[#allocation6 + $0x670] sm:$0xf0]  ;;  %v8050_v12 = vor.u32 %v9514_v5, %v8049_v3  ;;  %v8625_v42 = vld [vmem:[#allocation6 + $0x5e8] sm:$0xf]  ;;  %v9658_v62 = vld [vmem:[#allocation6 + $0x5f4] sm:$0xf0] }
 0x299   :  { %v8686_v10 = vor.u32 %v9671_v63, %v8683_v6  ;;  %v3651_v17 = vadd.f32 %v3650_v48, %v1960_v0  ;;  %v8638_v63 = vor.u32 %v9659_v43, %v8635_v44  ;;  %v8878_v6 = vor.u32 %v9719_v60, %v8875_v57  ;;  %v9646_v43 = vld [vmem:[#allocation6 + $0x594] sm:$0xf0]  ;;  %v9484_v44 = vld [vmem:[#allocation6 + $0x8c] sm:$0xf]  ;;  %v8561_v57 = vld [vmem:[#allocation6 + $0x568] sm:$0xf] }
 0x29a   :  { %v3711_v55 = vmax.f32 %v3639_v14, 0.0  ;;  %v9546_v60 = vld [vmem:[#allocation6 + $0x274] sm:$0xf0]  ;;  %v9480_v40 = vld [vmem:[#allocation6 + $0x6c] sm:$0xf] }
 0x29b   :  { %5456 = vmatpush.bf16.msra.mxu1 %v8510_v8  ;;  %5498 = vmatpush.bf16.msrb.mxu3 %v7874_v24  ;;  %v3666_v8 = vpop.f32.mrf.mxu1  ;;  %v3653_v24 = vadd.f32 %v3652_v13, %v1960_v0  ;;  %v8626_v13 = vor.u32 %v9658_v62, %v8625_v42  ;;  %v9642_v59 = vld [vmem:[#allocation6 + $0x574] sm:$0xf0]  ;;  %v7923_v42 = vld [vmem:[#allocation6 + $0x78] sm:$0xf0] }
 0x29c   :  { %v10121_v27 = vpack.c.bf16 %v3711_v55, %v3703_v20  ;;  %v8417_v20 = vld [vmem:[#allocation6 + $0x448] sm:$0xf]  ;;  %v9606_v55 = vld [vmem:[#allocation6 + $0x454] sm:$0xf0]  ;;  %v3680_v18 = vpop.f32.mrf.mxu2 }
 0x29d   :  { %v3667_v31 = vadd.f32 %v3666_v8, %v3653_v24  ;;  %v8843_v8 = vld [vmem:[#allocation6 + $0x7b0] sm:$0xf0] }
 0x29e   :  { %5359 = vmatmul.bf16.vlgmr.msra.gmra.mxu2 %v10121_v27  ;;  %5499 = vmatmul.bf16.vlgmr.msrb.gmra.mxu3 %v10085_v52 }
 0x29f   :  { %5505 = vmatpush.bf16.msrb.mxu1 %v8114_v25  ;;  %5463 = vmatpush.bf16.msra.mxu2 %v8750_v50  ;;  %v3665_v25 = vadd.f32 %v3664_v51, %v3651_v17  ;;  %v8670_v50 = vor.u32 %v9667_v30, %v8667_v16  ;;  %v8385_v51 = vld [vmem:[#allocation6 + $0x408] sm:$0xf]  ;;  %v7971_v17 = vld [vmem:[#allocation6 + $0xd8] sm:$0xf0] }
 0x2a0   :  { %5547 = vmatpush.bf16.msra.mxu3 %v8498_v28  ;;  %5457 = vmatmul.bf16.vlgmr.msra.gmra.mxu1 %v10110_v58  ;;  %v8418_v28 = vor.u32 %v9606_v55, %v8417_v20  ;;  %v8609_v30 = vld [vmem:[#allocation6 + $0x5c8] sm:$0xf]  ;;  %v9711_v55 = vld [vmem:[#allocation6 + $0x7a4] sm:$0xf] }
 0x2a1   :  { %v3679_v32 = vadd.f32 %v3678_v61, %v3665_v25  ;;  %v8610_v24 = vor.u32 %v9654_v15, %v8609_v30  ;;  %v7974_v25 = vor.u32 %v9492_v45, %v7971_v17  ;;  %v8846_v29 = vor.u32 %v9711_v55, %v8843_v8  ;;  %v8145_v45 = vld [vmem:[#allocation6 + $0x228] sm:$0xf]  ;;  %v9538_v17 = vld [vmem:[#allocation6 + $0x234] sm:$0xf0]  ;;  %v9472_v55 = vld [vmem:[#allocation6 + $0x2c] sm:$0xf] }
 0x2a2   :  { %v7891_v8 = vld [vmem:[#allocation6 + $0x38] sm:$0xf0] }
 0x2a3   :  { %5506 = vmatpush.bf16.msrb.mxu1 %v8098_v36  ;;  %5464 = vmatpush.bf16.msra.mxu2 %v8734_v39  ;;  %v9602_v36 = vld [vmem:[#allocation6 + $0x434] sm:$0xf0]  ;;  %v3681_v39 = vadd.f32 %v3680_v18, %v3667_v31 }
 0x2a4   :  { %5548 = vmatpush.bf16.msra.mxu3 %v8482_v9  ;;  %v8402_v48 = vor.u32 %v9602_v36, %v8401_v34  ;;  %v9554_v18 = vld [vmem:[#allocation6 + $0x2b4] sm:$0xf0]  ;;  %v7958_v36 = vor.u32 %v9488_v22, %v7955_v4  ;;  %v7894_v4 = vor.u32 %v9472_v55, %v7891_v8  ;;  %v8705_v55 = vld [vmem:[#allocation6 + $0x688] sm:$0xf] }
 0x2a5   :  { %v9678_v8 = vld [vmem:[#allocation6 + $0x694] sm:$0xf0] }
 0x2a7   :  { %5507 = vmatpush.bf16.msrb.mxu1 %v8082_v49  ;;  %5465 = vmatpush.bf16.msra.mxu2 %v8718_v53  ;;  %v9502_v49 = vld [vmem:[#allocation6 + $0x114] sm:$0xf0] }
 0x2a8   :  { %5549 = vmatpush.bf16.msra.mxu3 %v8466_v56  ;;  %v9598_v53 = vld [vmem:[#allocation6 + $0x414] sm:$0xf0] }
 0x2a9   :  { %v8386_v3 = vor.u32 %v9598_v53, %v8385_v51 }
 0x2ab   :  { %5508 = vmatpush.bf16.msrb.mxu1 %v8066_v35  ;;  %5466 = vmatpush.bf16.msra.mxu2 %v8702_v2  ;;  %v8002_v35 = vor.u32 %v9502_v49, %v8001_v46  ;;  %v9496_v2 = vld [vmem:[#allocation6 + $0xec] sm:$0xf]  ;;  %v7939_v46 = vld [vmem:[#allocation6 + $0x98] sm:$0xf0]  ;;  %v8811_v49 = vld [vmem:[#allocation6 + $0x770] sm:$0xf0] }
 0x2ac   :  { %5550 = vmatpush.bf16.msra.mxu3 %v8450_v1  ;;  %v7987_v1 = vld [vmem:[#allocation6 + $0xf8] sm:$0xf0]  ;;  %v7942_v53 = vor.u32 %v9484_v44, %v7939_v46 }
 0x2ad   :  { %v8115_v46 = vld [vmem:[#allocation6 + $0x1f8] sm:$0xf0] }
 0x2ae   :  { %5415 = vmatmul.bf16.vlgmr.msrb.gmra.mxu2 %v10096_v38 }
 0x2af   :  { %v3692_v14 = vpop.f32.mrf.mxu0  ;;  %5509 = vmatpush.bf16.msrb.mxu1 %v8050_v12  ;;  %5467 = vmatpush.bf16.msra.mxu2 %v8686_v10  ;;  %v8859_v12 = vld [vmem:[#allocation6 + $0x7d0] sm:$0xf0]  ;;  %v8225_v10 = vld [vmem:[#allocation6 + $0x2c8] sm:$0xf] }
 0x2b0   :  { %5551 = vmatpush.bf16.msra.mxu3 %v8434_v21  ;;  %v3693_v9 = vadd.f32 %v3692_v14, %v3679_v32  ;;  %v7990_v14 = vor.u32 %v9496_v2, %v7987_v1  ;;  %v9558_v21 = vld [vmem:[#allocation6 + $0x2d4] sm:$0xf0]  ;;  %v8862_v16 = vor.u32 %v9715_v37, %v8859_v12  ;;  %v9707_v32 = vld [vmem:[#allocation6 + $0x784] sm:$0xf]  ;;  %v8562_v2 = vor.u32 %v9642_v59, %v8561_v57  ;;  %v9476_v37 = vld [vmem:[#allocation6 + $0x4c] sm:$0xf] }
 0x2b1   :  { %v8226_v20 = vor.u32 %v9558_v21, %v8225_v10  ;;  %v7926_v1 = vor.u32 %v9480_v40, %v7923_v42  ;;  %v7907_v12 = vld [vmem:[#allocation6 + $0x58] sm:$0xf0]  ;;  %v9695_v10 = vld [vmem:[#allocation6 + $0x724] sm:$0xf]  ;;  %v8779_v21 = vld [vmem:[#allocation6 + $0x730] sm:$0xf0] }
 0x2b2   :  { %v3704_v61 = vmax.f32 %v3693_v9, 0.0  ;;  %v9550_v9 = vld [vmem:[#allocation6 + $0x294] sm:$0xf0]  ;;  %v7910_v15 = vor.u32 %v9476_v37, %v7907_v12  ;;  %v8737_v40 = vld [vmem:[#allocation6 + $0x6c8] sm:$0xf] }
 0x2b3   :  { %5510 = vmatpush.bf16.msrb.mxu1 %v8034_v26  ;;  %5468 = vmatpush.bf16.msra.mxu2 %v8670_v50  ;;  %v8209_v26 = vld [vmem:[#allocation6 + $0x2a8] sm:$0xf]  ;;  %v9686_v42 = vld [vmem:[#allocation6 + $0x6d4] sm:$0xf0] }
 0x2b4   :  { %5552 = vmatpush.bf16.msra.mxu3 %v8418_v28  ;;  %v8593_v50 = vld [vmem:[#allocation6 + $0x5a8] sm:$0xf]  ;;  %v9650_v28 = vld [vmem:[#allocation6 + $0x5b4] sm:$0xf0]  ;;  %v8210_v31 = vor.u32 %v9554_v18, %v8209_v26  ;;  %v8146_v26 = vor.u32 %v9538_v17, %v8145_v45  ;;  %v8763_v18 = vld [vmem:[#allocation6 + $0x710] sm:$0xf0] }
 0x2b5   :  { %v8594_v34 = vor.u32 %v9650_v28, %v8593_v50  ;;  %v8129_v50 = vld [vmem:[#allocation6 + $0x208] sm:$0xf]  ;;  %v9534_v28 = vld [vmem:[#allocation6 + $0x214] sm:$0xf0] }
 0x2b6   :  { %v8130_v44 = vor.u32 %v9534_v28, %v8129_v50  ;;  %v8721_v37 = vld [vmem:[#allocation6 + $0x6a8] sm:$0xf]  ;;  %v9682_v12 = vld [vmem:[#allocation6 + $0x6b4] sm:$0xf0]  ;;  %v8706_v50 = vor.u32 %v9678_v8, %v8705_v55  ;;  %v8243_v55 = vld [vmem:[#allocation6 + $0x2f8] sm:$0xf0] }
 0x2b7   :  { %v3694_v7 = vpop.f32.mrf.mxu0  ;;  %5511 = vmatpush.bf16.msrb.mxu1 %v8018_v41  ;;  %5469 = vmatpush.bf16.msra.mxu2 %v8654_v47  ;;  %v8577_v41 = vld [vmem:[#allocation6 + $0x588] sm:$0xf]  ;;  %v9582_v17 = vld [vmem:[#allocation6 + $0x394] sm:$0xf0] }
 0x2b8   :  { %v3695_v56 = vadd.f32 %v3694_v7, %v3681_v39  ;;  %5553 = vmatpush.bf16.msra.mxu3 %v8402_v48  ;;  %v8193_v39 = vld [vmem:[#allocation6 + $0x288] sm:$0xf]  ;;  %v8830_v7 = vor.u32 %v9707_v32, %v8827_v33  ;;  %v9703_v48 = vld [vmem:[#allocation6 + $0x764] sm:$0xf]  ;;  %v8578_v51 = vor.u32 %v9646_v43, %v8577_v41  ;;  %v9468_v32 = vld [vmem:[#allocation6 + $0xc] sm:$0xf] }
 0x2b9   :  { %v8194_v47 = vor.u32 %v9550_v9, %v8193_v39  ;;  %v8814_v62 = vor.u32 %v9703_v48, %v8811_v49  ;;  %v7875_v33 = vld [vmem:[#allocation6 + $0x18] sm:$0xf0]  ;;  %v8753_v39 = vld [vmem:[#allocation6 + $0x6e8] sm:$0xf]  ;;  %v9690_v9 = vld [vmem:[#allocation6 + $0x6f4] sm:$0xf0] }
 0x2ba   :  { %v3712_v0 = vmax.f32 %v3695_v56, 0.0  ;;  %v8177_v56 = vld [vmem:[#allocation6 + $0x268] sm:$0xf]  ;;  %v9528_v41 = vld [vmem:[#allocation6 + $0x1ec] sm:$0xf]  ;;  %v7878_v49 = vor.u32 %v9468_v32, %v7875_v33 }
 0x2bb   :  { %5512 = vmatpush.bf16.msrb.mxu1 %v8002_v35  ;;  %5470 = vmatpush.bf16.msra.mxu2 %v8638_v63  ;;  %v8795_v35 = vld [vmem:[#allocation6 + $0x750] sm:$0xf0]  ;;  %v8161_v63 = vld [vmem:[#allocation6 + $0x248] sm:$0xf]  ;;  %v8118_v57 = vor.u32 %v9528_v41, %v8115_v46  ;;  %v9674_v32 = vld [vmem:[#allocation6 + $0x674] sm:$0xf0] }
 0x2bc   :  { %v10128_v5 = vpack.c.bf16 %v3712_v0, %v3704_v61  ;;  %5554 = vmatpush.bf16.msra.mxu3 %v8386_v3  ;;  %v8178_v61 = vor.u32 %v9546_v60, %v8177_v56  ;;  %v9699_v0 = vld [vmem:[#allocation6 + $0x744] sm:$0xf]  ;;  %v9542_v3 = vld [vmem:[#allocation6 + $0x254] sm:$0xf0]  ;;  %v8353_v56 = vld [vmem:[#allocation6 + $0x3c8] sm:$0xf] }
 0x2bd   :  { %v9590_v60 = vld [vmem:[#allocation6 + $0x3d4] sm:$0xf0]  ;;  %v8321_v45 = vld [vmem:[#allocation6 + $0x388] sm:$0xf]  ;;  %v9512_v33 = vld [vmem:[#allocation6 + $0x16c] sm:$0xf] }
 0x2be   :  { %5373 = vmatmul.bf16.vlgmr.msra.gmra.mxu0 %v10128_v5  ;;  %5513 = vmatmul.bf16.vlgmr.msrb.gmra.mxu1 %v10093_v54  ;;  %v8305_v28 = vld [vmem:[#allocation6 + $0x368] sm:$0xf] }
 0x2bf   :  { %5477 = vmatpush.bf16.msra.mxu0 %v8878_v6  ;;  %5519 = vmatpush.bf16.msrb.mxu2 %v8242_v11  ;;  %v8545_v6 = vld [vmem:[#allocation6 + $0x548] sm:$0xf]  ;;  %v9638_v11 = vld [vmem:[#allocation6 + $0x554] sm:$0xf0] }
 0x2c0   :  { %5561 = vmatpush.bf16.msra.mxu1 %v8626_v13  ;;  %5603 = vmatpush.bf16.msrb.mxu3 %v7990_v14  ;;  %v8798_v13 = vor.u32 %v9699_v0, %v8795_v35  ;;  %v8162_v14 = vor.u32 %v9542_v3, %v8161_v63  ;;  %v8546_v30 = vor.u32 %v9638_v11, %v8545_v6  ;;  %v9620_v0 = vld [vmem:[#allocation6 + $0x4cc] sm:$0xf]  ;;  %v8483_v35 = vld [vmem:[#allocation6 + $0x4d8] sm:$0xf0]  ;;  %v8337_v63 = vld [vmem:[#allocation6 + $0x3a8] sm:$0xf] }
 0x2c1   :  { %5555 = vmatmul.bf16.vlgmr.msra.gmra.mxu3 %v10105_v23  ;;  %5471 = vmatmul.bf16.vlgmr.msra.gmra.mxu2 %v10121_v27  ;;  %v9586_v3 = vld [vmem:[#allocation6 + $0x3b4] sm:$0xf0]  ;;  %v8486_v11 = vor.u32 %v9620_v0, %v8483_v35  ;;  %v9504_v35 = vld [vmem:[#allocation6 + $0x12c] sm:$0xf] }
 0x2c2   :  { %v9666_v0 = vld [vmem:[#allocation6 + $0x634] sm:$0xf0] }
 0x2c3   :  { %5478 = vmatpush.bf16.msra.mxu0 %v8862_v16  ;;  %5520 = vmatpush.bf16.msrb.mxu2 %v8226_v20  ;;  %v8529_v16 = vld [vmem:[#allocation6 + $0x528] sm:$0xf]  ;;  %v9634_v20 = vld [vmem:[#allocation6 + $0x534] sm:$0xf0] }
 0x2c4   :  { %5562 = vmatpush.bf16.msra.mxu1 %v8610_v24  ;;  %5604 = vmatpush.bf16.msrb.mxu3 %v7974_v25  ;;  %v9691_v24 = vld [vmem:[#allocation6 + $0x704] sm:$0xf]  ;;  %v8782_v25 = vor.u32 %v9695_v10, %v8779_v21  ;;  %v8530_v22 = vor.u32 %v9634_v20, %v8529_v16  ;;  %v9616_v10 = vld [vmem:[#allocation6 + $0x4ac] sm:$0xf]  ;;  %v8467_v21 = vld [vmem:[#allocation6 + $0x4b8] sm:$0xf0] }
 0x2c5   :  { %v8766_v43 = vor.u32 %v9691_v24, %v8763_v18  ;;  %v8470_v20 = vor.u32 %v9616_v10, %v8467_v21  ;;  %v9516_v24 = vld [vmem:[#allocation6 + $0x18c] sm:$0xf]  ;;  %v8451_v18 = vld [vmem:[#allocation6 + $0x498] sm:$0xf0]  ;;  %v9662_v10 = vld [vmem:[#allocation6 + $0x614] sm:$0xf0] }
 0x2c6   :  { %v9500_v21 = vld [vmem:[#allocation6 + $0x10c] sm:$0xf] }
 0x2c7   :  { %5479 = vmatpush.bf16.msra.mxu0 %v8846_v29  ;;  %5521 = vmatpush.bf16.msrb.mxu2 %v8210_v31  ;;  %v8513_v29 = vld [vmem:[#allocation6 + $0x508] sm:$0xf]  ;;  %v9630_v31 = vld [vmem:[#allocation6 + $0x514] sm:$0xf0] }
 0x2c8   :  { %5563 = vmatpush.bf16.msra.mxu1 %v8594_v34  ;;  %5605 = vmatpush.bf16.msrb.mxu3 %v7958_v36  ;;  %v8369_v34 = vld [vmem:[#allocation6 + $0x3e8] sm:$0xf]  ;;  %v9594_v36 = vld [vmem:[#allocation6 + $0x3f4] sm:$0xf0]  ;;  %v8514_v48 = vor.u32 %v9630_v31, %v8513_v29 }
 0x2c9   :  { %v8689_v31 = vld [vmem:[#allocation6 + $0x668] sm:$0xf] }
 0x2ca   :  { %v8690_v41 = vor.u32 %v9674_v32, %v8689_v31  ;;  %v9556_v31 = vld [vmem:[#allocation6 + $0x2cc] sm:$0xf]  ;;  %v8227_v32 = vld [vmem:[#allocation6 + $0x2d8] sm:$0xf0] }
 0x2cb   :  { %5480 = vmatpush.bf16.msra.mxu0 %v8830_v7  ;;  %5522 = vmatpush.bf16.msrb.mxu2 %v8194_v47  ;;  %v9624_v7 = vld [vmem:[#allocation6 + $0x4ec] sm:$0xf]  ;;  %v8499_v47 = vld [vmem:[#allocation6 + $0x4f8] sm:$0xf0] }
 0x2cc   :  { %5564 = vmatpush.bf16.msra.mxu1 %v8578_v51  ;;  %5606 = vmatpush.bf16.msrb.mxu3 %v7942_v53  ;;  %v8370_v51 = vor.u32 %v9594_v36, %v8369_v34  ;;  %v8754_v53 = vor.u32 %v9690_v9, %v8753_v39  ;;  %v8502_v59 = vor.u32 %v9624_v7, %v8499_v47  ;;  %v8051_v34 = vld [vmem:[#allocation6 + $0x178] sm:$0xf0]  ;;  %v9608_v36 = vld [vmem:[#allocation6 + $0x46c] sm:$0xf]  ;;  %v8673_v47 = vld [vmem:[#allocation6 + $0x648] sm:$0xf] }
 0x2cd   :  { %v8435_v39 = vld [vmem:[#allocation6 + $0x478] sm:$0xf0]  ;;  %v8054_v46 = vor.u32 %v9512_v33, %v8051_v34  ;;  %v9652_v33 = vld [vmem:[#allocation6 + $0x5cc] sm:$0xf] }
 0x2ce   :  { %5429 = vmatmul.bf16.vlgmr.msrb.gmra.mxu0 %v10101_v19  ;;  %v8438_v7 = vor.u32 %v9608_v36, %v8435_v39  ;;  %v8611_v34 = vld [vmem:[#allocation6 + $0x5d8] sm:$0xf0]  ;;  %v8230_v39 = vor.u32 %v9556_v31, %v8227_v32  ;;  %v9592_v31 = vld [vmem:[#allocation6 + $0x3ec] sm:$0xf] }
 0x2cf   :  { %5481 = vmatpush.bf16.msra.mxu0 %v8814_v62  ;;  %5523 = vmatpush.bf16.msrb.mxu2 %v8178_v61  ;;  %v9524_v62 = vld [vmem:[#allocation6 + $0x1cc] sm:$0xf]  ;;  %v8099_v61 = vld [vmem:[#allocation6 + $0x1d8] sm:$0xf0] }
 0x2d0   :  { %5565 = vmatpush.bf16.msra.mxu1 %v8562_v2  ;;  %5607 = vmatpush.bf16.msrb.mxu3 %v7926_v1  ;;  %v8354_v2 = vor.u32 %v9590_v60, %v8353_v56  ;;  %v8738_v1 = vor.u32 %v9686_v42, %v8737_v40  ;;  %v8102_v6 = vor.u32 %v9524_v62, %v8099_v61  ;;  %v8419_v56 = vld [vmem:[#allocation6 + $0x458] sm:$0xf0]  ;;  %v9570_v40 = vld [vmem:[#allocation6 + $0x334] sm:$0xf0]  ;;  %v8657_v61 = vld [vmem:[#allocation6 + $0x628] sm:$0xf] }
 0x2d1   :  { %v8371_v32 = vld [vmem:[#allocation6 + $0x3f8] sm:$0xf0] }
 0x2d3   :  { %5482 = vmatpush.bf16.msra.mxu0 %v8798_v13  ;;  %5524 = vmatpush.bf16.msrb.mxu2 %v8162_v14  ;;  %v9520_v13 = vld [vmem:[#allocation6 + $0x1ac] sm:$0xf]  ;;  %v8083_v14 = vld [vmem:[#allocation6 + $0x1b8] sm:$0xf0] }
 0x2d4   :  { %5566 = vmatpush.bf16.msra.mxu1 %v8546_v30  ;;  %5608 = vmatpush.bf16.msrb.mxu3 %v7910_v15  ;;  %v8338_v30 = vor.u32 %v9586_v3, %v8337_v63  ;;  %v8722_v15 = vor.u32 %v9682_v12, %v8721_v37  ;;  %v8086_v16 = vor.u32 %v9520_v13, %v8083_v14  ;;  %v8403_v63 = vld [vmem:[#allocation6 + $0x438] sm:$0xf0]  ;;  %v9566_v37 = vld [vmem:[#allocation6 + $0x314] sm:$0xf0]  ;;  %v8641_v12 = vld [vmem:[#allocation6 + $0x608] sm:$0xf] }
 0x2d7   :  { %5483 = vmatpush.bf16.msra.mxu0 %v8782_v25  ;;  %5525 = vmatpush.bf16.msrb.mxu2 %v8146_v26  ;;  %v8067_v25 = vld [vmem:[#allocation6 + $0x198] sm:$0xf0]  ;;  %v9612_v26 = vld [vmem:[#allocation6 + $0x48c] sm:$0xf] }
 0x2d8   :  { %5567 = vmatpush.bf16.msra.mxu1 %v8530_v22  ;;  %5609 = vmatpush.bf16.msrb.mxu3 %v7894_v4  ;;  %v9578_v22 = vld [vmem:[#allocation6 + $0x374] sm:$0xf0]  ;;  %v8070_v4 = vor.u32 %v9516_v24, %v8067_v25  ;;  %v8454_v29 = vor.u32 %v9612_v26, %v8451_v18  ;;  %v8642_v24 = vor.u32 %v9662_v10, %v8641_v12  ;;  %v9656_v25 = vld [vmem:[#allocation6 + $0x5ec] sm:$0xf]  ;;  %v8627_v26 = vld [vmem:[#allocation6 + $0x5f8] sm:$0xf0] }
 0x2d9   :  { %v8306_v9 = vor.u32 %v9578_v22, %v8305_v28  ;;  %v8865_v22 = vld [vmem:[#allocation6 + $0x7c8] sm:$0xf]  ;;  %v9540_v12 = vld [vmem:[#allocation6 + $0x24c] sm:$0xf]  ;;  %v8547_v10 = vld [vmem:[#allocation6 + $0x558] sm:$0xf0] }
 0x2db   :  { %5484 = vmatpush.bf16.msra.mxu0 %v8766_v43  ;;  %5526 = vmatpush.bf16.msrb.mxu2 %v8130_v44  ;;  %v8289_v43 = vld [vmem:[#allocation6 + $0x348] sm:$0xf]  ;;  %v9574_v44 = vld [vmem:[#allocation6 + $0x354] sm:$0xf0] }
 0x2dc   :  { %5568 = vmatpush.bf16.msra.mxu1 %v8514_v48  ;;  %5610 = vmatpush.bf16.msrb.mxu3 %v7878_v49  ;;  %v9670_v48 = vld [vmem:[#allocation6 + $0x654] sm:$0xf0]  ;;  %v9508_v49 = vld [vmem:[#allocation6 + $0x14c] sm:$0xf]  ;;  %v8290_v60 = vor.u32 %v9574_v44, %v8289_v43 }
 0x2dd   :  { %v9714_v43 = vld [vmem:[#allocation6 + $0x7b4] sm:$0xf0]  ;;  %v9552_v44 = vld [vmem:[#allocation6 + $0x2ac] sm:$0xf] }
 0x2de   :  { %5527 = vmatmul.bf16.vlgmr.msrb.gmra.mxu2 %v10096_v38  ;;  %5485 = vmatmul.bf16.vlgmr.msra.gmra.mxu0 %v10128_v5 }
 0x2df   :  { %5533 = vmatpush.bf16.msrb.mxu0 %v8370_v51  ;;  %5575 = vmatpush.bf16.msra.mxu2 %v8754_v53  ;;  %v8035_v51 = vld [vmem:[#allocation6 + $0x158] sm:$0xf0]  ;;  %v9604_v53 = vld [vmem:[#allocation6 + $0x44c] sm:$0xf] }
 0x2e0   :  { %5617 = vmatpush.bf16.msrb.mxu1 %v8118_v57  ;;  %5659 = vmatpush.bf16.msra.mxu3 %v8502_v59  ;;  %v8674_v57 = vor.u32 %v9670_v48, %v8673_v47  ;;  %v8273_v59 = vld [vmem:[#allocation6 + $0x328] sm:$0xf]  ;;  %v8038_v42 = vor.u32 %v9508_v49, %v8035_v51  ;;  %v8422_v62 = vor.u32 %v9604_v53, %v8419_v56  ;;  %v8595_v47 = vld [vmem:[#allocation6 + $0x5b8] sm:$0xf0]  ;;  %v9710_v56 = vld [vmem:[#allocation6 + $0x794] sm:$0xf0] }
 0x2e1   :  { %5569 = vmatmul.bf16.vlgmr.msra.gmra.mxu1 %v10110_v58  ;;  %5611 = vmatmul.bf16.vlgmr.msrb.gmra.mxu3 %v10085_v52  ;;  %v8322_v52 = vor.u32 %v9582_v17, %v8321_v45  ;;  %v8274_v3 = vor.u32 %v9570_v40, %v8273_v59  ;;  %v8387_v45 = vld [vmem:[#allocation6 + $0x418] sm:$0xf0]  ;;  %v8881_v17 = vld [vmem:[#allocation6 + $0x7e8] sm:$0xf]  ;;  %v9644_v59 = vld [vmem:[#allocation6 + $0x58c] sm:$0xf] }
 0x2e2   :  { %v8833_v51 = vld [vmem:[#allocation6 + $0x788] sm:$0xf]  ;;  %v8579_v40 = vld [vmem:[#allocation6 + $0x598] sm:$0xf0] }
 0x2e3   :  { %5534 = vmatpush.bf16.msrb.mxu0 %v8354_v2  ;;  %5576 = vmatpush.bf16.msra.mxu2 %v8738_v1  ;;  %v8019_v2 = vld [vmem:[#allocation6 + $0x138] sm:$0xf0]  ;;  %v9600_v1 = vld [vmem:[#allocation6 + $0x42c] sm:$0xf] }
 0x2e4   :  { %5618 = vmatpush.bf16.msrb.mxu1 %v8102_v6  ;;  %5660 = vmatpush.bf16.msra.mxu3 %v8486_v11  ;;  %v8658_v6 = vor.u32 %v9666_v0, %v8657_v61  ;;  %v8257_v11 = vld [vmem:[#allocation6 + $0x308] sm:$0xf]  ;;  %v8022_v13 = vor.u32 %v9504_v35, %v8019_v2  ;;  %v8406_v14 = vor.u32 %v9600_v1, %v8403_v63  ;;  %v9544_v0 = vld [vmem:[#allocation6 + $0x26c] sm:$0xf]  ;;  %v8179_v35 = vld [vmem:[#allocation6 + $0x278] sm:$0xf0] }
 0x2e5   :  { %v8258_v8 = vor.u32 %v9566_v37, %v8257_v11  ;;  %v8582_v61 = vor.u32 %v9644_v59, %v8579_v40  ;;  %v9640_v2 = vld [vmem:[#allocation6 + $0x56c] sm:$0xf]  ;;  %v8563_v1 = vld [vmem:[#allocation6 + $0x578] sm:$0xf0]  ;;  %v9702_v37 = vld [vmem:[#allocation6 + $0x754] sm:$0xf0] }
 0x2e6   :  { %v8566_v11 = vor.u32 %v9640_v2, %v8563_v1  ;;  %v9727_v59 = vld [vmem:[%s10282_s7 + $0x20] sm:$0xff]  ;;  %v9680_v40 = vld [vmem:[#allocation6 + $0x6ac] sm:$0xf]  ;;  %v8707_v1 = vld [vmem:[#allocation6 + $0x698] sm:$0xf0] }
 0x2e7   :  { %5535 = vmatpush.bf16.msrb.mxu0 %v8338_v30  ;;  %5577 = vmatpush.bf16.msra.mxu2 %v8722_v15  ;;  %v8003_v30 = vld [vmem:[#allocation6 + $0x118] sm:$0xf0]  ;;  %v9596_v15 = vld [vmem:[#allocation6 + $0x40c] sm:$0xf] }
 0x2e8   :  { %5619 = vmatpush.bf16.msrb.mxu1 %v8086_v16  ;;  %5661 = vmatpush.bf16.msra.mxu3 %v8470_v20  ;;  %v9722_v16 = vld [vmem:[#allocation6 + $0x7f4] sm:$0xf0]  ;;  %v9560_v20 = vld [vmem:[#allocation6 + $0x2ec] sm:$0xf]  ;;  %v8006_v18 = vor.u32 %v9500_v21, %v8003_v30 }
 0x2e9   :  { %v8246_v28 = vor.u32 %v9560_v20, %v8243_v55  ;;  %v8147_v20 = vld [vmem:[#allocation6 + $0x238] sm:$0xf0]  ;;  %v9632_v55 = vld [vmem:[#allocation6 + $0x52c] sm:$0xf] }
 0x2ea   :  { %v9676_v2 = vld [vmem:[#allocation6 + $0x68c] sm:$0xf] }
 0x2eb   :  { %5536 = vmatpush.bf16.msrb.mxu0 %v8322_v52  ;;  %5578 = vmatpush.bf16.msra.mxu2 %v8706_v50  ;;  %v8390_v52 = vor.u32 %v9596_v15, %v8387_v45  ;;  %v8882_v50 = vor.u32 %v9722_v16, %v8881_v17  ;;  %v8785_v15 = vld [vmem:[#allocation6 + $0x728] sm:$0xf]  ;;  %v9698_v17 = vld [vmem:[#allocation6 + $0x734] sm:$0xf0]  ;;  %v9536_v16 = vld [vmem:[#allocation6 + $0x22c] sm:$0xf] }
 0x2ec   :  { %5620 = vmatpush.bf16.msrb.mxu1 %v8070_v4  ;;  %5662 = vmatpush.bf16.msra.mxu3 %v8454_v29  ;;  %v8630_v4 = vor.u32 %v9656_v25, %v8627_v26  ;;  %v9718_v29 = vld [vmem:[#allocation6 + $0x7d4] sm:$0xf0]  ;;  %v8786_v25 = vor.u32 %v9698_v17, %v8785_v15  ;;  %v8150_v26 = vor.u32 %v9536_v16, %v8147_v20  ;;  %v8291_v15 = vld [vmem:[#allocation6 + $0x358] sm:$0xf0]  ;;  %v9668_v17 = vld [vmem:[#allocation6 + $0x64c] sm:$0xf]  ;;  %v5318_v20 = vpop.f32.mrf.mxu0 }
 0x2ed   :  { %v8866_v36 = vor.u32 %v9718_v29, %v8865_v22  ;;  %v8131_v22 = vld [vmem:[#allocation6 + $0x218] sm:$0xf0] }
 0x2ee   :  { %v8515_v29 = vld [vmem:[#allocation6 + $0x518] sm:$0xf0] }
 0x2ef   :  { %5537 = vmatpush.bf16.msrb.mxu0 %v8306_v9  ;;  %5579 = vmatpush.bf16.msra.mxu2 %v8690_v41  ;;  %v8849_v9 = vld [vmem:[#allocation6 + $0x7a8] sm:$0xf]  ;;  %v8614_v41 = vor.u32 %v9652_v33, %v8611_v34  ;;  %v9729_v33 = vld [vmem:[%s10282_s7 + $0x30] sm:$0xff]  ;;  %v9688_v34 = vld [vmem:[#allocation6 + $0x6ec] sm:$0xf] }
 0x2f0   :  { %5621 = vmatpush.bf16.msrb.mxu1 %v8054_v46  ;;  %5663 = vmatpush.bf16.msra.mxu3 %v8438_v7  ;;  %v8211_v46 = vld [vmem:[#allocation6 + $0x2b8] sm:$0xf0]  ;;  %v9648_v7 = vld [vmem:[#allocation6 + $0x5ac] sm:$0xf]  ;;  %v8850_v48 = vor.u32 %v9714_v43, %v8849_v9  ;;  %v8374_v43 = vor.u32 %v9592_v31, %v8371_v32 }
 0x2f1   :  { %v8214_v49 = vor.u32 %v9552_v44, %v8211_v46  ;;  %v8598_v53 = vor.u32 %v9648_v7, %v8595_v47  ;;  %v9588_v46 = vld [vmem:[#allocation6 + $0x3cc] sm:$0xf]  ;;  %v8355_v7 = vld [vmem:[#allocation6 + $0x3d8] sm:$0xf0] }
 0x2f2   :  { %v9728_v47 = vld [vmem:[%s10282_s7 + $0x28] sm:$0xff]  ;;  %v8675_v16 = vld [vmem:[#allocation6 + $0x658] sm:$0xf0] }
 0x2f3   :  { %5538 = vmatpush.bf16.msrb.mxu0 %v8290_v60  ;;  %5580 = vmatpush.bf16.msra.mxu2 %v8674_v57  ;;  %v9548_v60 = vld [vmem:[#allocation6 + $0x28c] sm:$0xf]  ;;  %v8195_v57 = vld [vmem:[#allocation6 + $0x298] sm:$0xf0] }
 0x2f4   :  { %5622 = vmatpush.bf16.msrb.mxu1 %v8038_v42  ;;  %5664 = vmatpush.bf16.msra.mxu3 %v8422_v62  ;;  %v8834_v42 = vor.u32 %v9710_v56, %v8833_v51  ;;  %v8817_v62 = vld [vmem:[#allocation6 + $0x768] sm:$0xf]  ;;  %v10152_v51 = vpop.f32.mrf.mxu3 }
 0x2f7   :  { %5539 = vmatpush.bf16.msrb.mxu0 %v8274_v3  ;;  %5581 = vmatpush.bf16.msra.mxu2 %v8658_v6  ;;  %v8182_v3 = vor.u32 %v9544_v0, %v8179_v35  ;;  %v8801_v6 = vld [vmem:[#allocation6 + $0x748] sm:$0xf]  ;;  %v8323_v0 = vld [vmem:[#allocation6 + $0x398] sm:$0xf0] }
 0x2f8   :  { %5623 = vmatpush.bf16.msrb.mxu1 %v8022_v13  ;;  %5665 = vmatpush.bf16.msra.mxu3 %v8406_v14  ;;  %v8163_v13 = vld [vmem:[#allocation6 + $0x258] sm:$0xf0]  ;;  %v9636_v14 = vld [vmem:[#allocation6 + $0x54c] sm:$0xf]  ;;  %v8802_v21 = vor.u32 %v9702_v37, %v8801_v6  ;;  %v9725_v37 = vld [vmem:[%s10282_s7 + $0x10] sm:$0xff] }
 0x2f9   :  { %v8166_v30 = vor.u32 %v9540_v12, %v8163_v13  ;;  %v8550_v45 = vor.u32 %v9636_v14, %v8547_v10  ;;  %v9726_v35 = vld [vmem:[%s10282_s7 + $0x18] sm:$0xff]  ;;  %v9576_v6 = vld [vmem:[#allocation6 + $0x36c] sm:$0xf] }
 0x2fa   :  { %v9672_v12 = vld [vmem:[#allocation6 + $0x66c] sm:$0xf]  ;;  %v8691_v13 = vld [vmem:[#allocation6 + $0x678] sm:$0xf0] }
 0x2fb   :  { %5540 = vmatpush.bf16.msrb.mxu0 %v8258_v8  ;;  %5582 = vmatpush.bf16.msra.mxu2 %v8642_v24  ;;  %v8531_v8 = vld [vmem:[#allocation6 + $0x538] sm:$0xf0] }
 0x2fc   :  { %5624 = vmatpush.bf16.msrb.mxu1 %v8006_v18  ;;  %5666 = vmatpush.bf16.msra.mxu3 %v8390_v52  ;;  %v9730_v24 = vld [vmem:[%s10282_s7 + $0x38] sm:$0xff]  ;;  %v8769_v18 = vld [vmem:[#allocation6 + $0x708] sm:$0xf] }
 0x2fd   :  { %v9694_v52 = vld [vmem:[#allocation6 + $0x714] sm:$0xf0] }
 0x2fe   :  { %5541 = vmatmul.bf16.vlgmr.msrb.gmra.mxu0 %v10101_v19  ;;  %5583 = vmatmul.bf16.vlgmr.msra.gmra.mxu2 %v10121_v27 }
 0x2ff   :  { %5589 = vmatpush.bf16.msra.mxu0 %v8882_v50  ;;  %5631 = vmatpush.bf16.msrb.mxu2 %v8246_v28  ;;  %v9532_v50 = vld [vmem:[#allocation6 + $0x20c] sm:$0xf]  ;;  %v8534_v28 = vor.u32 %v9632_v55, %v8531_v8 }
 0x300   :  { %5673 = vmatpush.bf16.msra.mxu1 %v8630_v4  ;;  %5667 = vmatmul.bf16.vlgmr.msra.gmra.mxu3 %v10105_v23  ;;  %v9706_v23 = vld [vmem:[#allocation6 + $0x774] sm:$0xf0]  ;;  %v9628_v4 = vld [vmem:[#allocation6 + $0x50c] sm:$0xf]  ;;  %v8134_v9 = vor.u32 %v9532_v50, %v8131_v22  ;;  %v10181_v22 = vld [vmem:[%s10281_s6] sm:$0xf] }
 0x301   :  { %5625 = vmatmul.bf16.vlgmr.msrb.gmra.mxu1 %v10093_v54  ;;  %v8198_v54 = vor.u32 %v9548_v60, %v8195_v57  ;;  %v8818_v63 = vor.u32 %v9706_v23, %v8817_v62  ;;  %5987 = vmatpush.bf16.msrb.mxu3 %v9730_v24  ;;  %v9584_v60 = vld [vmem:[#allocation6 + $0x3ac] sm:$0xf]  ;;  %v8339_v57 = vld [vmem:[#allocation6 + $0x3b8] sm:$0xf0] }
 0x302   :  { %v8342_v62 = vor.u32 %v9584_v60, %v8339_v57  ;;  %v9580_v23 = vld [vmem:[#allocation6 + $0x38c] sm:$0xf] }
 0x303   :  { %5590 = vmatpush.bf16.msra.mxu0 %v8866_v36  ;;  %5632 = vmatpush.bf16.msrb.mxu2 %v8230_v39  ;;  %v8755_v36 = vld [vmem:[#allocation6 + $0x6f8] sm:$0xf0]  ;;  %v8770_v39 = vor.u32 %v9694_v52, %v8769_v18  ;;  %v9723_v52 = vld [vmem:[%s10282_s7] sm:$0xff]  ;;  %v9664_v50 = vld [vmem:[#allocation6 + $0x62c] sm:$0xf] }
 0x304   :  { %5674 = vmatpush.bf16.msra.mxu1 %v8614_v41  ;;  %v8518_v41 = vor.u32 %v9628_v4, %v8515_v29  ;;  %v8758_v44 = vor.u32 %v9688_v34, %v8755_v36  ;;  %v8275_v18 = vld [vmem:[#allocation6 + $0x338] sm:$0xf0]  ;;  %v9564_v29 = vld [vmem:[#allocation6 + $0x30c] sm:$0xf] }
 0x305   :  { %5988 = vmatpush.bf16.msrb.mxu3 %v9729_v33  ;;  %v8259_v33 = vld [vmem:[#allocation6 + $0x318] sm:$0xf0]  ;;  %v9660_v34 = vld [vmem:[#allocation6 + $0x60c] sm:$0xf] }
 0x306   :  { %v9738_v36 = vld [vmem:[%s10282_s7 + $0x78] sm:$0xff] }
 0x307   :  { %5591 = vmatpush.bf16.msra.mxu0 %v8850_v48  ;;  %5633 = vmatpush.bf16.msrb.mxu2 %v8214_v49  ;;  %v9684_v48 = vld [vmem:[#allocation6 + $0x6cc] sm:$0xf]  ;;  %v8739_v49 = vld [vmem:[#allocation6 + $0x6d8] sm:$0xf0] }
 0x308   :  { %5675 = vmatpush.bf16.msra.mxu1 %v8598_v53  ;;  %v8358_v53 = vor.u32 %v9588_v46, %v8355_v7  ;;  %v8742_v56 = vor.u32 %v9684_v48, %v8739_v49  ;;  %v9737_v48 = vld [vmem:[%s10282_s7 + $0x70] sm:$0xff]  ;;  %v5320_v49 = vpop.f32.mrf.mxu0 }
 0x309   :  { %5989 = vmatpush.bf16.msrb.mxu3 %v9728_v47 }
 0x30b   :  { %5592 = vmatpush.bf16.msra.mxu0 %v8834_v42  ;;  %5634 = vmatpush.bf16.msrb.mxu2 %v8198_v54  ;;  %v8723_v42 = vld [vmem:[#allocation6 + $0x6b8] sm:$0xf0]  ;;  %v10159_v54 = vpop.f32.mrf.mxu1 }
 0x30c   :  { %5676 = vmatpush.bf16.msra.mxu1 %v8582_v61  ;;  %v8726_v61 = vor.u32 %v9680_v40, %v8723_v42 }
 0x30d   :  { %5990 = vmatpush.bf16.msrb.mxu3 %v9727_v59 }
 0x30f   :  { %5593 = vmatpush.bf16.msra.mxu0 %v8818_v63  ;;  %5635 = vmatpush.bf16.msrb.mxu2 %v8182_v3  ;;  %v8326_v63 = vor.u32 %v9580_v23, %v8323_v0  ;;  %v10167_v3 = vpop.f32.mrf.mxu3  ;;  %v8851_v23 = vld [vmem:[#allocation6 + $0x7b8] sm:$0xf0] }
 0x310   :  { %5677 = vmatpush.bf16.msra.mxu1 %v8566_v11  ;;  %v8307_v11 = vld [vmem:[#allocation6 + $0x378] sm:$0xf0] }
 0x311   :  { %5991 = vmatpush.bf16.msrb.mxu3 %v9726_v35  ;;  %v8310_v14 = vor.u32 %v9576_v6, %v8307_v11  ;;  %v8835_v6 = vld [vmem:[#allocation6 + $0x798] sm:$0xf0] }
 0x313   :  { %5594 = vmatpush.bf16.msra.mxu0 %v8802_v21  ;;  %5636 = vmatpush.bf16.msrb.mxu2 %v8166_v30  ;;  %v5292_v10 = vpop.f32.mrf.mxu1  ;;  %v8694_v21 = vor.u32 %v9672_v12, %v8691_v13  ;;  %v9572_v30 = vld [vmem:[#allocation6 + $0x34c] sm:$0xf] }
 0x314   :  { %5678 = vmatpush.bf16.msra.mxu1 %v8550_v45  ;;  %v9724_v45 = vld [vmem:[%s10282_s7 + $0x8] sm:$0xff]  ;;  %v8294_v55 = vor.u32 %v9572_v30, %v8291_v15 }
 0x315   :  { %5992 = vmatpush.bf16.msrb.mxu3 %v9725_v37 }
 0x317   :  { %5595 = vmatpush.bf16.msra.mxu0 %v8786_v25  ;;  %5637 = vmatpush.bf16.msrb.mxu2 %v8150_v26  ;;  %v5332_v24 = vpop.f32.mrf.mxu3  ;;  %v8678_v25 = vor.u32 %v9668_v17, %v8675_v16  ;;  %v9568_v26 = vld [vmem:[#allocation6 + $0x32c] sm:$0xf] }
 0x318   :  { %5679 = vmatpush.bf16.msra.mxu1 %v8534_v28  ;;  %v8659_v28 = vld [vmem:[#allocation6 + $0x638] sm:$0xf0]  ;;  %v8278_v4 = vor.u32 %v9568_v26, %v8275_v18 }
 0x319   :  { %5993 = vmatpush.bf16.msrb.mxu3 %v9724_v45  ;;  %v8662_v32 = vor.u32 %v9664_v50, %v8659_v28  ;;  %v9733_v45 = vld [vmem:[%s10282_s7 + $0x50] sm:$0xff] }
 0x31b   :  { %5596 = vmatpush.bf16.msra.mxu0 %v8770_v39  ;;  %5638 = vmatpush.bf16.msrb.mxu2 %v8134_v9  ;;  %v5346_v31 = vpop.f32.mrf.mxu1  ;;  %v8643_v39 = vld [vmem:[#allocation6 + $0x618] sm:$0xf0]  ;;  %v9720_v9 = vld [vmem:[#allocation6 + $0x7ec] sm:$0xf] }
 0x31c   :  { %5680 = vmatpush.bf16.msra.mxu1 %v8518_v41  ;;  %v8883_v41 = vld [vmem:[#allocation6 + $0x7f8] sm:$0xf0]  ;;  %v8646_v7 = vor.u32 %v9660_v34, %v8643_v39 }
 0x31d   :  { %5994 = vmatpush.bf16.msrb.mxu3 %v9723_v52  ;;  %v8886_v47 = vor.u32 %v9720_v9, %v8883_v41  ;;  %v9692_v9 = vld [vmem:[#allocation6 + $0x70c] sm:$0xf]  ;;  %v8771_v41 = vld [vmem:[#allocation6 + $0x718] sm:$0xf0] }
 0x31e   :  { %5597 = vmatmul.bf16.vlgmr.msra.gmra.mxu0 %v10128_v5  ;;  %5639 = vmatmul.bf16.vlgmr.msrb.gmra.mxu2 %v10096_v38  ;;  %v10165_v38 = vpop.f32.mrf.mxu2 }
 0x31f   :  { %5645 = vmatpush.bf16.msrb.mxu0 %v8374_v43  ;;  %5687 = vmatpush.bf16.msra.mxu2 %v8758_v44  ;;  %v3979_v43 = vperm.slane %v10181_v22, 0  ;;  %v8262_v44 = vor.u32 %v9564_v29, %v8259_v33  ;;  %v5334_v57 = vpop.f32.mrf.mxu3  ;;  %v9696_v29 = vld [vmem:[#allocation6 + $0x72c] sm:$0xf] }
 0x320   :  { %5681 = vmatmul.bf16.vlgmr.msra.gmra.mxu1 %v10110_v58  ;;  %v8710_v58 = vor.u32 %v9676_v2, %v8707_v1 }
 0x321   :  { %6001 = vmatpush.bf16.msrb.mxu1 %v9738_v36  ;;  %v5277_v60 = vadd.f32 %v10152_v51, %v3979_v43  ;;  %v5279_v59 = vadd.f32 %v10167_v3, %v3979_v43  ;;  %v9731_v36 = vld [vmem:[%s10282_s7 + $0x40] sm:$0xff] }
 0x323   :  { %5646 = vmatpush.bf16.msrb.mxu0 %v8358_v53  ;;  %5688 = vmatpush.bf16.msra.mxu2 %v8742_v56  ;;  %v9716_v53 = vld [vmem:[#allocation6 + $0x7cc] sm:$0xf]  ;;  %v8867_v56 = vld [vmem:[#allocation6 + $0x7d8] sm:$0xf0]  ;;  %v5291_v40 = vadd.f32 %v10159_v54, %v5277_v60  ;;  %v5293_v0 = vadd.f32 %v5292_v10, %v5279_v59  ;;  %v5348_v51 = vpop.f32.mrf.mxu1  ;;  %v9735_v54 = vld [vmem:[%s10282_s7 + $0x60] sm:$0xff] }
 0x324   :  { %v8870_v42 = vor.u32 %v9716_v53, %v8867_v56  ;;  %v9704_v10 = vld [vmem:[#allocation6 + $0x76c] sm:$0xf] }
 0x325   :  { %6002 = vmatpush.bf16.msrb.mxu1 %v9737_v48  ;;  %v5305_v35 = vadd.f32 %v10165_v38, %v5291_v40 }
 0x326   :  { %v5306_v8 = vpop.f32.mrf.mxu2 }
 0x327   :  { %5647 = vmatpush.bf16.msrb.mxu0 %v8342_v62  ;;  %5689 = vmatpush.bf16.msra.mxu2 %v8726_v61  ;;  %v9736_v62 = vld [vmem:[%s10282_s7 + $0x68] sm:$0xff]  ;;  %v5307_v2 = vadd.f32 %v5306_v8, %v5293_v0  ;;  %v5319_v1 = vadd.f32 %v5318_v20, %v5305_v35 }
 0x328   :  { %v9712_v61 = vld [vmem:[#allocation6 + $0x7ac] sm:$0xf] }
 0x329   :  { %6003 = vmatpush.bf16.msrb.mxu1 %v9736_v62  ;;  %v5321_v11 = vadd.f32 %v5320_v49, %v5307_v2  ;;  %v5333_v37 = vadd.f32 %v5332_v24, %v5319_v1  ;;  %v9700_v24 = vld [vmem:[#allocation6 + $0x74c] sm:$0xf] }
 0x32b   :  { %5648 = vmatpush.bf16.msrb.mxu0 %v8326_v63  ;;  %5690 = vmatpush.bf16.msra.mxu2 %v8710_v58  ;;  %v8854_v63 = vor.u32 %v9712_v61, %v8851_v23  ;;  %v9708_v58 = vld [vmem:[#allocation6 + $0x78c] sm:$0xf]  ;;  %v5335_v12 = vadd.f32 %v5334_v57, %v5321_v11  ;;  %v5347_v13 = vadd.f32 %v5346_v31, %v5333_v37  ;;  %v5402_v17 = vpop.f32.mrf.mxu1  ;;  %v8787_v31 = vld [vmem:[#allocation6 + $0x738] sm:$0xf0] }
 0x32c   :  { %v8790_v34 = vor.u32 %v9696_v29, %v8787_v31 }
 0x32d   :  { %6004 = vmatpush.bf16.msrb.mxu1 %v9735_v54  ;;  %v5349_v30 = vadd.f32 %v5348_v51, %v5335_v12 }
 0x32e   :  { %v5360_v46 = vpop.f32.mrf.mxu2 }
 0x32f   :  { %5649 = vmatpush.bf16.msrb.mxu0 %v8310_v14  ;;  %5691 = vmatpush.bf16.msra.mxu2 %v8694_v21  ;;  %v8838_v14 = vor.u32 %v9708_v58, %v8835_v6  ;;  %v8819_v21 = vld [vmem:[#allocation6 + $0x778] sm:$0xf0]  ;;  %v5361_v15 = vadd.f32 %v5360_v46, %v5347_v13  ;;  %v8774_v46 = vor.u32 %v9692_v9, %v8771_v41 }
 0x333   :  { %5650 = vmatpush.bf16.msrb.mxu0 %v8294_v55  ;;  %5692 = vmatpush.bf16.msra.mxu2 %v8678_v25  ;;  %v8822_v55 = vor.u32 %v9704_v10, %v8819_v21  ;;  %v8803_v25 = vld [vmem:[#allocation6 + $0x758] sm:$0xf0]  ;;  %v5404_v43 = vpop.f32.mrf.mxu1 }
 0x334   :  { %v8806_v28 = vor.u32 %v9700_v24, %v8803_v25  ;;  %v9742_v10 = vld [vmem:[%s10282_s7 + $0x98] sm:$0xff] }
 0x336   :  { %v5362_v38 = vpop.f32.mrf.mxu2 }
 0x337   :  { %5651 = vmatpush.bf16.msrb.mxu0 %v8278_v4  ;;  %5693 = vmatpush.bf16.msra.mxu2 %v8662_v32  ;;  %v5363_v16 = vadd.f32 %v5362_v38, %v5349_v30  ;;  %v9732_v4 = vld [vmem:[%s10282_s7 + $0x48] sm:$0xff]  ;;  %v9741_v30 = vld [vmem:[%s10282_s7 + $0x90] sm:$0xff] }
 0x33b   :  { %5652 = vmatpush.bf16.msrb.mxu0 %v8262_v44  ;;  %5694 = vmatpush.bf16.msra.mxu2 %v8646_v7  ;;  %v5374_v3 = vpop.f32.mrf.mxu0  ;;  %v3980_v44 = vperm.slane %v10181_v22, 1  ;;  %v5458_v59 = vpop.f32.mrf.mxu1 }
 0x33c   :  { %v5375_v20 = vadd.f32 %v5374_v3, %v5361_v15 }
 0x33e   :  { %5653 = vmatmul.bf16.vlgmr.msrb.gmra.mxu0 %v10101_v19  ;;  %5695 = vmatmul.bf16.vlgmr.msra.gmra.mxu2 %v10121_v27  ;;  %v5388_v19 = vpop.f32.mrf.mxu3  ;;  %v9734_v27 = vld [vmem:[%s10282_s7 + $0x58] sm:$0xff]  ;;  %v5416_v18 = vpop.f32.mrf.mxu2  ;;  %v5715_v52 = vmax.f32 %v5375_v20, 0.0 }
 0x33f   :  { %5701 = vmatpush.bf16.msra.mxu0 %v8886_v47  ;;  %6005 = vmatpush.bf16.msrb.mxu1 %v9734_v27  ;;  %v5389_v47 = vadd.f32 %v5388_v19, %v3980_v44  ;;  %v9745_v19 = vld [vmem:[%s10282_s7 + $0xb0] sm:$0xff]  ;;  %v9743_v27 = vld [vmem:[%s10282_s7 + $0xa0] sm:$0xff] }
 0x341   :  { %v5403_v53 = vadd.f32 %v5402_v17, %v5389_v47 }
 0x343   :  { %5702 = vmatpush.bf16.msra.mxu0 %v8870_v42  ;;  %v5376_v8 = vpop.f32.mrf.mxu0  ;;  %6006 = vmatpush.bf16.msrb.mxu1 %v9733_v45  ;;  %v5417_v57 = vadd.f32 %v5416_v18, %v5403_v53  ;;  %v5460_v2 = vpop.f32.mrf.mxu1  ;;  %v9740_v45 = vld [vmem:[%s10282_s7 + $0x88] sm:$0xff] }
 0x344   :  { %v5377_v26 = vadd.f32 %v5376_v8, %v5363_v16  ;;  %v9739_v16 = vld [vmem:[%s10282_s7 + $0x80] sm:$0xff]  ;;  %v3981_v8 = vperm.slane %v10181_v22, 2 }
 0x346   :  { %v5719_v50 = vmax.f32 %v5377_v26, 0.0  ;;  %v5390_v32 = vpop.f32.mrf.mxu3  ;;  %v5418_v7 = vpop.f32.mrf.mxu2 }
 0x347   :  { %5703 = vmatpush.bf16.msra.mxu0 %v8854_v63  ;;  %6007 = vmatpush.bf16.msrb.mxu1 %v9732_v4  ;;  %v5391_v49 = vadd.f32 %v5390_v32, %v3980_v44 }
 0x348   :  { %v5723_v33 = vpack.c.bf16 %v5719_v50, %v5715_v52 }
 0x349   :  { %v5405_v60 = vadd.f32 %v5404_v43, %v5391_v49 }
 0x34a   :  { %5995 = vmatmul.bf16.vlgmr.msrb.gmra.mxu3 %v5723_v33 }
 0x34b   :  { %5704 = vmatpush.bf16.msra.mxu0 %v8838_v14  ;;  %v5430_v39 = vpop.f32.mrf.mxu0  ;;  %6008 = vmatpush.bf16.msrb.mxu1 %v9731_v36  ;;  %v5419_v40 = vadd.f32 %v5418_v7, %v5405_v60  ;;  %v9744_v14 = vld [vmem:[%s10282_s7 + $0xa8] sm:$0xff]  ;;  %v5514_v15 = vpop.f32.mrf.mxu1  ;;  %v9754_v60 = vld [vmem:[%s10282_s7 + $0xf8] sm:$0xff] }
 0x34c   :  { %v5431_v42 = vadd.f32 %v5430_v39, %v5417_v57 }
 0x34e   :  { %v5444_v48 = vpop.f32.mrf.mxu3  ;;  %v5472_v61 = vpop.f32.mrf.mxu2 }
 0x34f   :  { %5705 = vmatpush.bf16.msra.mxu0 %v8822_v55  ;;  %v5445_v23 = vadd.f32 %v5444_v48, %v5431_v42 }
 0x351   :  { %v5459_v54 = vadd.f32 %v5458_v59, %v5445_v23  ;;  %v9751_v23 = vld [vmem:[%s10282_s7 + $0xe0] sm:$0xff] }
 0x353   :  { %5706 = vmatpush.bf16.msra.mxu0 %v8806_v28  ;;  %v5432_v56 = vpop.f32.mrf.mxu0  ;;  %v5473_v63 = vadd.f32 %v5472_v61, %v5459_v54  ;;  %v5516_v24 = vpop.f32.mrf.mxu1  ;;  %v9752_v61 = vld [vmem:[%s10282_s7 + $0xe8] sm:$0xff] }
 0x354   :  { %v5433_v62 = vadd.f32 %v5432_v56, %v5419_v40 }
 0x356   :  { %v5446_v0 = vpop.f32.mrf.mxu3  ;;  %v5474_v3 = vpop.f32.mrf.mxu2 }
 0x357   :  { %5707 = vmatpush.bf16.msra.mxu0 %v8790_v34  ;;  %v5447_v35 = vadd.f32 %v5446_v0, %v5433_v62  ;;  %v9753_v62 = vld [vmem:[%s10282_s7 + $0xf0] sm:$0xff]  ;;  %v9750_v0 = vld [vmem:[%s10282_s7 + $0xd8] sm:$0xff] }
 0x359   :  { %v5461_v1 = vadd.f32 %v5460_v2, %v5447_v35  ;;  %v9748_v2 = vld [vmem:[%s10282_s7 + $0xc8] sm:$0xff] }
 0x35b   :  { %5708 = vmatpush.bf16.msra.mxu0 %v8774_v46  ;;  %v5486_v51 = vpop.f32.mrf.mxu0  ;;  %v5475_v6 = vadd.f32 %v5474_v3, %v5461_v1 }
 0x35c   :  { %v5487_v58 = vadd.f32 %v5486_v51, %v5473_v63  ;;  %v9749_v51 = vld [vmem:[%s10282_s7 + $0xd0] sm:$0xff]  ;;  %v9747_v63 = vld [vmem:[%s10282_s7 + $0xc0] sm:$0xff] }
 0x35e   :  { %5709 = vmatmul.bf16.vlgmr.msra.gmra.mxu0 %v10128_v5  ;;  %v9746_v5 = vld [vmem:[%s10282_s7 + $0xb8] sm:$0xff]  ;;  %v5716_v38 = vmax.f32 %v5487_v58, 0.0  ;;  %v5500_v21 = vpop.f32.mrf.mxu3  ;;  %v5570_v29 = vpop.f32.mrf.mxu1 }
 0x35f   :  { %6015 = vmatpush.bf16.msrb.mxu2 %v9746_v5  ;;  %v5501_v26 = vadd.f32 %v5500_v21, %v3981_v8  ;;  %6029 = vmatpush.bf16.msrb.mxu0 %v9754_v60 }
 0x361   :  { %v5528_v17 = vpop.f32.mrf.mxu2  ;;  %v5515_v50 = vadd.f32 %v5514_v15, %v5501_v26 }
 0x363   :  { %v5488_v11 = vpop.f32.mrf.mxu0  ;;  %6016 = vmatpush.bf16.msrb.mxu2 %v9745_v19  ;;  %v5529_v4 = vadd.f32 %v5528_v17, %v5515_v50  ;;  %6030 = vmatpush.bf16.msrb.mxu0 %v9753_v62 }
 0x364   :  { %v5489_v37 = vadd.f32 %v5488_v11, %v5475_v6  ;;  %v3982_v6 = vperm.slane %v10181_v22, 3 }
 0x366   :  { %v5720_v12 = vmax.f32 %v5489_v37, 0.0  ;;  %v5502_v20 = vpop.f32.mrf.mxu3  ;;  %v5572_v46 = vpop.f32.mrf.mxu1 }
 0x367   :  { %6017 = vmatpush.bf16.msrb.mxu2 %v9744_v14  ;;  %v5503_v52 = vadd.f32 %v5502_v20, %v3981_v8  ;;  %6031 = vmatpush.bf16.msrb.mxu0 %v9752_v61 }
 0x368   :  { %v5724_v13 = vpack.c.bf16 %v5720_v12, %v5716_v38 }
 0x369   :  { %v5530_v25 = vpop.f32.mrf.mxu2  ;;  %v5517_v28 = vadd.f32 %v5516_v24, %v5503_v52 }
 0x36a   :  { %6009 = vmatmul.bf16.vlgmr.msrb.gmra.mxu1 %v5724_v13 }
 0x36b   :  { %6018 = vmatpush.bf16.msrb.mxu2 %v9743_v27  ;;  %v5531_v32 = vadd.f32 %v5530_v25, %v5517_v28  ;;  %6032 = vmatpush.bf16.msrb.mxu0 %v9751_v23 }
 0x36e   :  { %v5556_v18 = vpop.f32.mrf.mxu3 }
 0x36f   :  { %6019 = vmatpush.bf16.msrb.mxu2 %v9742_v10  ;;  %6033 = vmatpush.bf16.msrb.mxu0 %v9750_v0 }
 0x373   :  { %6020 = vmatpush.bf16.msrb.mxu2 %v9741_v30  ;;  %6034 = vmatpush.bf16.msrb.mxu0 %v9749_v51 }
 0x376   :  { %v5558_v9 = vpop.f32.mrf.mxu3 }
 0x377   :  { %6021 = vmatpush.bf16.msrb.mxu2 %v9740_v45  ;;  %6035 = vmatpush.bf16.msrb.mxu0 %v9748_v2 }
 0x37b   :  { %6022 = vmatpush.bf16.msrb.mxu2 %v9739_v16  ;;  %v5542_v55 = vpop.f32.mrf.mxu0  ;;  %6036 = vmatpush.bf16.msrb.mxu0 %v9747_v63 }
 0x37c   :  { %v5543_v33 = vadd.f32 %v5542_v55, %v5529_v4 }
 0x37e   :  { %v5557_v39 = vadd.f32 %v5556_v18, %v5543_v33  ;;  %v5612_v35 = vpop.f32.mrf.mxu3  ;;  %v5626_v54 = vpop.f32.mrf.mxu1  ;;  %v9762_v33 = vld [vmem:[%s10283_s8] ss:$0 sm:$0xff] }
 0x37f   :  { %v5613_v37 = vadd.f32 %v5612_v35, %v3982_v6 }
 0x380   :  { %v5571_v44 = vadd.f32 %v5570_v29, %v5557_v39 }
 0x381   :  { %v5584_v34 = vpop.f32.mrf.mxu2  ;;  %v5627_v19 = vadd.f32 %v5626_v54, %v5613_v37 }
 0x382   :  { %v5585_v48 = vadd.f32 %v5584_v34, %v5571_v44 }
 0x383   :  { %v5544_v31 = vpop.f32.mrf.mxu0 }
 0x384   :  { %v5545_v36 = vadd.f32 %v5544_v31, %v5531_v32 }
 0x386   :  { %v5559_v41 = vadd.f32 %v5558_v9, %v5545_v36  ;;  %v5614_v3 = vpop.f32.mrf.mxu3  ;;  %v5628_v5 = vpop.f32.mrf.mxu1 }
 0x387   :  { %v5615_v12 = vadd.f32 %v5614_v3, %v3982_v6 }
 0x388   :  { %v5573_v7 = vadd.f32 %v5572_v46, %v5559_v41 }
 0x389   :  { %v5586_v47 = vpop.f32.mrf.mxu2  ;;  %v5629_v13 = vadd.f32 %v5628_v5, %v5615_v12 }
 0x38a   :  { %v5587_v49 = vadd.f32 %v5586_v47, %v5573_v7 }
 0x38e   :  { %v5668_v38 = vpop.f32.mrf.mxu3 }
 0x396   :  { %v5670_v16 = vpop.f32.mrf.mxu3 }
 0x39b   :  { %v5598_v43 = vpop.f32.mrf.mxu0 }
 0x39c   :  { %v5599_v53 = vadd.f32 %v5598_v43, %v5585_v48 }
 0x39d   :  { %v5682_v27 = vpop.f32.mrf.mxu1 }
 0x39e   :  { %v5717_v59 = vmax.f32 %v5599_v53, 0.0 }
 0x3a1   :  { %v5640_v1 = vpop.f32.mrf.mxu2 }
 0x3a2   :  { %v5641_v14 = vadd.f32 %v5640_v1, %v5627_v19 }
 0x3a3   :  { %v5600_v56 = vpop.f32.mrf.mxu0 }
 0x3a4   :  { %v5601_v57 = vadd.f32 %v5600_v56, %v5587_v49 }
 0x3a5   :  { %v5684_v22 = vpop.f32.mrf.mxu1 }
 0x3a6   :  { %v5721_v40 = vmax.f32 %v5601_v57, 0.0 }
 0x3a8   :  { %v5725_v42 = vpack.c.bf16 %v5721_v40, %v5717_v59 }
 0x3a9   :  { %v5642_v11 = vpop.f32.mrf.mxu2 }
 0x3aa   :  { %6023 = vmatmul.bf16.vlgmr.msrb.gmra.mxu2 %v5725_v42  ;;  %v5643_v21 = vadd.f32 %v5642_v11, %v5629_v13 }
 0x3bb   :  { %v5654_v58 = vpop.f32.mrf.mxu0 }
 0x3bc   :  { %v5655_v30 = vadd.f32 %v5654_v58, %v5641_v14 }
 0x3be   :  { %v5669_v17 = vadd.f32 %v5668_v38, %v5655_v30 }
 0x3c0   :  { %v5683_v8 = vadd.f32 %v5682_v27, %v5669_v17 }
 0x3c1   :  { %v5696_v15 = vpop.f32.mrf.mxu2 }
 0x3c2   :  { %v5697_v26 = vadd.f32 %v5696_v15, %v5683_v8 }
 0x3c3   :  { %v5656_v10 = vpop.f32.mrf.mxu0 }
 0x3c4   :  { %v5657_v45 = vadd.f32 %v5656_v10, %v5643_v21 }
 0x3c6   :  { %v5671_v20 = vadd.f32 %v5670_v16, %v5657_v45 }
 0x3c8   :  { %v5685_v24 = vadd.f32 %v5684_v22, %v5671_v20 }
 0x3c9   :  { %v5698_v25 = vpop.f32.mrf.mxu2 }
 0x3ca   :  { %v5699_v18 = vadd.f32 %v5698_v25, %v5685_v24 }
 0x3cd   :  { %v5996_v32 = vpop.f32.mrf.mxu3 }
 0x3ce   :  { %v5997_v39 = vadd.f32 %v9762_v33, %v5996_v32 }
 0x3d5   :  { %v5998_v43 = vpop.f32.mrf.mxu3 }
 0x3d6   :  { %v5999_v47 = vadd.f32 %v9762_v33, %v5998_v43 }
 0x3db   :  { %v5710_v55 = vpop.f32.mrf.mxu0 }
 0x3dc   :  { %v5711_v52 = vadd.f32 %v5710_v55, %v5697_v26 }
 0x3de   :  { %v5718_v4 = vmax.f32 %v5711_v52, 0.0 }
 0x3e3   :  { %v5712_v50 = vpop.f32.mrf.mxu0 }
 0x3e4   :  { %v5713_v28 = vadd.f32 %v5712_v50, %v5699_v18 }
 0x3e6   :  { %v5722_v29 = vmax.f32 %v5713_v28, 0.0 }
 0x3e7   :  { %v6010_v34 = vpop.f32.mrf.mxu1 }
 0x3e8   :  { %v5726_v31 = vpack.c.bf16 %v5722_v29, %v5718_v4  ;;  %v6011_v9 = vadd.f32 %v6010_v34, %v5997_v39 }
 0x3ea   :  { %6037 = vmatmul.bf16.vlgmr.msrb.gmra.mxu0 %v5726_v31 }
 0x3ef   :  { %v6012_v7 = vpop.f32.mrf.mxu1 }
 0x3f0   :  { %v6013_v49 = vadd.f32 %v6012_v7, %v5999_v47 }
 0x42d   :  { %v6024_v36 = vpop.f32.mrf.mxu2 }
 0x42e   :  { %v6025_v41 = vadd.f32 %v6024_v36, %v6011_v9 }
 0x435   :  { %v6026_v48 = vpop.f32.mrf.mxu2 }
 0x436   :  { %v6027_v53 = vadd.f32 %v6026_v48, %v6013_v49 }
 0x467   :  { %v6038_v44 = vpop.f32.mrf.mxu0 }
 0x468   :  { %v6039_v46 = vadd.f32 %v6038_v44, %v6025_v41 }
 0x46a   :  { %6043 = vst [vmem:[%s10284_s9] sm:$0xff] %v6039_v46 }
 0x46f   :  { %v6040_v56 = vpop.f32.mrf.mxu0 }
 0x470   :  { %v6041_v60 = vadd.f32 %v6040_v56, %v6027_v53 }
 0x472   :  { %6044 = vst [vmem:[%s10284_s9 + $0x8] sm:$0xff] %v6041_v60 }
 0x473   :  { %6049 = vsyncpa [#allocation3], 1 }
 0x474   :  { %6050 = vsyncpa [#allocation5], 1 }

</bundles_post_ra>
